<compile_context>
chip_gen: v6e
topology: v6e:2x2x1
jax: 0.10.0
libtpu: 0.0.40
codegen_flags: <defaults>
</compile_context>

<pallas_src>
import functools
import math

import jax
import jax.numpy as jnp
from jax.experimental import pallas as pl
from jax.experimental.pallas import tpu as pltpu

EPS = 1e-3                  # BatchNorm eps of the PyTorch module
TM_MM = 256                 # matmul M tile
TN_MM = 512                 # matmul N tile (v7x-safe)
TK_MM = 512                 # matmul K tile (v7x-safe)
TM_EW = 512                 # elementwise row tile (HBM-bandwidth bound)
VMEM_LIMIT = 48 * 1024 * 1024


def _round_up(x, m):
    return (x + m - 1) // m * m


# --------------------------------------------------------------------------
# Pallas kernels
# --------------------------------------------------------------------------

def _mm_stats_kernel(x_ref, w_ref, o_ref, sum_ref, sq_ref, acc_ref):
    """Tiled bf16 matmul with f32 accumulation.  Per-channel sum / sum^2 of the
    result are fused into the k==last epilogue (accumulated across the M grid
    axis).  grid = (N tiles, M tiles, K tiles)."""
    i = pl.program_id(1)          # M tile index
    k = pl.program_id(2)          # K tile index

    @pl.when(k == 0)
    def _():
        acc_ref[...] = jnp.zeros_like(acc_ref)

    @pl.when(jnp.logical_and(i == 0, k == 0))
    def _():
        sum_ref[...] = jnp.zeros_like(sum_ref)
        sq_ref[...] = jnp.zeros_like(sq_ref)

    acc_ref[...] += jnp.dot(x_ref[...], w_ref[...],
                            preferred_element_type=jnp.float32)

    @pl.when(k == pl.num_programs(2) - 1)
    def _():
        y = acc_ref[...]
        o_ref[...] = y
        sum_ref[...] += jnp.sum(y, axis=0, keepdims=True)
        sq_ref[...] += jnp.sum(y * y, axis=0, keepdims=True)


def _affine_act_kernel(x_ref, scale_ref, shift_ref, o_ref, *, act):
    # y = act(x * scale + shift)   (scale/shift fold BN or bias)
    y = x_ref[...] * scale_ref[...] + shift_ref[...]
    if act == "lrelu":
        y = jnp.where(y >= 0, y, 0.2 * y)
    elif act == "relu":
        y = jnp.maximum(y, 0.0)
    elif act == "tanh":
        y = jnp.tanh(y)
    o_ref[...] = y.astype(o_ref.dtype)


# --------------------------------------------------------------------------
# Pallas wrappers
# --------------------------------------------------------------------------

def pallas_matmul_stats(x, w):
    """x:(M,K), w:(K,N) -> (y:(Mp,Np) f32, sum:(1,Np) f32, sumsq:(1,Np) f32).

    Inputs are cast to bf16 (f32 MXU accumulation).  Padded rows / columns are
    exactly zero, so the fused statistics only need division by the real count
    on the host side."""
    M, K = x.shape
    K2, N = w.shape
    assert K == K2

    tile_m = min(TM_MM, _round_up(M, 8))
    tile_n = min(TN_MM, _round_up(N, 128))
    if K <= TK_MM and K % 8 == 0:
        tile_k = K                                # full-K block: no K pad copy
    else:
        tile_k = TK_MM if K > TK_MM else _round_up(K, 128)
    Mp = _round_up(M, tile_m)
    Kp = _round_up(K, tile_k)
    Np = _round_up(N, tile_n)

    xb = x.astype(jnp.bfloat16)
    wb = w.astype(jnp.bfloat16)
    if (Mp, Kp) != (M, K):
        xb = jnp.pad(xb, ((0, Mp - M), (0, Kp - K)))
    if (Kp, Np) != (K, N):
        wb = jnp.pad(wb, ((0, Kp - K), (0, Np - N)))

    grid = (Np // tile_n, Mp // tile_m, Kp // tile_k)
    cost = pl.CostEstimate(
        flops=2 * Mp * Kp * Np,
        transcendentals=0,
        bytes_accessed=int(xb.size) * 2 * (Np // tile_n)
        + int(wb.size) * 2 * (Mp // tile_m)
        + Mp * Np * 4 + 2 * Np * 4,
    )

    y, s, sq = pl.pallas_call(
        _mm_stats_kernel,
        out_shape=(jax.ShapeDtypeStruct((Mp, Np), jnp.float32),
                   jax.ShapeDtypeStruct((1, Np), jnp.float32),
                   jax.ShapeDtypeStruct((1, Np), jnp.float32)),
        grid=grid,
        in_specs=[pl.BlockSpec((tile_m, tile_k), lambda j, i, k: (i, k)),
                  pl.BlockSpec((tile_k, tile_n), lambda j, i, k: (k, j))],
        out_specs=(pl.BlockSpec((tile_m, tile_n), lambda j, i, k: (i, j)),
                   pl.BlockSpec((1, tile_n), lambda j, i, k: (0, j)),
                   pl.BlockSpec((1, tile_n), lambda j, i, k: (0, j))),
        scratch_shapes=[pltpu.VMEM((tile_m, tile_n), jnp.float32)],
        compiler_params=pltpu.CompilerParams(
            dimension_semantics=("parallel", "arbitrary", "arbitrary"),
            vmem_limit_bytes=VMEM_LIMIT),
        cost_estimate=cost,
    )(xb, wb)
    return y, s, sq


def pallas_affine_act(yp, scale, shift, act, out_dtype):
    """y = act(yp * scale + shift), wide row tiles, configurable output dtype."""
    Mp, Np = yp.shape
    tile_r = math.gcd(Mp, TM_EW)          # Mp is always a multiple of 8
    kern = functools.partial(_affine_act_kernel, act=act)
    return pl.pallas_call(
        kern,
        out_shape=jax.ShapeDtypeStruct((Mp, Np), out_dtype),
        grid=(Mp // tile_r,),
        in_specs=[pl.BlockSpec((tile_r, Np), lambda i: (i, 0)),
                  pl.BlockSpec((1, Np), lambda i: (0, 0)),
                  pl.BlockSpec((1, Np), lambda i: (0, 0))],
        out_specs=pl.BlockSpec((tile_r, Np), lambda i: (i, 0)),
        compiler_params=pltpu.CompilerParams(
            dimension_semantics=("parallel",),
            vmem_limit_bytes=VMEM_LIMIT),
    )(yp, scale, shift)


# --------------------------------------------------------------------------
# Conv / ConvTranspose building blocks (im2col glue in JAX, matmul in Pallas)
# --------------------------------------------------------------------------

# TODO(synk): pull im2col into the matmul kernel (grid over kh/kw with offset
# index_maps) to avoid materializing the K*K-blown-up patch matrix in HBM.
def _extract_patches(xpad, K, stride, Hout, Wout):
    """xpad:(N,Hp,Wp,C) -> (N*Hout*Wout, K*K*C), minor order (kh, kw, c)."""
    cols = []
    for kh in range(K):
        for kw in range(K):
            cols.append(xpad[:, kh:kh + stride * (Hout - 1) + 1:stride,
                             kw:kw + stride * (Wout - 1) + 1:stride, :])
    p = jnp.concatenate(cols, axis=-1)
    return p.reshape(-1, K * K * xpad.shape[-1])


def _bn_scale_shift(s, sq, count, gamma, beta, Cout, Np):
    mean = s / count
    var = jnp.maximum(sq / count - mean * mean, 0.0)   # biased var (BN training)
    g = jnp.zeros((1, Np), jnp.float32).at[0, :Cout].set(gamma)
    b = jnp.zeros((1, Np), jnp.float32).at[0, :Cout].set(beta)
    scale = g * jax.lax.rsqrt(var + EPS)
    shift = b - mean * scale
    return scale, shift


def conv_bn_act(x, w, gamma, beta, act, *, stride=2, pad=1, K=4):
    """Conv2d(no bias) + BatchNorm(batch stats) + activation.
    x:(N,H,W,Cin) NHWC (bf16), w:(Cout,Cin,K,K) PyTorch layout."""
    N, H, W, Cin = x.shape
    Cout = w.shape[0]
    Hout = (H + 2 * pad - K) // stride + 1
    Wout = (W + 2 * pad - K) // stride + 1
    xpad = jnp.pad(x, ((0, 0), (pad, pad), (pad, pad), (0, 0)))
    patches = _extract_patches(xpad, K, stride, Hout, Wout)
    wmat = jnp.transpose(w, (2, 3, 1, 0)).reshape(K * K * Cin, Cout)
    M = N * Hout * Wout

    yp, s, sq = pallas_matmul_stats(patches, wmat)
    Np_ = yp.shape[1]
    scale, shift = _bn_scale_shift(s, sq, float(M), gamma, beta, Cout, Np_)
    out = pallas_affine_act(yp, scale, shift, act, jnp.bfloat16)
    return out[:M, :Cout].reshape(N, Hout, Wout, Cout)


# kernel-tap indices used by even / odd output positions of a 4x4 / stride-2 /
# pad-1 transposed conv:  y[2m]   = x[m-1]*w[3] + x[m]*w[1]
#                         y[2m+1] = x[m]  *w[2] + x[m+1]*w[0]
_SEL = ((3, 1), (2, 0))


def _subpixel_convT_matmuls(x, w_t):
    """ConvTranspose2d(4x4, stride=2, pad=1) as 4 stride-1 2x2 convolutions on
    the un-dilated input (one per output-pixel parity), each lowered to an MXU
    matmul with fused BN statistics.  x:(N,H,W,Cin), w_t:(Cin,Cout,4,4)."""
    N, H, W, Cin = x.shape
    Cout = w_t.shape[1]
    results = []
    for dy in range(2):
        for dx in range(2):
            ph = (1, 0) if dy == 0 else (0, 1)
            pw = (1, 0) if dx == 0 else (0, 1)
            xp = jnp.pad(x, ((0, 0), ph, pw, (0, 0)))
            patches = _extract_patches(xp, 2, 1, H, W)
            sel_h = jnp.array(_SEL[dy])
            sel_w = jnp.array(_SEL[dx])
            w_sub = w_t[:, :, sel_h, :][:, :, :, sel_w]      # (Cin,Cout,2,2)
            wmat = jnp.transpose(w_sub, (2, 3, 0, 1)).reshape(4 * Cin, Cout)
            results.append(pallas_matmul_stats(patches, wmat))
    return results, N, H, W, Cout


def _interleave_subpixel(subs_nhwc, N, H, W, Cout):
    # subs in (dy, dx) order -> out[n, 2h+dy, 2w+dx, c]
    st = jnp.stack(subs_nhwc, axis=0).reshape(2, 2, N, H, W, Cout)
    return jnp.transpose(st, (2, 3, 0, 4, 1, 5)).reshape(N, 2 * H, 2 * W, Cout)


def convT_bn_act(x, w_t, gamma, beta, act):
    results, N, H, W, Cout = _subpixel_convT_matmuls(x, w_t)
    M = N * H * W
    Np_ = results[0][0].shape[1]
    s = sum(r[1] for r in results)
    sq = sum(r[2] for r in results)
    scale, shift = _bn_scale_shift(s, sq, float(4 * M), gamma, beta, Cout, Np_)
    subs = []
    for (yp, _, _) in results:
        o = pallas_affine_act(yp, scale, shift, act, jnp.bfloat16)
        subs.append(o[:M, :Cout].reshape(N, H, W, Cout))
    return _interleave_subpixel(subs, N, H, W, Cout)


def convT_bias_tanh(x, w_t, bias):
    results, N, H, W, Cout = _subpixel_convT_matmuls(x, w_t)
    M = N * H * W
    Np_ = results[0][0].shape[1]
    scale = jnp.ones((1, Np_), jnp.float32)
    shift = jnp.zeros((1, Np_), jnp.float32).at[0, :Cout].set(bias)
    subs = []
    for (yp, _, _) in results:
        o = pallas_affine_act(yp, scale, shift, "tanh", jnp.float32)
        subs.append(o[:M, :Cout].reshape(N, H, W, Cout))
    return _interleave_subpixel(subs, N, H, W, Cout)


# --------------------------------------------------------------------------
# AttGANGenerator parameters + forward (mirrors the PyTorch __init__/forward)
# --------------------------------------------------------------------------

def init_attgan_params(key, *, enc_dim=64, enc_layers=5, dec_dim=64,
                       dec_layers=5, n_attrs=13, shortcut_layers=1,
                       inject_layers=1, img_size=128):
    MAX_DIM = 1024
    params = {
        "enc": [], "dec": [],
        "shortcut": min(shortcut_layers, dec_layers - 1),
        "inject": min(inject_layers, dec_layers - 1),
        "f_size": img_size // 2 ** enc_layers,
        "n_attrs": n_attrs, "dec_layers": dec_layers,
    }
    n_in = 3
    for i in range(enc_layers):
        n_out = min(enc_dim * 2 ** i, MAX_DIM)
        key, k1, k2, k3 = jax.random.split(key, 4)
        w = 0.05 * jax.random.normal(k1, (n_out, n_in, 4, 4), jnp.float32)
        gamma = 1.0 + 0.1 * jax.random.normal(k2, (n_out,), jnp.float32)
        beta = 0.1 * jax.random.normal(k3, (n_out,), jnp.float32)
        params["enc"].append((w, gamma, beta))
        n_in = n_out

    n_in = n_in + n_attrs
    for i in range(dec_layers):
        if i < dec_layers - 1:
            n_out = min(dec_dim * 2 ** (dec_layers - i - 1), MAX_DIM)
            key, k1, k2, k3 = jax.random.split(key, 4)
            w = 0.05 * jax.random.normal(k1, (n_in, n_out, 4, 4), jnp.float32)
            gamma = 1.0 + 0.1 * jax.random.normal(k2, (n_out,), jnp.float32)
            beta = 0.1 * jax.random.normal(k3, (n_out,), jnp.float32)
            params["dec"].append(("bn_relu", w, gamma, beta))
            n_in = n_out
            n_in = n_in + n_in // 2 if params["shortcut"] > i else n_in
            n_in = n_in + n_attrs if params["inject"] > i else n_in
        else:
            key, k1, k2 = jax.random.split(key, 3)
            w = 0.05 * jax.random.normal(k1, (n_in, 3, 4, 4), jnp.float32)
            bias = 0.1 * jax.random.normal(k2, (3,), jnp.float32)
            params["dec"].append(("tanh", w, bias))
    return params


def attgan_forward(params, x_nchw, a):
    """enc-dec forward.  x_nchw:(B,3,H,W), a:(B,n_attrs) -> (B,3,H,W)."""
    x = jnp.transpose(x_nchw, (0, 2, 3, 1)).astype(jnp.bfloat16)   # -> NHWC
    B = x.shape[0]
    n_attrs = params["n_attrs"]
    f = params["f_size"]
    dec_layers = params["dec_layers"]

    # ---- encode ----
    zs = []
    z = x
    for (w, gamma, beta) in params["enc"]:
        z = conv_bn_act(z, w, gamma, beta, "lrelu")
        zs.append(z)

    # ---- decode ----
    a_tile = jnp.broadcast_to(a.reshape(B, 1, 1, n_attrs).astype(z.dtype),
                              (B, f, f, n_attrs))
    z = jnp.concatenate([zs[-1], a_tile], axis=-1)
    for i, layer in enumerate(params["dec"]):
        if layer[0] == "bn_relu":
            _, w, gamma, beta = layer
            z = convT_bn_act(z, w, gamma, beta, "relu")
        else:
            _, w, bias = layer
            z = convT_bias_tanh(z, w, bias)
        if params["shortcut"] > i:
            z = jnp.concatenate([z, zs[dec_layers - 2 - i]], axis=-1)
        if params["inject"] > i:
            s = f * 2 ** (i + 1)
            a_t = jnp.broadcast_to(a.reshape(B, 1, 1, n_attrs).astype(z.dtype),
                                   (B, s, s, n_attrs))
            z = jnp.concatenate([z, a_t], axis=-1)
    return jnp.transpose(z, (0, 3, 1, 2))                          # -> NCHW


# TODO(synk): BatchNorm running-stat bookkeeping (momentum=None cumulative
# average) is stateful training machinery and is not reproduced; the forward
# uses batch statistics exactly as a fresh PyTorch module in train mode does.

if __name__ == "__main__":
    key = jax.random.PRNGKey(0)
    kp, kx, ka = jax.random.split(key, 3)

    # Small configuration consistent with the module's constructor arguments.
    cfg = dict(enc_dim=8, enc_layers=3, dec_dim=8, dec_layers=3,
               n_attrs=4, shortcut_layers=1, inject_layers=1, img_size=32)
    params = init_attgan_params(kp, **cfg)

    x = jax.random.normal(kx, (2, 3, 32, 32), jnp.float32)   # NCHW like PyTorch
    a = jax.random.normal(ka, (2, 4), jnp.float32)

    fwd = jax.jit(lambda xx, aa: attgan_forward(params, xx, aa))
    out = fwd(x, a)
    out = jax.block_until_ready(out)

    assert out.shape == (2, 3, 32, 32), out.shape
    assert bool(jnp.all(jnp.isfinite(out)))
    assert bool(jnp.all(jnp.abs(out) <= 1.0))   # tanh output range
    print("KERNEL_OK")
</pallas_src>

<mosaic_0001>
module attributes {stable_mosaic.version = 11 : i64} {
  func.func @_mm_stats_kernel(%arg0: i32, %arg1: i32, %arg2: i32, %arg3: memref<256x48xbf16, #tpu.memory_space<vmem>>, %arg4: memref<48x128xbf16, #tpu.memory_space<vmem>>, %arg5: memref<256x128xf32, #tpu.memory_space<vmem>>, %arg6: memref<1x128xf32, #tpu.memory_space<vmem>>, %arg7: memref<1x128xf32, #tpu.memory_space<vmem>>, %arg8: memref<256x128xf32, #tpu.memory_space<vmem>>) attributes {dimension_semantics = [#tpu.dimension_semantics<parallel>, #tpu.dimension_semantics<arbitrary>, #tpu.dimension_semantics<arbitrary>], iteration_bounds = array<i64: 1, 2, 1>, scalar_prefetch = 0 : i64, scratch_operands = 1 : i64, tpu.core_type = #tpu.core_type<tc>, window_params = [{transform_indices = @transform_0, window_bounds = array<i64: 256, 48>}, {transform_indices = @transform_1, window_bounds = array<i64: 48, 128>}, {transform_indices = @transform_2, window_bounds = array<i64: 256, 128>}, {transform_indices = @transform_3, window_bounds = array<i64: 1, 128>}, {transform_indices = @transform_4, window_bounds = array<i64: 1, 128>}]} {
    %c0_i32 = arith.constant 0 : i32
    %0 = arith.cmpi eq, %arg2, %c0_i32 : i32
    %1 = arith.extui %0 : i1 to i32
    %c0_i32_0 = arith.constant 0 : i32
    %2 = arith.cmpi ne, %1, %c0_i32_0 : i32
    scf.if %2 {
      %cst_13 = arith.constant 0.000000e+00 : f32
      %17 = vector.broadcast %cst_13 : f32 to vector<256x128xf32>
      %c0_14 = arith.constant 0 : index
      %c0_15 = arith.constant 0 : index
      %18 = vector.load %arg8[%c0_14, %c0_15] : memref<256x128xf32, #tpu.memory_space<vmem>>, vector<256x128xf32>
      tpu.vector_store %arg8[%c0_14, %c0_15], %17 {strides = array<i32>} : memref<256x128xf32, #tpu.memory_space<vmem>>, vector<256x128xf32>,
    } else {
    }
    %c0_i32_1 = arith.constant 0 : i32
    %3 = arith.cmpi eq, %arg1, %c0_i32_1 : i32
    %c0_i32_2 = arith.constant 0 : i32
    %4 = arith.cmpi eq, %arg2, %c0_i32_2 : i32
    %5 = arith.andi %3, %4 : i1
    %6 = arith.extui %5 : i1 to i32
    %c0_i32_3 = arith.constant 0 : i32
    %7 = arith.cmpi ne, %6, %c0_i32_3 : i32
    scf.if %7 {
      %cst_13 = arith.constant 0.000000e+00 : f32
      %17 = vector.broadcast %cst_13 : f32 to vector<1x128xf32>
      %c0_14 = arith.constant 0 : index
      %c0_15 = arith.constant 0 : index
      %18 = vector.load %arg6[%c0_14, %c0_15] : memref<1x128xf32, #tpu.memory_space<vmem>>, vector<1x128xf32>
      tpu.vector_store %arg6[%c0_14, %c0_15], %17 {strides = array<i32>} : memref<1x128xf32, #tpu.memory_space<vmem>>, vector<1x128xf32>,
      %cst_16 = arith.constant 0.000000e+00 : f32
      %19 = vector.broadcast %cst_16 : f32 to vector<1x128xf32>
      %c0_17 = arith.constant 0 : index
      %c0_18 = arith.constant 0 : index
      %20 = vector.load %arg7[%c0_17, %c0_18] : memref<1x128xf32, #tpu.memory_space<vmem>>, vector<1x128xf32>
      tpu.vector_store %arg7[%c0_17, %c0_18], %19 {strides = array<i32>} : memref<1x128xf32, #tpu.memory_space<vmem>>, vector<1x128xf32>,
    } else {
    }
    %c0 = arith.constant 0 : index
    %c0_4 = arith.constant 0 : index
    %8 = vector.load %arg8[%c0, %c0_4] : memref<256x128xf32, #tpu.memory_space<vmem>>, vector<256x128xf32>
    %c0_5 = arith.constant 0 : index
    %c0_6 = arith.constant 0 : index
    %9 = vector.load %arg3[%c0_5, %c0_6] : memref<256x48xbf16, #tpu.memory_space<vmem>>, vector<256x48xbf16>
    %c0_7 = arith.constant 0 : index
    %c0_8 = arith.constant 0 : index
    %10 = vector.load %arg4[%c0_7, %c0_8] : memref<48x128xbf16, #tpu.memory_space<vmem>>, vector<48x128xbf16>
    %cst = arith.constant dense<0.000000e+00> : vector<256x128xf32>
    %11 = tpu.matmul %9, %10, %cst {dimension_numbers = #tpu.dot_dimension_numbers<[1], [0], [0], [1], [0, 0, 1, 1], [], []>} : vector<256x48xbf16>, vector<48x128xbf16>, vector<256x128xf32> -> vector<256x128xf32>
    %12 = arith.addf %8, %11 : vector<256x128xf32>
    %c0_9 = arith.constant 0 : index
    %c0_10 = arith.constant 0 : index
    %13 = vector.load %arg8[%c0_9, %c0_10] : memref<256x128xf32, #tpu.memory_space<vmem>>, vector<256x128xf32>
    tpu.vector_store %arg8[%c0_9, %c0_10], %12 {strides = array<i32>} : memref<256x128xf32, #tpu.memory_space<vmem>>, vector<256x128xf32>,
    %c0_i32_11 = arith.constant 0 : i32
    %14 = arith.cmpi eq, %arg2, %c0_i32_11 : i32
    %15 = arith.extui %14 : i1 to i32
    %c0_i32_12 = arith.constant 0 : i32
    %16 = arith.cmpi ne, %15, %c0_i32_12 : i32
    scf.if %16 {
      %c0_13 = arith.constant 0 : index
      %c0_14 = arith.constant 0 : index
      %17 = vector.load %arg8[%c0_13, %c0_14] : memref<256x128xf32, #tpu.memory_space<vmem>>, vector<256x128xf32>
      %c0_15 = arith.constant 0 : index
      %c0_16 = arith.constant 0 : index
      %18 = vector.load %arg5[%c0_15, %c0_16] : memref<256x128xf32, #tpu.memory_space<vmem>>, vector<256x128xf32>
      tpu.vector_store %arg5[%c0_15, %c0_16], %17 {strides = array<i32>} : memref<256x128xf32, #tpu.memory_space<vmem>>, vector<256x128xf32>,
      %c0_17 = arith.constant 0 : index
      %c0_18 = arith.constant 0 : index
      %19 = vector.load %arg6[%c0_17, %c0_18] : memref<1x128xf32, #tpu.memory_space<vmem>>, vector<1x128xf32>
      %cst_19 = arith.constant dense<0.000000e+00> : vector<128xf32>
      %20 = vector.multi_reduction <add>, %17, %cst_19 [0] : vector<256x128xf32> to vector<128xf32>
      %21 = vector.shape_cast %20 : vector<128xf32> to vector<1x128xf32>
      %22 = arith.addf %19, %21 : vector<1x128xf32>
      %c0_20 = arith.constant 0 : index
      %c0_21 = arith.constant 0 : index
      %23 = vector.load %arg6[%c0_20, %c0_21] : memref<1x128xf32, #tpu.memory_space<vmem>>, vector<1x128xf32>
      tpu.vector_store %arg6[%c0_20, %c0_21], %22 {strides = array<i32>} : memref<1x128xf32, #tpu.memory_space<vmem>>, vector<1x128xf32>,
      %c0_22 = arith.constant 0 : index
      %c0_23 = arith.constant 0 : index
      %24 = vector.load %arg7[%c0_22, %c0_23] : memref<1x128xf32, #tpu.memory_space<vmem>>, vector<1x128xf32>
      %25 = arith.mulf %17, %17 : vector<256x128xf32>
      %cst_24 = arith.constant dense<0.000000e+00> : vector<128xf32>
      %26 = vector.multi_reduction <add>, %25, %cst_24 [0] : vector<256x128xf32> to vector<128xf32>
      %27 = vector.shape_cast %26 : vector<128xf32> to vector<1x128xf32>
      %28 = arith.addf %24, %27 : vector<1x128xf32>
      %c0_25 = arith.constant 0 : index
      %c0_26 = arith.constant 0 : index
      %29 = vector.load %arg7[%c0_25, %c0_26] : memref<1x128xf32, #tpu.memory_space<vmem>>, vector<1x128xf32>
      tpu.vector_store %arg7[%c0_25, %c0_26], %28 {strides = array<i32>} : memref<1x128xf32, #tpu.memory_space<vmem>>, vector<1x128xf32>,
    } else {
    }
    return
  }
  func.func @transform_0(%arg0: i32, %arg1: i32, %arg2: i32) -> (i32, i32) {
    %c0_i32 = arith.constant 0 : i32
    return %arg1, %arg2 : i32, i32
  }
  func.func @transform_1(%arg0: i32, %arg1: i32, %arg2: i32) -> (i32, i32) {
    %c0_i32 = arith.constant 0 : i32
    return %arg2, %arg0 : i32, i32
  }
  func.func @transform_2(%arg0: i32, %arg1: i32, %arg2: i32) -> (i32, i32) {
    %c0_i32 = arith.constant 0 : i32
    return %arg1, %arg0 : i32, i32
  }
  func.func @transform_3(%arg0: i32, %arg1: i32, %arg2: i32) -> (i32, i32) {
    %c0_i32 = arith.constant 0 : i32
    %c0_i32_0 = arith.constant 0 : i32
    return %c0_i32, %arg0 : i32, i32
  }
  func.func @transform_4(%arg0: i32, %arg1: i32, %arg2: i32) -> (i32, i32) {
    %c0_i32 = arith.constant 0 : i32
    %c0_i32_0 = arith.constant 0 : i32
    return %c0_i32, %arg0 : i32, i32
  }
}

module attributes {stable_mosaic.version = 11 : i64} {
  func.func @_affine_act_kernel(%arg0: i32, %arg1: memref<512x128xf32, #tpu.memory_space<vmem>>, %arg2: memref<1x128xf32, #tpu.memory_space<vmem>>, %arg3: memref<1x128xf32, #tpu.memory_space<vmem>>, %arg4: memref<512x128xbf16, #tpu.memory_space<vmem>>) attributes {dimension_semantics = [#tpu.dimension_semantics<parallel>], iteration_bounds = array<i64: 1>, scalar_prefetch = 0 : i64, scratch_operands = 0 : i64, tpu.core_type = #tpu.core_type<tc>, window_params = [{transform_indices = @transform_0, window_bounds = array<i64: 512, 128>}, {pipeline_mode = #tpu.pipeline_mode<synchronous>, transform_indices = @transform_1, window_bounds = array<i64: 1, 128>}, {pipeline_mode = #tpu.pipeline_mode<synchronous>, transform_indices = @transform_2, window_bounds = array<i64: 1, 128>}, {transform_indices = @transform_3, window_bounds = array<i64: 512, 128>}]} {
    %c0 = arith.constant 0 : index
    %c0_0 = arith.constant 0 : index
    %0 = vector.load %arg1[%c0, %c0_0] : memref<512x128xf32, #tpu.memory_space<vmem>>, vector<512x128xf32>
    %c0_1 = arith.constant 0 : index
    %c0_2 = arith.constant 0 : index
    %1 = vector.load %arg2[%c0_1, %c0_2] : memref<1x128xf32, #tpu.memory_space<vmem>>, vector<1x128xf32>
    %2 = vector.broadcast %1 : vector<1x128xf32> to vector<512x128xf32>
    %3 = arith.mulf %0, %2 : vector<512x128xf32>
    %c0_3 = arith.constant 0 : index
    %c0_4 = arith.constant 0 : index
    %4 = vector.load %arg3[%c0_3, %c0_4] : memref<1x128xf32, #tpu.memory_space<vmem>>, vector<1x128xf32>
    %5 = vector.broadcast %4 : vector<1x128xf32> to vector<512x128xf32>
    %6 = arith.addf %3, %5 : vector<512x128xf32>
    %cst = arith.constant 0.000000e+00 : f32
    %7 = vector.broadcast %cst : f32 to vector<512x128xf32>
    %8 = arith.cmpf oge, %6, %7 : vector<512x128xf32>
    %cst_5 = arith.constant 2.000000e-01 : f32
    %9 = vector.broadcast %cst_5 : f32 to vector<512x128xf32>
    %10 = arith.mulf %9, %6 : vector<512x128xf32>
    %11 = arith.select %8, %6, %10 : vector<512x128xi1>, vector<512x128xf32>
    %12 = arith.truncf %11 : vector<512x128xf32> to vector<512x128xbf16>
    %c0_6 = arith.constant 0 : index
    %c0_7 = arith.constant 0 : index
    %13 = vector.load %arg4[%c0_6, %c0_7] : memref<512x128xbf16, #tpu.memory_space<vmem>>, vector<512x128xbf16>
    tpu.vector_store %arg4[%c0_6, %c0_7], %12 {strides = array<i32>} : memref<512x128xbf16, #tpu.memory_space<vmem>>, vector<512x128xbf16>,
    return
  }
  func.func @transform_0(%arg0: i32) -> (i32, i32) {
    %c0_i32 = arith.constant 0 : i32
    %c0_i32_0 = arith.constant 0 : i32
    return %arg0, %c0_i32 : i32, i32
  }
  func.func @transform_1(%arg0: i32) -> (i32, i32) {
    %c0_i32 = arith.constant 0 : i32
    %c0_i32_0 = arith.constant 0 : i32
    %c0_i32_1 = arith.constant 0 : i32
    return %c0_i32, %c0_i32_0 : i32, i32
  }
  func.func @transform_2(%arg0: i32) -> (i32, i32) {
    %c0_i32 = arith.constant 0 : i32
    %c0_i32_0 = arith.constant 0 : i32
    %c0_i32_1 = arith.constant 0 : i32
    return %c0_i32, %c0_i32_0 : i32, i32
  }
  func.func @transform_3(%arg0: i32) -> (i32, i32) {
    %c0_i32 = arith.constant 0 : i32
    %c0_i32_0 = arith.constant 0 : i32
    return %arg0, %c0_i32 : i32, i32
  }
}

module attributes {stable_mosaic.version = 11 : i64} {
  func.func @_mm_stats_kernel(%arg0: i32, %arg1: i32, %arg2: i32, %arg3: memref<128x128xbf16, #tpu.memory_space<vmem>>, %arg4: memref<128x128xbf16, #tpu.memory_space<vmem>>, %arg5: memref<128x128xf32, #tpu.memory_space<vmem>>, %arg6: memref<1x128xf32, #tpu.memory_space<vmem>>, %arg7: memref<1x128xf32, #tpu.memory_space<vmem>>, %arg8: memref<128x128xf32, #tpu.memory_space<vmem>>) attributes {dimension_semantics = [#tpu.dimension_semantics<parallel>, #tpu.dimension_semantics<arbitrary>, #tpu.dimension_semantics<arbitrary>], iteration_bounds = array<i64: 1, 1, 1>, scalar_prefetch = 0 : i64, scratch_operands = 1 : i64, tpu.core_type = #tpu.core_type<tc>, window_params = [{transform_indices = @transform_0, window_bounds = array<i64: 128, 128>}, {transform_indices = @transform_1, window_bounds = array<i64: 128, 128>}, {transform_indices = @transform_2, window_bounds = array<i64: 128, 128>}, {transform_indices = @transform_3, window_bounds = array<i64: 1, 128>}, {transform_indices = @transform_4, window_bounds = array<i64: 1, 128>}]} {
    %c0_i32 = arith.constant 0 : i32
    %0 = arith.cmpi eq, %arg2, %c0_i32 : i32
    %1 = arith.extui %0 : i1 to i32
    %c0_i32_0 = arith.constant 0 : i32
    %2 = arith.cmpi ne, %1, %c0_i32_0 : i32
    scf.if %2 {
      %cst_13 = arith.constant 0.000000e+00 : f32
      %17 = vector.broadcast %cst_13 : f32 to vector<128x128xf32>
      %c0_14 = arith.constant 0 : index
      %c0_15 = arith.constant 0 : index
      %18 = vector.load %arg8[%c0_14, %c0_15] : memref<128x128xf32, #tpu.memory_space<vmem>>, vector<128x128xf32>
      tpu.vector_store %arg8[%c0_14, %c0_15], %17 {strides = array<i32>} : memref<128x128xf32, #tpu.memory_space<vmem>>, vector<128x128xf32>,
    } else {
    }
    %c0_i32_1 = arith.constant 0 : i32
    %3 = arith.cmpi eq, %arg1, %c0_i32_1 : i32
    %c0_i32_2 = arith.constant 0 : i32
    %4 = arith.cmpi eq, %arg2, %c0_i32_2 : i32
    %5 = arith.andi %3, %4 : i1
    %6 = arith.extui %5 : i1 to i32
    %c0_i32_3 = arith.constant 0 : i32
    %7 = arith.cmpi ne, %6, %c0_i32_3 : i32
    scf.if %7 {
      %cst_13 = arith.constant 0.000000e+00 : f32
      %17 = vector.broadcast %cst_13 : f32 to vector<1x128xf32>
      %c0_14 = arith.constant 0 : index
      %c0_15 = arith.constant 0 : index
      %18 = vector.load %arg6[%c0_14, %c0_15] : memref<1x128xf32, #tpu.memory_space<vmem>>, vector<1x128xf32>
      tpu.vector_store %arg6[%c0_14, %c0_15], %17 {strides = array<i32>} : memref<1x128xf32, #tpu.memory_space<vmem>>, vector<1x128xf32>,
      %cst_16 = arith.constant 0.000000e+00 : f32
      %19 = vector.broadcast %cst_16 : f32 to vector<1x128xf32>
      %c0_17 = arith.constant 0 : index
      %c0_18 = arith.constant 0 : index
      %20 = vector.load %arg7[%c0_17, %c0_18] : memref<1x128xf32, #tpu.memory_space<vmem>>, vector<1x128xf32>
      tpu.vector_store %arg7[%c0_17, %c0_18], %19 {strides = array<i32>} : memref<1x128xf32, #tpu.memory_space<vmem>>, vector<1x128xf32>,
    } else {
    }
    %c0 = arith.constant 0 : index
    %c0_4 = arith.constant 0 : index
    %8 = vector.load %arg8[%c0, %c0_4] : memref<128x128xf32, #tpu.memory_space<vmem>>, vector<128x128xf32>
    %c0_5 = arith.constant 0 : index
    %c0_6 = arith.constant 0 : index
    %9 = vector.load %arg3[%c0_5, %c0_6] : memref<128x128xbf16, #tpu.memory_space<vmem>>, vector<128x128xbf16>
    %c0_7 = arith.constant 0 : index
    %c0_8 = arith.constant 0 : index
    %10 = vector.load %arg4[%c0_7, %c0_8] : memref<128x128xbf16, #tpu.memory_space<vmem>>, vector<128x128xbf16>
    %cst = arith.constant dense<0.000000e+00> : vector<128x128xf32>
    %11 = tpu.matmul %9, %10, %cst {dimension_numbers = #tpu.dot_dimension_numbers<[1], [0], [0], [1], [0, 0, 1, 1], [], []>} : vector<128x128xbf16>, vector<128x128xbf16>, vector<128x128xf32> -> vector<128x128xf32>
    %12 = arith.addf %8, %11 : vector<128x128xf32>
    %c0_9 = arith.constant 0 : index
    %c0_10 = arith.constant 0 : index
    %13 = vector.load %arg8[%c0_9, %c0_10] : memref<128x128xf32, #tpu.memory_space<vmem>>, vector<128x128xf32>
    tpu.vector_store %arg8[%c0_9, %c0_10], %12 {strides = array<i32>} : memref<128x128xf32, #tpu.memory_space<vmem>>, vector<128x128xf32>,
    %c0_i32_11 = arith.constant 0 : i32
    %14 = arith.cmpi eq, %arg2, %c0_i32_11 : i32
    %15 = arith.extui %14 : i1 to i32
    %c0_i32_12 = arith.constant 0 : i32
    %16 = arith.cmpi ne, %15, %c0_i32_12 : i32
    scf.if %16 {
      %c0_13 = arith.constant 0 : index
      %c0_14 = arith.constant 0 : index
      %17 = vector.load %arg8[%c0_13, %c0_14] : memref<128x128xf32, #tpu.memory_space<vmem>>, vector<128x128xf32>
      %c0_15 = arith.constant 0 : index
      %c0_16 = arith.constant 0 : index
      %18 = vector.load %arg5[%c0_15, %c0_16] : memref<128x128xf32, #tpu.memory_space<vmem>>, vector<128x128xf32>
      tpu.vector_store %arg5[%c0_15, %c0_16], %17 {strides = array<i32>} : memref<128x128xf32, #tpu.memory_space<vmem>>, vector<128x128xf32>,
      %c0_17 = arith.constant 0 : index
      %c0_18 = arith.constant 0 : index
      %19 = vector.load %arg6[%c0_17, %c0_18] : memref<1x128xf32, #tpu.memory_space<vmem>>, vector<1x128xf32>
      %cst_19 = arith.constant dense<0.000000e+00> : vector<128xf32>
      %20 = vector.multi_reduction <add>, %17, %cst_19 [0] : vector<128x128xf32> to vector<128xf32>
      %21 = vector.shape_cast %20 : vector<128xf32> to vector<1x128xf32>
      %22 = arith.addf %19, %21 : vector<1x128xf32>
      %c0_20 = arith.constant 0 : index
      %c0_21 = arith.constant 0 : index
      %23 = vector.load %arg6[%c0_20, %c0_21] : memref<1x128xf32, #tpu.memory_space<vmem>>, vector<1x128xf32>
      tpu.vector_store %arg6[%c0_20, %c0_21], %22 {strides = array<i32>} : memref<1x128xf32, #tpu.memory_space<vmem>>, vector<1x128xf32>,
      %c0_22 = arith.constant 0 : index
      %c0_23 = arith.constant 0 : index
      %24 = vector.load %arg7[%c0_22, %c0_23] : memref<1x128xf32, #tpu.memory_space<vmem>>, vector<1x128xf32>
      %25 = arith.mulf %17, %17 : vector<128x128xf32>
      %cst_24 = arith.constant dense<0.000000e+00> : vector<128xf32>
      %26 = vector.multi_reduction <add>, %25, %cst_24 [0] : vector<128x128xf32> to vector<128xf32>
      %27 = vector.shape_cast %26 : vector<128xf32> to vector<1x128xf32>
      %28 = arith.addf %24, %27 : vector<1x128xf32>
      %c0_25 = arith.constant 0 : index
      %c0_26 = arith.constant 0 : index
      %29 = vector.load %arg7[%c0_25, %c0_26] : memref<1x128xf32, #tpu.memory_space<vmem>>, vector<1x128xf32>
      tpu.vector_store %arg7[%c0_25, %c0_26], %28 {strides = array<i32>} : memref<1x128xf32, #tpu.memory_space<vmem>>, vector<1x128xf32>,
    } else {
    }
    return
  }
  func.func @transform_0(%arg0: i32, %arg1: i32, %arg2: i32) -> (i32, i32) {
    %c0_i32 = arith.constant 0 : i32
    return %arg1, %arg2 : i32, i32
  }
  func.func @transform_1(%arg0: i32, %arg1: i32, %arg2: i32) -> (i32, i32) {
    %c0_i32 = arith.constant 0 : i32
    return %arg2, %arg0 : i32, i32
  }
  func.func @transform_2(%arg0: i32, %arg1: i32, %arg2: i32) -> (i32, i32) {
    %c0_i32 = arith.constant 0 : i32
    return %arg1, %arg0 : i32, i32
  }
  func.func @transform_3(%arg0: i32, %arg1: i32, %arg2: i32) -> (i32, i32) {
    %c0_i32 = arith.constant 0 : i32
    %c0_i32_0 = arith.constant 0 : i32
    return %c0_i32, %arg0 : i32, i32
  }
  func.func @transform_4(%arg0: i32, %arg1: i32, %arg2: i32) -> (i32, i32) {
    %c0_i32 = arith.constant 0 : i32
    %c0_i32_0 = arith.constant 0 : i32
    return %c0_i32, %arg0 : i32, i32
  }
}

module attributes {stable_mosaic.version = 11 : i64} {
  func.func @_affine_act_kernel(%arg0: i32, %arg1: memref<128x128xf32, #tpu.memory_space<vmem>>, %arg2: memref<1x128xf32, #tpu.memory_space<vmem>>, %arg3: memref<1x128xf32, #tpu.memory_space<vmem>>, %arg4: memref<128x128xbf16, #tpu.memory_space<vmem>>) attributes {dimension_semantics = [#tpu.dimension_semantics<parallel>], iteration_bounds = array<i64: 1>, scalar_prefetch = 0 : i64, scratch_operands = 0 : i64, tpu.core_type = #tpu.core_type<tc>, window_params = [{transform_indices = @transform_0, window_bounds = array<i64: 128, 128>}, {pipeline_mode = #tpu.pipeline_mode<synchronous>, transform_indices = @transform_1, window_bounds = array<i64: 1, 128>}, {pipeline_mode = #tpu.pipeline_mode<synchronous>, transform_indices = @transform_2, window_bounds = array<i64: 1, 128>}, {transform_indices = @transform_3, window_bounds = array<i64: 128, 128>}]} {
    %c0 = arith.constant 0 : index
    %c0_0 = arith.constant 0 : index
    %0 = vector.load %arg1[%c0, %c0_0] : memref<128x128xf32, #tpu.memory_space<vmem>>, vector<128x128xf32>
    %c0_1 = arith.constant 0 : index
    %c0_2 = arith.constant 0 : index
    %1 = vector.load %arg2[%c0_1, %c0_2] : memref<1x128xf32, #tpu.memory_space<vmem>>, vector<1x128xf32>
    %2 = vector.broadcast %1 : vector<1x128xf32> to vector<128x128xf32>
    %3 = arith.mulf %0, %2 : vector<128x128xf32>
    %c0_3 = arith.constant 0 : index
    %c0_4 = arith.constant 0 : index
    %4 = vector.load %arg3[%c0_3, %c0_4] : memref<1x128xf32, #tpu.memory_space<vmem>>, vector<1x128xf32>
    %5 = vector.broadcast %4 : vector<1x128xf32> to vector<128x128xf32>
    %6 = arith.addf %3, %5 : vector<128x128xf32>
    %cst = arith.constant 0.000000e+00 : f32
    %7 = vector.broadcast %cst : f32 to vector<128x128xf32>
    %8 = arith.cmpf oge, %6, %7 : vector<128x128xf32>
    %cst_5 = arith.constant 2.000000e-01 : f32
    %9 = vector.broadcast %cst_5 : f32 to vector<128x128xf32>
    %10 = arith.mulf %9, %6 : vector<128x128xf32>
    %11 = arith.select %8, %6, %10 : vector<128x128xi1>, vector<128x128xf32>
    %12 = arith.truncf %11 : vector<128x128xf32> to vector<128x128xbf16>
    %c0_6 = arith.constant 0 : index
    %c0_7 = arith.constant 0 : index
    %13 = vector.load %arg4[%c0_6, %c0_7] : memref<128x128xbf16, #tpu.memory_space<vmem>>, vector<128x128xbf16>
    tpu.vector_store %arg4[%c0_6, %c0_7], %12 {strides = array<i32>} : memref<128x128xbf16, #tpu.memory_space<vmem>>, vector<128x128xbf16>,
    return
  }
  func.func @transform_0(%arg0: i32) -> (i32, i32) {
    %c0_i32 = arith.constant 0 : i32
    %c0_i32_0 = arith.constant 0 : i32
    return %arg0, %c0_i32 : i32, i32
  }
  func.func @transform_1(%arg0: i32) -> (i32, i32) {
    %c0_i32 = arith.constant 0 : i32
    %c0_i32_0 = arith.constant 0 : i32
    %c0_i32_1 = arith.constant 0 : i32
    return %c0_i32, %c0_i32_0 : i32, i32
  }
  func.func @transform_2(%arg0: i32) -> (i32, i32) {
    %c0_i32 = arith.constant 0 : i32
    %c0_i32_0 = arith.constant 0 : i32
    %c0_i32_1 = arith.constant 0 : i32
    return %c0_i32, %c0_i32_0 : i32, i32
  }
  func.func @transform_3(%arg0: i32) -> (i32, i32) {
    %c0_i32 = arith.constant 0 : i32
    %c0_i32_0 = arith.constant 0 : i32
    return %arg0, %c0_i32 : i32, i32
  }
}

module attributes {stable_mosaic.version = 11 : i64} {
  func.func @_affine_act_kernel(%arg0: i32, %arg1: memref<32x128xf32, #tpu.memory_space<vmem>>, %arg2: memref<1x128xf32, #tpu.memory_space<vmem>>, %arg3: memref<1x128xf32, #tpu.memory_space<vmem>>, %arg4: memref<32x128xbf16, #tpu.memory_space<vmem>>) attributes {dimension_semantics = [#tpu.dimension_semantics<parallel>], iteration_bounds = array<i64: 1>, scalar_prefetch = 0 : i64, scratch_operands = 0 : i64, tpu.core_type = #tpu.core_type<tc>, window_params = [{transform_indices = @transform_0, window_bounds = array<i64: 32, 128>}, {pipeline_mode = #tpu.pipeline_mode<synchronous>, transform_indices = @transform_1, window_bounds = array<i64: 1, 128>}, {pipeline_mode = #tpu.pipeline_mode<synchronous>, transform_indices = @transform_2, window_bounds = array<i64: 1, 128>}, {transform_indices = @transform_3, window_bounds = array<i64: 32, 128>}]} {
    %c0 = arith.constant 0 : index
    %c0_0 = arith.constant 0 : index
    %0 = vector.load %arg1[%c0, %c0_0] : memref<32x128xf32, #tpu.memory_space<vmem>>, vector<32x128xf32>
    %c0_1 = arith.constant 0 : index
    %c0_2 = arith.constant 0 : index
    %1 = vector.load %arg2[%c0_1, %c0_2] : memref<1x128xf32, #tpu.memory_space<vmem>>, vector<1x128xf32>
    %2 = vector.broadcast %1 : vector<1x128xf32> to vector<32x128xf32>
    %3 = arith.mulf %0, %2 : vector<32x128xf32>
    %c0_3 = arith.constant 0 : index
    %c0_4 = arith.constant 0 : index
    %4 = vector.load %arg3[%c0_3, %c0_4] : memref<1x128xf32, #tpu.memory_space<vmem>>, vector<1x128xf32>
    %5 = vector.broadcast %4 : vector<1x128xf32> to vector<32x128xf32>
    %6 = arith.addf %3, %5 : vector<32x128xf32>
    %cst = arith.constant 0.000000e+00 : f32
    %7 = vector.broadcast %cst : f32 to vector<32x128xf32>
    %8 = arith.cmpf oge, %6, %7 : vector<32x128xf32>
    %cst_5 = arith.constant 2.000000e-01 : f32
    %9 = vector.broadcast %cst_5 : f32 to vector<32x128xf32>
    %10 = arith.mulf %9, %6 : vector<32x128xf32>
    %11 = arith.select %8, %6, %10 : vector<32x128xi1>, vector<32x128xf32>
    %12 = arith.truncf %11 : vector<32x128xf32> to vector<32x128xbf16>
    %c0_6 = arith.constant 0 : index
    %c0_7 = arith.constant 0 : index
    %13 = vector.load %arg4[%c0_6, %c0_7] : memref<32x128xbf16, #tpu.memory_space<vmem>>, vector<32x128xbf16>
    tpu.vector_store %arg4[%c0_6, %c0_7], %12 {strides = array<i32>} : memref<32x128xbf16, #tpu.memory_space<vmem>>, vector<32x128xbf16>,
    return
  }
  func.func @transform_0(%arg0: i32) -> (i32, i32) {
    %c0_i32 = arith.constant 0 : i32
    %c0_i32_0 = arith.constant 0 : i32
    return %arg0, %c0_i32 : i32, i32
  }
  func.func @transform_1(%arg0: i32) -> (i32, i32) {
    %c0_i32 = arith.constant 0 : i32
    %c0_i32_0 = arith.constant 0 : i32
    %c0_i32_1 = arith.constant 0 : i32
    return %c0_i32, %c0_i32_0 : i32, i32
  }
  func.func @transform_2(%arg0: i32) -> (i32, i32) {
    %c0_i32 = arith.constant 0 : i32
    %c0_i32_0 = arith.constant 0 : i32
    %c0_i32_1 = arith.constant 0 : i32
    return %c0_i32, %c0_i32_0 : i32, i32
  }
  func.func @transform_3(%arg0: i32) -> (i32, i32) {
    %c0_i32 = arith.constant 0 : i32
    %c0_i32_0 = arith.constant 0 : i32
    return %arg0, %c0_i32 : i32, i32
  }
}

module attributes {stable_mosaic.version = 11 : i64} {
  func.func @_mm_stats_kernel(%arg0: i32, %arg1: i32, %arg2: i32, %arg3: memref<32x256xbf16, #tpu.memory_space<vmem>>, %arg4: memref<256x128xbf16, #tpu.memory_space<vmem>>, %arg5: memref<32x128xf32, #tpu.memory_space<vmem>>, %arg6: memref<1x128xf32, #tpu.memory_space<vmem>>, %arg7: memref<1x128xf32, #tpu.memory_space<vmem>>, %arg8: memref<32x128xf32, #tpu.memory_space<vmem>>) attributes {dimension_semantics = [#tpu.dimension_semantics<parallel>, #tpu.dimension_semantics<arbitrary>, #tpu.dimension_semantics<arbitrary>], iteration_bounds = array<i64: 1, 1, 1>, scalar_prefetch = 0 : i64, scratch_operands = 1 : i64, tpu.core_type = #tpu.core_type<tc>, window_params = [{transform_indices = @transform_0, window_bounds = array<i64: 32, 256>}, {transform_indices = @transform_1, window_bounds = array<i64: 256, 128>}, {transform_indices = @transform_2, window_bounds = array<i64: 32, 128>}, {transform_indices = @transform_3, window_bounds = array<i64: 1, 128>}, {transform_indices = @transform_4, window_bounds = array<i64: 1, 128>}]} {
    %c0_i32 = arith.constant 0 : i32
    %0 = arith.cmpi eq, %arg2, %c0_i32 : i32
    %1 = arith.extui %0 : i1 to i32
    %c0_i32_0 = arith.constant 0 : i32
    %2 = arith.cmpi ne, %1, %c0_i32_0 : i32
    scf.if %2 {
      %cst_13 = arith.constant 0.000000e+00 : f32
      %17 = vector.broadcast %cst_13 : f32 to vector<32x128xf32>
      %c0_14 = arith.constant 0 : index
      %c0_15 = arith.constant 0 : index
      %18 = vector.load %arg8[%c0_14, %c0_15] : memref<32x128xf32, #tpu.memory_space<vmem>>, vector<32x128xf32>
      tpu.vector_store %arg8[%c0_14, %c0_15], %17 {strides = array<i32>} : memref<32x128xf32, #tpu.memory_space<vmem>>, vector<32x128xf32>,
    } else {
    }
    %c0_i32_1 = arith.constant 0 : i32
    %3 = arith.cmpi eq, %arg1, %c0_i32_1 : i32
    %c0_i32_2 = arith.constant 0 : i32
    %4 = arith.cmpi eq, %arg2, %c0_i32_2 : i32
    %5 = arith.andi %3, %4 : i1
    %6 = arith.extui %5 : i1 to i32
    %c0_i32_3 = arith.constant 0 : i32
    %7 = arith.cmpi ne, %6, %c0_i32_3 : i32
    scf.if %7 {
      %cst_13 = arith.constant 0.000000e+00 : f32
      %17 = vector.broadcast %cst_13 : f32 to vector<1x128xf32>
      %c0_14 = arith.constant 0 : index
      %c0_15 = arith.constant 0 : index
      %18 = vector.load %arg6[%c0_14, %c0_15] : memref<1x128xf32, #tpu.memory_space<vmem>>, vector<1x128xf32>
      tpu.vector_store %arg6[%c0_14, %c0_15], %17 {strides = array<i32>} : memref<1x128xf32, #tpu.memory_space<vmem>>, vector<1x128xf32>,
      %cst_16 = arith.constant 0.000000e+00 : f32
      %19 = vector.broadcast %cst_16 : f32 to vector<1x128xf32>
      %c0_17 = arith.constant 0 : index
      %c0_18 = arith.constant 0 : index
      %20 = vector.load %arg7[%c0_17, %c0_18] : memref<1x128xf32, #tpu.memory_space<vmem>>, vector<1x128xf32>
      tpu.vector_store %arg7[%c0_17, %c0_18], %19 {strides = array<i32>} : memref<1x128xf32, #tpu.memory_space<vmem>>, vector<1x128xf32>,
    } else {
    }
    %c0 = arith.constant 0 : index
    %c0_4 = arith.constant 0 : index
    %8 = vector.load %arg8[%c0, %c0_4] : memref<32x128xf32, #tpu.memory_space<vmem>>, vector<32x128xf32>
    %c0_5 = arith.constant 0 : index
    %c0_6 = arith.constant 0 : index
    %9 = vector.load %arg3[%c0_5, %c0_6] : memref<32x256xbf16, #tpu.memory_space<vmem>>, vector<32x256xbf16>
    %c0_7 = arith.constant 0 : index
    %c0_8 = arith.constant 0 : index
    %10 = vector.load %arg4[%c0_7, %c0_8] : memref<256x128xbf16, #tpu.memory_space<vmem>>, vector<256x128xbf16>
    %cst = arith.constant dense<0.000000e+00> : vector<32x128xf32>
    %11 = tpu.matmul %9, %10, %cst {dimension_numbers = #tpu.dot_dimension_numbers<[1], [0], [0], [1], [0, 0, 1, 1], [], []>} : vector<32x256xbf16>, vector<256x128xbf16>, vector<32x128xf32> -> vector<32x128xf32>
    %12 = arith.addf %8, %11 : vector<32x128xf32>
    %c0_9 = arith.constant 0 : index
    %c0_10 = arith.constant 0 : index
    %13 = vector.load %arg8[%c0_9, %c0_10] : memref<32x128xf32, #tpu.memory_space<vmem>>, vector<32x128xf32>
    tpu.vector_store %arg8[%c0_9, %c0_10], %12 {strides = array<i32>} : memref<32x128xf32, #tpu.memory_space<vmem>>, vector<32x128xf32>,
    %c0_i32_11 = arith.constant 0 : i32
    %14 = arith.cmpi eq, %arg2, %c0_i32_11 : i32
    %15 = arith.extui %14 : i1 to i32
    %c0_i32_12 = arith.constant 0 : i32
    %16 = arith.cmpi ne, %15, %c0_i32_12 : i32
    scf.if %16 {
      %c0_13 = arith.constant 0 : index
      %c0_14 = arith.constant 0 : index
      %17 = vector.load %arg8[%c0_13, %c0_14] : memref<32x128xf32, #tpu.memory_space<vmem>>, vector<32x128xf32>
      %c0_15 = arith.constant 0 : index
      %c0_16 = arith.constant 0 : index
      %18 = vector.load %arg5[%c0_15, %c0_16] : memref<32x128xf32, #tpu.memory_space<vmem>>, vector<32x128xf32>
      tpu.vector_store %arg5[%c0_15, %c0_16], %17 {strides = array<i32>} : memref<32x128xf32, #tpu.memory_space<vmem>>, vector<32x128xf32>,
      %c0_17 = arith.constant 0 : index
      %c0_18 = arith.constant 0 : index
      %19 = vector.load %arg6[%c0_17, %c0_18] : memref<1x128xf32, #tpu.memory_space<vmem>>, vector<1x128xf32>
      %cst_19 = arith.constant dense<0.000000e+00> : vector<128xf32>
      %20 = vector.multi_reduction <add>, %17, %cst_19 [0] : vector<32x128xf32> to vector<128xf32>
      %21 = vector.shape_cast %20 : vector<128xf32> to vector<1x128xf32>
      %22 = arith.addf %19, %21 : vector<1x128xf32>
      %c0_20 = arith.constant 0 : index
      %c0_21 = arith.constant 0 : index
      %23 = vector.load %arg6[%c0_20, %c0_21] : memref<1x128xf32, #tpu.memory_space<vmem>>, vector<1x128xf32>
      tpu.vector_store %arg6[%c0_20, %c0_21], %22 {strides = array<i32>} : memref<1x128xf32, #tpu.memory_space<vmem>>, vector<1x128xf32>,
      %c0_22 = arith.constant 0 : index
      %c0_23 = arith.constant 0 : index
      %24 = vector.load %arg7[%c0_22, %c0_23] : memref<1x128xf32, #tpu.memory_space<vmem>>, vector<1x128xf32>
      %25 = arith.mulf %17, %17 : vector<32x128xf32>
      %cst_24 = arith.constant dense<0.000000e+00> : vector<128xf32>
      %26 = vector.multi_reduction <add>, %25, %cst_24 [0] : vector<32x128xf32> to vector<128xf32>
      %27 = vector.shape_cast %26 : vector<128xf32> to vector<1x128xf32>
      %28 = arith.addf %24, %27 : vector<1x128xf32>
      %c0_25 = arith.constant 0 : index
      %c0_26 = arith.constant 0 : index
      %29 = vector.load %arg7[%c0_25, %c0_26] : memref<1x128xf32, #tpu.memory_space<vmem>>, vector<1x128xf32>
      tpu.vector_store %arg7[%c0_25, %c0_26], %28 {strides = array<i32>} : memref<1x128xf32, #tpu.memory_space<vmem>>, vector<1x128xf32>,
    } else {
    }
    return
  }
  func.func @transform_0(%arg0: i32, %arg1: i32, %arg2: i32) -> (i32, i32) {
    %c0_i32 = arith.constant 0 : i32
    return %arg1, %arg2 : i32, i32
  }
  func.func @transform_1(%arg0: i32, %arg1: i32, %arg2: i32) -> (i32, i32) {
    %c0_i32 = arith.constant 0 : i32
    return %arg2, %arg0 : i32, i32
  }
  func.func @transform_2(%arg0: i32, %arg1: i32, %arg2: i32) -> (i32, i32) {
    %c0_i32 = arith.constant 0 : i32
    return %arg1, %arg0 : i32, i32
  }
  func.func @transform_3(%arg0: i32, %arg1: i32, %arg2: i32) -> (i32, i32) {
    %c0_i32 = arith.constant 0 : i32
    %c0_i32_0 = arith.constant 0 : i32
    return %c0_i32, %arg0 : i32, i32
  }
  func.func @transform_4(%arg0: i32, %arg1: i32, %arg2: i32) -> (i32, i32) {
    %c0_i32 = arith.constant 0 : i32
    %c0_i32_0 = arith.constant 0 : i32
    return %c0_i32, %arg0 : i32, i32
  }
}

module attributes {stable_mosaic.version = 11 : i64} {
  func.func @_mm_stats_kernel(%arg0: i32, %arg1: i32, %arg2: i32, %arg3: memref<32x144xbf16, #tpu.memory_space<vmem>>, %arg4: memref<144x128xbf16, #tpu.memory_space<vmem>>, %arg5: memref<32x128xf32, #tpu.memory_space<vmem>>, %arg6: memref<1x128xf32, #tpu.memory_space<vmem>>, %arg7: memref<1x128xf32, #tpu.memory_space<vmem>>, %arg8: memref<32x128xf32, #tpu.memory_space<vmem>>) attributes {dimension_semantics = [#tpu.dimension_semantics<parallel>, #tpu.dimension_semantics<arbitrary>, #tpu.dimension_semantics<arbitrary>], iteration_bounds = array<i64: 1, 1, 1>, scalar_prefetch = 0 : i64, scratch_operands = 1 : i64, tpu.core_type = #tpu.core_type<tc>, window_params = [{transform_indices = @transform_0, window_bounds = array<i64: 32, 144>}, {transform_indices = @transform_1, window_bounds = array<i64: 144, 128>}, {transform_indices = @transform_2, window_bounds = array<i64: 32, 128>}, {transform_indices = @transform_3, window_bounds = array<i64: 1, 128>}, {transform_indices = @transform_4, window_bounds = array<i64: 1, 128>}]} {
    %c0_i32 = arith.constant 0 : i32
    %0 = arith.cmpi eq, %arg2, %c0_i32 : i32
    %1 = arith.extui %0 : i1 to i32
    %c0_i32_0 = arith.constant 0 : i32
    %2 = arith.cmpi ne, %1, %c0_i32_0 : i32
    scf.if %2 {
      %cst_13 = arith.constant 0.000000e+00 : f32
      %17 = vector.broadcast %cst_13 : f32 to vector<32x128xf32>
      %c0_14 = arith.constant 0 : index
      %c0_15 = arith.constant 0 : index
      %18 = vector.load %arg8[%c0_14, %c0_15] : memref<32x128xf32, #tpu.memory_space<vmem>>, vector<32x128xf32>
      tpu.vector_store %arg8[%c0_14, %c0_15], %17 {strides = array<i32>} : memref<32x128xf32, #tpu.memory_space<vmem>>, vector<32x128xf32>,
    } else {
    }
    %c0_i32_1 = arith.constant 0 : i32
    %3 = arith.cmpi eq, %arg1, %c0_i32_1 : i32
    %c0_i32_2 = arith.constant 0 : i32
    %4 = arith.cmpi eq, %arg2, %c0_i32_2 : i32
    %5 = arith.andi %3, %4 : i1
    %6 = arith.extui %5 : i1 to i32
    %c0_i32_3 = arith.constant 0 : i32
    %7 = arith.cmpi ne, %6, %c0_i32_3 : i32
    scf.if %7 {
      %cst_13 = arith.constant 0.000000e+00 : f32
      %17 = vector.broadcast %cst_13 : f32 to vector<1x128xf32>
      %c0_14 = arith.constant 0 : index
      %c0_15 = arith.constant 0 : index
      %18 = vector.load %arg6[%c0_14, %c0_15] : memref<1x128xf32, #tpu.memory_space<vmem>>, vector<1x128xf32>
      tpu.vector_store %arg6[%c0_14, %c0_15], %17 {strides = array<i32>} : memref<1x128xf32, #tpu.memory_space<vmem>>, vector<1x128xf32>,
      %cst_16 = arith.constant 0.000000e+00 : f32
      %19 = vector.broadcast %cst_16 : f32 to vector<1x128xf32>
      %c0_17 = arith.constant 0 : index
      %c0_18 = arith.constant 0 : index
      %20 = vector.load %arg7[%c0_17, %c0_18] : memref<1x128xf32, #tpu.memory_space<vmem>>, vector<1x128xf32>
      tpu.vector_store %arg7[%c0_17, %c0_18], %19 {strides = array<i32>} : memref<1x128xf32, #tpu.memory_space<vmem>>, vector<1x128xf32>,
    } else {
    }
    %c0 = arith.constant 0 : index
    %c0_4 = arith.constant 0 : index
    %8 = vector.load %arg8[%c0, %c0_4] : memref<32x128xf32, #tpu.memory_space<vmem>>, vector<32x128xf32>
    %c0_5 = arith.constant 0 : index
    %c0_6 = arith.constant 0 : index
    %9 = vector.load %arg3[%c0_5, %c0_6] : memref<32x144xbf16, #tpu.memory_space<vmem>>, vector<32x144xbf16>
    %c0_7 = arith.constant 0 : index
    %c0_8 = arith.constant 0 : index
    %10 = vector.load %arg4[%c0_7, %c0_8] : memref<144x128xbf16, #tpu.memory_space<vmem>>, vector<144x128xbf16>
    %cst = arith.constant dense<0.000000e+00> : vector<32x128xf32>
    %11 = tpu.matmul %9, %10, %cst {dimension_numbers = #tpu.dot_dimension_numbers<[1], [0], [0], [1], [0, 0, 1, 1], [], []>} : vector<32x144xbf16>, vector<144x128xbf16>, vector<32x128xf32> -> vector<32x128xf32>
    %12 = arith.addf %8, %11 : vector<32x128xf32>
    %c0_9 = arith.constant 0 : index
    %c0_10 = arith.constant 0 : index
    %13 = vector.load %arg8[%c0_9, %c0_10] : memref<32x128xf32, #tpu.memory_space<vmem>>, vector<32x128xf32>
    tpu.vector_store %arg8[%c0_9, %c0_10], %12 {strides = array<i32>} : memref<32x128xf32, #tpu.memory_space<vmem>>, vector<32x128xf32>,
    %c0_i32_11 = arith.constant 0 : i32
    %14 = arith.cmpi eq, %arg2, %c0_i32_11 : i32
    %15 = arith.extui %14 : i1 to i32
    %c0_i32_12 = arith.constant 0 : i32
    %16 = arith.cmpi ne, %15, %c0_i32_12 : i32
    scf.if %16 {
      %c0_13 = arith.constant 0 : index
      %c0_14 = arith.constant 0 : index
      %17 = vector.load %arg8[%c0_13, %c0_14] : memref<32x128xf32, #tpu.memory_space<vmem>>, vector<32x128xf32>
      %c0_15 = arith.constant 0 : index
      %c0_16 = arith.constant 0 : index
      %18 = vector.load %arg5[%c0_15, %c0_16] : memref<32x128xf32, #tpu.memory_space<vmem>>, vector<32x128xf32>
      tpu.vector_store %arg5[%c0_15, %c0_16], %17 {strides = array<i32>} : memref<32x128xf32, #tpu.memory_space<vmem>>, vector<32x128xf32>,
      %c0_17 = arith.constant 0 : index
      %c0_18 = arith.constant 0 : index
      %19 = vector.load %arg6[%c0_17, %c0_18] : memref<1x128xf32, #tpu.memory_space<vmem>>, vector<1x128xf32>
      %cst_19 = arith.constant dense<0.000000e+00> : vector<128xf32>
      %20 = vector.multi_reduction <add>, %17, %cst_19 [0] : vector<32x128xf32> to vector<128xf32>
      %21 = vector.shape_cast %20 : vector<128xf32> to vector<1x128xf32>
      %22 = arith.addf %19, %21 : vector<1x128xf32>
      %c0_20 = arith.constant 0 : index
      %c0_21 = arith.constant 0 : index
      %23 = vector.load %arg6[%c0_20, %c0_21] : memref<1x128xf32, #tpu.memory_space<vmem>>, vector<1x128xf32>
      tpu.vector_store %arg6[%c0_20, %c0_21], %22 {strides = array<i32>} : memref<1x128xf32, #tpu.memory_space<vmem>>, vector<1x128xf32>,
      %c0_22 = arith.constant 0 : index
      %c0_23 = arith.constant 0 : index
      %24 = vector.load %arg7[%c0_22, %c0_23] : memref<1x128xf32, #tpu.memory_space<vmem>>, vector<1x128xf32>
      %25 = arith.mulf %17, %17 : vector<32x128xf32>
      %cst_24 = arith.constant dense<0.000000e+00> : vector<128xf32>
      %26 = vector.multi_reduction <add>, %25, %cst_24 [0] : vector<32x128xf32> to vector<128xf32>
      %27 = vector.shape_cast %26 : vector<128xf32> to vector<1x128xf32>
      %28 = arith.addf %24, %27 : vector<1x128xf32>
      %c0_25 = arith.constant 0 : index
      %c0_26 = arith.constant 0 : index
      %29 = vector.load %arg7[%c0_25, %c0_26] : memref<1x128xf32, #tpu.memory_space<vmem>>, vector<1x128xf32>
      tpu.vector_store %arg7[%c0_25, %c0_26], %28 {strides = array<i32>} : memref<1x128xf32, #tpu.memory_space<vmem>>, vector<1x128xf32>,
    } else {
    }
    return
  }
  func.func @transform_0(%arg0: i32, %arg1: i32, %arg2: i32) -> (i32, i32) {
    %c0_i32 = arith.constant 0 : i32
    return %arg1, %arg2 : i32, i32
  }
  func.func @transform_1(%arg0: i32, %arg1: i32, %arg2: i32) -> (i32, i32) {
    %c0_i32 = arith.constant 0 : i32
    return %arg2, %arg0 : i32, i32
  }
  func.func @transform_2(%arg0: i32, %arg1: i32, %arg2: i32) -> (i32, i32) {
    %c0_i32 = arith.constant 0 : i32
    return %arg1, %arg0 : i32, i32
  }
  func.func @transform_3(%arg0: i32, %arg1: i32, %arg2: i32) -> (i32, i32) {
    %c0_i32 = arith.constant 0 : i32
    %c0_i32_0 = arith.constant 0 : i32
    return %c0_i32, %arg0 : i32, i32
  }
  func.func @transform_4(%arg0: i32, %arg1: i32, %arg2: i32) -> (i32, i32) {
    %c0_i32 = arith.constant 0 : i32
    %c0_i32_0 = arith.constant 0 : i32
    return %c0_i32, %arg0 : i32, i32
  }
}

module attributes {stable_mosaic.version = 11 : i64} {
  func.func @_affine_act_kernel(%arg0: i32, %arg1: memref<32x128xf32, #tpu.memory_space<vmem>>, %arg2: memref<1x128xf32, #tpu.memory_space<vmem>>, %arg3: memref<1x128xf32, #tpu.memory_space<vmem>>, %arg4: memref<32x128xbf16, #tpu.memory_space<vmem>>) attributes {dimension_semantics = [#tpu.dimension_semantics<parallel>], iteration_bounds = array<i64: 1>, scalar_prefetch = 0 : i64, scratch_operands = 0 : i64, tpu.core_type = #tpu.core_type<tc>, window_params = [{transform_indices = @transform_0, window_bounds = array<i64: 32, 128>}, {pipeline_mode = #tpu.pipeline_mode<synchronous>, transform_indices = @transform_1, window_bounds = array<i64: 1, 128>}, {pipeline_mode = #tpu.pipeline_mode<synchronous>, transform_indices = @transform_2, window_bounds = array<i64: 1, 128>}, {transform_indices = @transform_3, window_bounds = array<i64: 32, 128>}]} {
    %c0 = arith.constant 0 : index
    %c0_0 = arith.constant 0 : index
    %0 = vector.load %arg1[%c0, %c0_0] : memref<32x128xf32, #tpu.memory_space<vmem>>, vector<32x128xf32>
    %c0_1 = arith.constant 0 : index
    %c0_2 = arith.constant 0 : index
    %1 = vector.load %arg2[%c0_1, %c0_2] : memref<1x128xf32, #tpu.memory_space<vmem>>, vector<1x128xf32>
    %2 = vector.broadcast %1 : vector<1x128xf32> to vector<32x128xf32>
    %3 = arith.mulf %0, %2 : vector<32x128xf32>
    %c0_3 = arith.constant 0 : index
    %c0_4 = arith.constant 0 : index
    %4 = vector.load %arg3[%c0_3, %c0_4] : memref<1x128xf32, #tpu.memory_space<vmem>>, vector<1x128xf32>
    %5 = vector.broadcast %4 : vector<1x128xf32> to vector<32x128xf32>
    %6 = arith.addf %3, %5 : vector<32x128xf32>
    %cst = arith.constant 0.000000e+00 : f32
    %7 = vector.broadcast %cst : f32 to vector<32x128xf32>
    %8 = arith.maximumf %6, %7 : vector<32x128xf32>
    %9 = arith.truncf %8 : vector<32x128xf32> to vector<32x128xbf16>
    %c0_5 = arith.constant 0 : index
    %c0_6 = arith.constant 0 : index
    %10 = vector.load %arg4[%c0_5, %c0_6] : memref<32x128xbf16, #tpu.memory_space<vmem>>, vector<32x128xbf16>
    tpu.vector_store %arg4[%c0_5, %c0_6], %9 {strides = array<i32>} : memref<32x128xbf16, #tpu.memory_space<vmem>>, vector<32x128xbf16>,
    return
  }
  func.func @transform_0(%arg0: i32) -> (i32, i32) {
    %c0_i32 = arith.constant 0 : i32
    %c0_i32_0 = arith.constant 0 : i32
    return %arg0, %c0_i32 : i32, i32
  }
  func.func @transform_1(%arg0: i32) -> (i32, i32) {
    %c0_i32 = arith.constant 0 : i32
    %c0_i32_0 = arith.constant 0 : i32
    %c0_i32_1 = arith.constant 0 : i32
    return %c0_i32, %c0_i32_0 : i32, i32
  }
  func.func @transform_2(%arg0: i32) -> (i32, i32) {
    %c0_i32 = arith.constant 0 : i32
    %c0_i32_0 = arith.constant 0 : i32
    %c0_i32_1 = arith.constant 0 : i32
    return %c0_i32, %c0_i32_0 : i32, i32
  }
  func.func @transform_3(%arg0: i32) -> (i32, i32) {
    %c0_i32 = arith.constant 0 : i32
    %c0_i32_0 = arith.constant 0 : i32
    return %arg0, %c0_i32 : i32, i32
  }
}

module attributes {stable_mosaic.version = 11 : i64} {
  func.func @_mm_stats_kernel(%arg0: i32, %arg1: i32, %arg2: i32, %arg3: memref<128x208xbf16, #tpu.memory_space<vmem>>, %arg4: memref<208x128xbf16, #tpu.memory_space<vmem>>, %arg5: memref<128x128xf32, #tpu.memory_space<vmem>>, %arg6: memref<1x128xf32, #tpu.memory_space<vmem>>, %arg7: memref<1x128xf32, #tpu.memory_space<vmem>>, %arg8: memref<128x128xf32, #tpu.memory_space<vmem>>) attributes {dimension_semantics = [#tpu.dimension_semantics<parallel>, #tpu.dimension_semantics<arbitrary>, #tpu.dimension_semantics<arbitrary>], iteration_bounds = array<i64: 1, 1, 1>, scalar_prefetch = 0 : i64, scratch_operands = 1 : i64, tpu.core_type = #tpu.core_type<tc>, window_params = [{transform_indices = @transform_0, window_bounds = array<i64: 128, 208>}, {transform_indices = @transform_1, window_bounds = array<i64: 208, 128>}, {transform_indices = @transform_2, window_bounds = array<i64: 128, 128>}, {transform_indices = @transform_3, window_bounds = array<i64: 1, 128>}, {transform_indices = @transform_4, window_bounds = array<i64: 1, 128>}]} {
    %c0_i32 = arith.constant 0 : i32
    %0 = arith.cmpi eq, %arg2, %c0_i32 : i32
    %1 = arith.extui %0 : i1 to i32
    %c0_i32_0 = arith.constant 0 : i32
    %2 = arith.cmpi ne, %1, %c0_i32_0 : i32
    scf.if %2 {
      %cst_13 = arith.constant 0.000000e+00 : f32
      %17 = vector.broadcast %cst_13 : f32 to vector<128x128xf32>
      %c0_14 = arith.constant 0 : index
      %c0_15 = arith.constant 0 : index
      %18 = vector.load %arg8[%c0_14, %c0_15] : memref<128x128xf32, #tpu.memory_space<vmem>>, vector<128x128xf32>
      tpu.vector_store %arg8[%c0_14, %c0_15], %17 {strides = array<i32>} : memref<128x128xf32, #tpu.memory_space<vmem>>, vector<128x128xf32>,
    } else {
    }
    %c0_i32_1 = arith.constant 0 : i32
    %3 = arith.cmpi eq, %arg1, %c0_i32_1 : i32
    %c0_i32_2 = arith.constant 0 : i32
    %4 = arith.cmpi eq, %arg2, %c0_i32_2 : i32
    %5 = arith.andi %3, %4 : i1
    %6 = arith.extui %5 : i1 to i32
    %c0_i32_3 = arith.constant 0 : i32
    %7 = arith.cmpi ne, %6, %c0_i32_3 : i32
    scf.if %7 {
      %cst_13 = arith.constant 0.000000e+00 : f32
      %17 = vector.broadcast %cst_13 : f32 to vector<1x128xf32>
      %c0_14 = arith.constant 0 : index
      %c0_15 = arith.constant 0 : index
      %18 = vector.load %arg6[%c0_14, %c0_15] : memref<1x128xf32, #tpu.memory_space<vmem>>, vector<1x128xf32>
      tpu.vector_store %arg6[%c0_14, %c0_15], %17 {strides = array<i32>} : memref<1x128xf32, #tpu.memory_space<vmem>>, vector<1x128xf32>,
      %cst_16 = arith.constant 0.000000e+00 : f32
      %19 = vector.broadcast %cst_16 : f32 to vector<1x128xf32>
      %c0_17 = arith.constant 0 : index
      %c0_18 = arith.constant 0 : index
      %20 = vector.load %arg7[%c0_17, %c0_18] : memref<1x128xf32, #tpu.memory_space<vmem>>, vector<1x128xf32>
      tpu.vector_store %arg7[%c0_17, %c0_18], %19 {strides = array<i32>} : memref<1x128xf32, #tpu.memory_space<vmem>>, vector<1x128xf32>,
    } else {
    }
    %c0 = arith.constant 0 : index
    %c0_4 = arith.constant 0 : index
    %8 = vector.load %arg8[%c0, %c0_4] : memref<128x128xf32, #tpu.memory_space<vmem>>, vector<128x128xf32>
    %c0_5 = arith.constant 0 : index
    %c0_6 = arith.constant 0 : index
    %9 = vector.load %arg3[%c0_5, %c0_6] : memref<128x208xbf16, #tpu.memory_space<vmem>>, vector<128x208xbf16>
    %c0_7 = arith.constant 0 : index
    %c0_8 = arith.constant 0 : index
    %10 = vector.load %arg4[%c0_7, %c0_8] : memref<208x128xbf16, #tpu.memory_space<vmem>>, vector<208x128xbf16>
    %cst = arith.constant dense<0.000000e+00> : vector<128x128xf32>
    %11 = tpu.matmul %9, %10, %cst {dimension_numbers = #tpu.dot_dimension_numbers<[1], [0], [0], [1], [0, 0, 1, 1], [], []>} : vector<128x208xbf16>, vector<208x128xbf16>, vector<128x128xf32> -> vector<128x128xf32>
    %12 = arith.addf %8, %11 : vector<128x128xf32>
    %c0_9 = arith.constant 0 : index
    %c0_10 = arith.constant 0 : index
    %13 = vector.load %arg8[%c0_9, %c0_10] : memref<128x128xf32, #tpu.memory_space<vmem>>, vector<128x128xf32>
    tpu.vector_store %arg8[%c0_9, %c0_10], %12 {strides = array<i32>} : memref<128x128xf32, #tpu.memory_space<vmem>>, vector<128x128xf32>,
    %c0_i32_11 = arith.constant 0 : i32
    %14 = arith.cmpi eq, %arg2, %c0_i32_11 : i32
    %15 = arith.extui %14 : i1 to i32
    %c0_i32_12 = arith.constant 0 : i32
    %16 = arith.cmpi ne, %15, %c0_i32_12 : i32
    scf.if %16 {
      %c0_13 = arith.constant 0 : index
      %c0_14 = arith.constant 0 : index
      %17 = vector.load %arg8[%c0_13, %c0_14] : memref<128x128xf32, #tpu.memory_space<vmem>>, vector<128x128xf32>
      %c0_15 = arith.constant 0 : index
      %c0_16 = arith.constant 0 : index
      %18 = vector.load %arg5[%c0_15, %c0_16] : memref<128x128xf32, #tpu.memory_space<vmem>>, vector<128x128xf32>
      tpu.vector_store %arg5[%c0_15, %c0_16], %17 {strides = array<i32>} : memref<128x128xf32, #tpu.memory_space<vmem>>, vector<128x128xf32>,
      %c0_17 = arith.constant 0 : index
      %c0_18 = arith.constant 0 : index
      %19 = vector.load %arg6[%c0_17, %c0_18] : memref<1x128xf32, #tpu.memory_space<vmem>>, vector<1x128xf32>
      %cst_19 = arith.constant dense<0.000000e+00> : vector<128xf32>
      %20 = vector.multi_reduction <add>, %17, %cst_19 [0] : vector<128x128xf32> to vector<128xf32>
      %21 = vector.shape_cast %20 : vector<128xf32> to vector<1x128xf32>
      %22 = arith.addf %19, %21 : vector<1x128xf32>
      %c0_20 = arith.constant 0 : index
      %c0_21 = arith.constant 0 : index
      %23 = vector.load %arg6[%c0_20, %c0_21] : memref<1x128xf32, #tpu.memory_space<vmem>>, vector<1x128xf32>
      tpu.vector_store %arg6[%c0_20, %c0_21], %22 {strides = array<i32>} : memref<1x128xf32, #tpu.memory_space<vmem>>, vector<1x128xf32>,
      %c0_22 = arith.constant 0 : index
      %c0_23 = arith.constant 0 : index
      %24 = vector.load %arg7[%c0_22, %c0_23] : memref<1x128xf32, #tpu.memory_space<vmem>>, vector<1x128xf32>
      %25 = arith.mulf %17, %17 : vector<128x128xf32>
      %cst_24 = arith.constant dense<0.000000e+00> : vector<128xf32>
      %26 = vector.multi_reduction <add>, %25, %cst_24 [0] : vector<128x128xf32> to vector<128xf32>
      %27 = vector.shape_cast %26 : vector<128xf32> to vector<1x128xf32>
      %28 = arith.addf %24, %27 : vector<1x128xf32>
      %c0_25 = arith.constant 0 : index
      %c0_26 = arith.constant 0 : index
      %29 = vector.load %arg7[%c0_25, %c0_26] : memref<1x128xf32, #tpu.memory_space<vmem>>, vector<1x128xf32>
      tpu.vector_store %arg7[%c0_25, %c0_26], %28 {strides = array<i32>} : memref<1x128xf32, #tpu.memory_space<vmem>>, vector<1x128xf32>,
    } else {
    }
    return
  }
  func.func @transform_0(%arg0: i32, %arg1: i32, %arg2: i32) -> (i32, i32) {
    %c0_i32 = arith.constant 0 : i32
    return %arg1, %arg2 : i32, i32
  }
  func.func @transform_1(%arg0: i32, %arg1: i32, %arg2: i32) -> (i32, i32) {
    %c0_i32 = arith.constant 0 : i32
    return %arg2, %arg0 : i32, i32
  }
  func.func @transform_2(%arg0: i32, %arg1: i32, %arg2: i32) -> (i32, i32) {
    %c0_i32 = arith.constant 0 : i32
    return %arg1, %arg0 : i32, i32
  }
  func.func @transform_3(%arg0: i32, %arg1: i32, %arg2: i32) -> (i32, i32) {
    %c0_i32 = arith.constant 0 : i32
    %c0_i32_0 = arith.constant 0 : i32
    return %c0_i32, %arg0 : i32, i32
  }
  func.func @transform_4(%arg0: i32, %arg1: i32, %arg2: i32) -> (i32, i32) {
    %c0_i32 = arith.constant 0 : i32
    %c0_i32_0 = arith.constant 0 : i32
    return %c0_i32, %arg0 : i32, i32
  }
}

module attributes {stable_mosaic.version = 11 : i64} {
  func.func @_affine_act_kernel(%arg0: i32, %arg1: memref<128x128xf32, #tpu.memory_space<vmem>>, %arg2: memref<1x128xf32, #tpu.memory_space<vmem>>, %arg3: memref<1x128xf32, #tpu.memory_space<vmem>>, %arg4: memref<128x128xbf16, #tpu.memory_space<vmem>>) attributes {dimension_semantics = [#tpu.dimension_semantics<parallel>], iteration_bounds = array<i64: 1>, scalar_prefetch = 0 : i64, scratch_operands = 0 : i64, tpu.core_type = #tpu.core_type<tc>, window_params = [{transform_indices = @transform_0, window_bounds = array<i64: 128, 128>}, {pipeline_mode = #tpu.pipeline_mode<synchronous>, transform_indices = @transform_1, window_bounds = array<i64: 1, 128>}, {pipeline_mode = #tpu.pipeline_mode<synchronous>, transform_indices = @transform_2, window_bounds = array<i64: 1, 128>}, {transform_indices = @transform_3, window_bounds = array<i64: 128, 128>}]} {
    %c0 = arith.constant 0 : index
    %c0_0 = arith.constant 0 : index
    %0 = vector.load %arg1[%c0, %c0_0] : memref<128x128xf32, #tpu.memory_space<vmem>>, vector<128x128xf32>
    %c0_1 = arith.constant 0 : index
    %c0_2 = arith.constant 0 : index
    %1 = vector.load %arg2[%c0_1, %c0_2] : memref<1x128xf32, #tpu.memory_space<vmem>>, vector<1x128xf32>
    %2 = vector.broadcast %1 : vector<1x128xf32> to vector<128x128xf32>
    %3 = arith.mulf %0, %2 : vector<128x128xf32>
    %c0_3 = arith.constant 0 : index
    %c0_4 = arith.constant 0 : index
    %4 = vector.load %arg3[%c0_3, %c0_4] : memref<1x128xf32, #tpu.memory_space<vmem>>, vector<1x128xf32>
    %5 = vector.broadcast %4 : vector<1x128xf32> to vector<128x128xf32>
    %6 = arith.addf %3, %5 : vector<128x128xf32>
    %cst = arith.constant 0.000000e+00 : f32
    %7 = vector.broadcast %cst : f32 to vector<128x128xf32>
    %8 = arith.maximumf %6, %7 : vector<128x128xf32>
    %9 = arith.truncf %8 : vector<128x128xf32> to vector<128x128xbf16>
    %c0_5 = arith.constant 0 : index
    %c0_6 = arith.constant 0 : index
    %10 = vector.load %arg4[%c0_5, %c0_6] : memref<128x128xbf16, #tpu.memory_space<vmem>>, vector<128x128xbf16>
    tpu.vector_store %arg4[%c0_5, %c0_6], %9 {strides = array<i32>} : memref<128x128xbf16, #tpu.memory_space<vmem>>, vector<128x128xbf16>,
    return
  }
  func.func @transform_0(%arg0: i32) -> (i32, i32) {
    %c0_i32 = arith.constant 0 : i32
    %c0_i32_0 = arith.constant 0 : i32
    return %arg0, %c0_i32 : i32, i32
  }
  func.func @transform_1(%arg0: i32) -> (i32, i32) {
    %c0_i32 = arith.constant 0 : i32
    %c0_i32_0 = arith.constant 0 : i32
    %c0_i32_1 = arith.constant 0 : i32
    return %c0_i32, %c0_i32_0 : i32, i32
  }
  func.func @transform_2(%arg0: i32) -> (i32, i32) {
    %c0_i32 = arith.constant 0 : i32
    %c0_i32_0 = arith.constant 0 : i32
    %c0_i32_1 = arith.constant 0 : i32
    return %c0_i32, %c0_i32_0 : i32, i32
  }
  func.func @transform_3(%arg0: i32) -> (i32, i32) {
    %c0_i32 = arith.constant 0 : i32
    %c0_i32_0 = arith.constant 0 : i32
    return %arg0, %c0_i32 : i32, i32
  }
}

module attributes {stable_mosaic.version = 11 : i64} {
  func.func @_mm_stats_kernel(%arg0: i32, %arg1: i32, %arg2: i32, %arg3: memref<256x64xbf16, #tpu.memory_space<vmem>>, %arg4: memref<64x128xbf16, #tpu.memory_space<vmem>>, %arg5: memref<256x128xf32, #tpu.memory_space<vmem>>, %arg6: memref<1x128xf32, #tpu.memory_space<vmem>>, %arg7: memref<1x128xf32, #tpu.memory_space<vmem>>, %arg8: memref<256x128xf32, #tpu.memory_space<vmem>>) attributes {dimension_semantics = [#tpu.dimension_semantics<parallel>, #tpu.dimension_semantics<arbitrary>, #tpu.dimension_semantics<arbitrary>], iteration_bounds = array<i64: 1, 2, 1>, scalar_prefetch = 0 : i64, scratch_operands = 1 : i64, tpu.core_type = #tpu.core_type<tc>, window_params = [{transform_indices = @transform_0, window_bounds = array<i64: 256, 64>}, {transform_indices = @transform_1, window_bounds = array<i64: 64, 128>}, {transform_indices = @transform_2, window_bounds = array<i64: 256, 128>}, {transform_indices = @transform_3, window_bounds = array<i64: 1, 128>}, {transform_indices = @transform_4, window_bounds = array<i64: 1, 128>}]} {
    %c0_i32 = arith.constant 0 : i32
    %0 = arith.cmpi eq, %arg2, %c0_i32 : i32
    %1 = arith.extui %0 : i1 to i32
    %c0_i32_0 = arith.constant 0 : i32
    %2 = arith.cmpi ne, %1, %c0_i32_0 : i32
    scf.if %2 {
      %cst_13 = arith.constant 0.000000e+00 : f32
      %17 = vector.broadcast %cst_13 : f32 to vector<256x128xf32>
      %c0_14 = arith.constant 0 : index
      %c0_15 = arith.constant 0 : index
      %18 = vector.load %arg8[%c0_14, %c0_15] : memref<256x128xf32, #tpu.memory_space<vmem>>, vector<256x128xf32>
      tpu.vector_store %arg8[%c0_14, %c0_15], %17 {strides = array<i32>} : memref<256x128xf32, #tpu.memory_space<vmem>>, vector<256x128xf32>,
    } else {
    }
    %c0_i32_1 = arith.constant 0 : i32
    %3 = arith.cmpi eq, %arg1, %c0_i32_1 : i32
    %c0_i32_2 = arith.constant 0 : i32
    %4 = arith.cmpi eq, %arg2, %c0_i32_2 : i32
    %5 = arith.andi %3, %4 : i1
    %6 = arith.extui %5 : i1 to i32
    %c0_i32_3 = arith.constant 0 : i32
    %7 = arith.cmpi ne, %6, %c0_i32_3 : i32
    scf.if %7 {
      %cst_13 = arith.constant 0.000000e+00 : f32
      %17 = vector.broadcast %cst_13 : f32 to vector<1x128xf32>
      %c0_14 = arith.constant 0 : index
      %c0_15 = arith.constant 0 : index
      %18 = vector.load %arg6[%c0_14, %c0_15] : memref<1x128xf32, #tpu.memory_space<vmem>>, vector<1x128xf32>
      tpu.vector_store %arg6[%c0_14, %c0_15], %17 {strides = array<i32>} : memref<1x128xf32, #tpu.memory_space<vmem>>, vector<1x128xf32>,
      %cst_16 = arith.constant 0.000000e+00 : f32
      %19 = vector.broadcast %cst_16 : f32 to vector<1x128xf32>
      %c0_17 = arith.constant 0 : index
      %c0_18 = arith.constant 0 : index
      %20 = vector.load %arg7[%c0_17, %c0_18] : memref<1x128xf32, #tpu.memory_space<vmem>>, vector<1x128xf32>
      tpu.vector_store %arg7[%c0_17, %c0_18], %19 {strides = array<i32>} : memref<1x128xf32, #tpu.memory_space<vmem>>, vector<1x128xf32>,
    } else {
    }
    %c0 = arith.constant 0 : index
    %c0_4 = arith.constant 0 : index
    %8 = vector.load %arg8[%c0, %c0_4] : memref<256x128xf32, #tpu.memory_space<vmem>>, vector<256x128xf32>
    %c0_5 = arith.constant 0 : index
    %c0_6 = arith.constant 0 : index
    %9 = vector.load %arg3[%c0_5, %c0_6] : memref<256x64xbf16, #tpu.memory_space<vmem>>, vector<256x64xbf16>
    %c0_7 = arith.constant 0 : index
    %c0_8 = arith.constant 0 : index
    %10 = vector.load %arg4[%c0_7, %c0_8] : memref<64x128xbf16, #tpu.memory_space<vmem>>, vector<64x128xbf16>
    %cst = arith.constant dense<0.000000e+00> : vector<256x128xf32>
    %11 = tpu.matmul %9, %10, %cst {dimension_numbers = #tpu.dot_dimension_numbers<[1], [0], [0], [1], [0, 0, 1, 1], [], []>} : vector<256x64xbf16>, vector<64x128xbf16>, vector<256x128xf32> -> vector<256x128xf32>
    %12 = arith.addf %8, %11 : vector<256x128xf32>
    %c0_9 = arith.constant 0 : index
    %c0_10 = arith.constant 0 : index
    %13 = vector.load %arg8[%c0_9, %c0_10] : memref<256x128xf32, #tpu.memory_space<vmem>>, vector<256x128xf32>
    tpu.vector_store %arg8[%c0_9, %c0_10], %12 {strides = array<i32>} : memref<256x128xf32, #tpu.memory_space<vmem>>, vector<256x128xf32>,
    %c0_i32_11 = arith.constant 0 : i32
    %14 = arith.cmpi eq, %arg2, %c0_i32_11 : i32
    %15 = arith.extui %14 : i1 to i32
    %c0_i32_12 = arith.constant 0 : i32
    %16 = arith.cmpi ne, %15, %c0_i32_12 : i32
    scf.if %16 {
      %c0_13 = arith.constant 0 : index
      %c0_14 = arith.constant 0 : index
      %17 = vector.load %arg8[%c0_13, %c0_14] : memref<256x128xf32, #tpu.memory_space<vmem>>, vector<256x128xf32>
      %c0_15 = arith.constant 0 : index
      %c0_16 = arith.constant 0 : index
      %18 = vector.load %arg5[%c0_15, %c0_16] : memref<256x128xf32, #tpu.memory_space<vmem>>, vector<256x128xf32>
      tpu.vector_store %arg5[%c0_15, %c0_16], %17 {strides = array<i32>} : memref<256x128xf32, #tpu.memory_space<vmem>>, vector<256x128xf32>,
      %c0_17 = arith.constant 0 : index
      %c0_18 = arith.constant 0 : index
      %19 = vector.load %arg6[%c0_17, %c0_18] : memref<1x128xf32, #tpu.memory_space<vmem>>, vector<1x128xf32>
      %cst_19 = arith.constant dense<0.000000e+00> : vector<128xf32>
      %20 = vector.multi_reduction <add>, %17, %cst_19 [0] : vector<256x128xf32> to vector<128xf32>
      %21 = vector.shape_cast %20 : vector<128xf32> to vector<1x128xf32>
      %22 = arith.addf %19, %21 : vector<1x128xf32>
      %c0_20 = arith.constant 0 : index
      %c0_21 = arith.constant 0 : index
      %23 = vector.load %arg6[%c0_20, %c0_21] : memref<1x128xf32, #tpu.memory_space<vmem>>, vector<1x128xf32>
      tpu.vector_store %arg6[%c0_20, %c0_21], %22 {strides = array<i32>} : memref<1x128xf32, #tpu.memory_space<vmem>>, vector<1x128xf32>,
      %c0_22 = arith.constant 0 : index
      %c0_23 = arith.constant 0 : index
      %24 = vector.load %arg7[%c0_22, %c0_23] : memref<1x128xf32, #tpu.memory_space<vmem>>, vector<1x128xf32>
      %25 = arith.mulf %17, %17 : vector<256x128xf32>
      %cst_24 = arith.constant dense<0.000000e+00> : vector<128xf32>
      %26 = vector.multi_reduction <add>, %25, %cst_24 [0] : vector<256x128xf32> to vector<128xf32>
      %27 = vector.shape_cast %26 : vector<128xf32> to vector<1x128xf32>
      %28 = arith.addf %24, %27 : vector<1x128xf32>
      %c0_25 = arith.constant 0 : index
      %c0_26 = arith.constant 0 : index
      %29 = vector.load %arg7[%c0_25, %c0_26] : memref<1x128xf32, #tpu.memory_space<vmem>>, vector<1x128xf32>
      tpu.vector_store %arg7[%c0_25, %c0_26], %28 {strides = array<i32>} : memref<1x128xf32, #tpu.memory_space<vmem>>, vector<1x128xf32>,
    } else {
    }
    return
  }
  func.func @transform_0(%arg0: i32, %arg1: i32, %arg2: i32) -> (i32, i32) {
    %c0_i32 = arith.constant 0 : i32
    return %arg1, %arg2 : i32, i32
  }
  func.func @transform_1(%arg0: i32, %arg1: i32, %arg2: i32) -> (i32, i32) {
    %c0_i32 = arith.constant 0 : i32
    return %arg2, %arg0 : i32, i32
  }
  func.func @transform_2(%arg0: i32, %arg1: i32, %arg2: i32) -> (i32, i32) {
    %c0_i32 = arith.constant 0 : i32
    return %arg1, %arg0 : i32, i32
  }
  func.func @transform_3(%arg0: i32, %arg1: i32, %arg2: i32) -> (i32, i32) {
    %c0_i32 = arith.constant 0 : i32
    %c0_i32_0 = arith.constant 0 : i32
    return %c0_i32, %arg0 : i32, i32
  }
  func.func @transform_4(%arg0: i32, %arg1: i32, %arg2: i32) -> (i32, i32) {
    %c0_i32 = arith.constant 0 : i32
    %c0_i32_0 = arith.constant 0 : i32
    return %c0_i32, %arg0 : i32, i32
  }
}

module attributes {stable_mosaic.version = 11 : i64} {
  func.func @_affine_act_kernel(%arg0: i32, %arg1: memref<512x128xf32, #tpu.memory_space<vmem>>, %arg2: memref<1x128xf32, #tpu.memory_space<vmem>>, %arg3: memref<1x128xf32, #tpu.memory_space<vmem>>, %arg4: memref<512x128xf32, #tpu.memory_space<vmem>>) attributes {dimension_semantics = [#tpu.dimension_semantics<parallel>], iteration_bounds = array<i64: 1>, scalar_prefetch = 0 : i64, scratch_operands = 0 : i64, tpu.core_type = #tpu.core_type<tc>, window_params = [{transform_indices = @transform_0, window_bounds = array<i64: 512, 128>}, {pipeline_mode = #tpu.pipeline_mode<synchronous>, transform_indices = @transform_1, window_bounds = array<i64: 1, 128>}, {pipeline_mode = #tpu.pipeline_mode<synchronous>, transform_indices = @transform_2, window_bounds = array<i64: 1, 128>}, {transform_indices = @transform_3, window_bounds = array<i64: 512, 128>}]} {
    %c0 = arith.constant 0 : index
    %c0_0 = arith.constant 0 : index
    %0 = vector.load %arg1[%c0, %c0_0] : memref<512x128xf32, #tpu.memory_space<vmem>>, vector<512x128xf32>
    %c0_1 = arith.constant 0 : index
    %c0_2 = arith.constant 0 : index
    %1 = vector.load %arg2[%c0_1, %c0_2] : memref<1x128xf32, #tpu.memory_space<vmem>>, vector<1x128xf32>
    %2 = vector.broadcast %1 : vector<1x128xf32> to vector<512x128xf32>
    %3 = arith.mulf %0, %2 : vector<512x128xf32>
    %c0_3 = arith.constant 0 : index
    %c0_4 = arith.constant 0 : index
    %4 = vector.load %arg3[%c0_3, %c0_4] : memref<1x128xf32, #tpu.memory_space<vmem>>, vector<1x128xf32>
    %5 = vector.broadcast %4 : vector<1x128xf32> to vector<512x128xf32>
    %6 = arith.addf %3, %5 : vector<512x128xf32>
    %7 = math.tanh %6 : vector<512x128xf32>
    %c0_5 = arith.constant 0 : index
    %c0_6 = arith.constant 0 : index
    %8 = vector.load %arg4[%c0_5, %c0_6] : memref<512x128xf32, #tpu.memory_space<vmem>>, vector<512x128xf32>
    tpu.vector_store %arg4[%c0_5, %c0_6], %7 {strides = array<i32>} : memref<512x128xf32, #tpu.memory_space<vmem>>, vector<512x128xf32>,
    return
  }
  func.func @transform_0(%arg0: i32) -> (i32, i32) {
    %c0_i32 = arith.constant 0 : i32
    %c0_i32_0 = arith.constant 0 : i32
    return %arg0, %c0_i32 : i32, i32
  }
  func.func @transform_1(%arg0: i32) -> (i32, i32) {
    %c0_i32 = arith.constant 0 : i32
    %c0_i32_0 = arith.constant 0 : i32
    %c0_i32_1 = arith.constant 0 : i32
    return %c0_i32, %c0_i32_0 : i32, i32
  }
  func.func @transform_2(%arg0: i32) -> (i32, i32) {
    %c0_i32 = arith.constant 0 : i32
    %c0_i32_0 = arith.constant 0 : i32
    %c0_i32_1 = arith.constant 0 : i32
    return %c0_i32, %c0_i32_0 : i32, i32
  }
  func.func @transform_3(%arg0: i32) -> (i32, i32) {
    %c0_i32 = arith.constant 0 : i32
    %c0_i32_0 = arith.constant 0 : i32
    return %arg0, %c0_i32 : i32, i32
  }
}

</mosaic_0001>

<bundles_post_ra>
// kernel: _lambda_.31
= control target key start
LH: loop header
LB: loop body
LE: loop exit
PB: predicated region body
PF: predicated region fallthrough
CT: control target
= control target key end

     0   :  { %s1503_s0 = inlined_call_operand.vmem [shape: f32[512,128], index: 0, kind: input, shape index: {}]   ;;  %s1504_s1 = inlined_call_operand.vmem [shape: f32[1,128], index: 1, kind: input, shape index: {}]   ;;  %s1505_s2 = inlined_call_operand.vmem [shape: f32[1,128], index: 2, kind: input, shape index: {}]   ;;  %s1506_s3 = inlined_call_operand.vmem [shape: bf16[512,128], index: 3, kind: output, shape index: {}]  }
   0x1   :  { %v14_v0 = vld [vmem:[%s1503_s0] sm:$0xff]  ;;  %v15_v1 = vld [vmem:[%s1503_s0 + $0x8] sm:$0xff]  ;;  %v16_v6 = vld [vmem:[%s1503_s0 + $0x10] sm:$0xff] }
   0x2   :  { %v1086_v2 = vld [vmem:[%s1504_s1] ss:$0 sm:$0xff]  ;;  %v17_v7 = vld [vmem:[%s1503_s0 + $0x18] sm:$0xff]  ;;  %v19_v11 = vld [vmem:[%s1503_s0 + $0x28] sm:$0xff] }
   0x3   :  { %v85_v3 = vmul.f32 %v1086_v2, %v14_v0  ;;  %v86_v4 = vmul.f32 %v1086_v2, %v15_v1  ;;  %v1093_v5 = vld [vmem:[%s1505_s2] ss:$0 sm:$0xff]  ;;  %v87_v8 = vmul.f32 %v1086_v2, %v16_v6  ;;  %v88_v9 = vmul.f32 %v1086_v2, %v17_v7  ;;  %v20_v12 = vld [vmem:[%s1503_s0 + $0x30] sm:$0xff]  ;;  %v21_v17 = vld [vmem:[%s1503_s0 + $0x38] sm:$0xff] }
   0x4   :  { %v18_v10 = vld [vmem:[%s1503_s0 + $0x20] sm:$0xff]  ;;  %v90_v16 = vmul.f32 %v1086_v2, %v19_v11  ;;  %v91_v20 = vmul.f32 %v1086_v2, %v20_v12  ;;  %v92_v21 = vmul.f32 %v1086_v2, %v21_v17  ;;  %v23_v35 = vld [vmem:[%s1503_s0 + $0x48] sm:$0xff]  ;;  %v24_v36 = vld [vmem:[%s1503_s0 + $0x50] sm:$0xff] }
   0x5   :  { %v156_v13 = vadd.f32 %v1093_v5, %v85_v3  ;;  %v157_v14 = vadd.f32 %v1093_v5, %v86_v4  ;;  %v89_v15 = vmul.f32 %v1086_v2, %v18_v10  ;;  %v158_v18 = vadd.f32 %v1093_v5, %v87_v8  ;;  %v22_v34 = vld [vmem:[%s1503_s0 + $0x40] sm:$0xff]  ;;  %v25_v42 = vld [vmem:[%s1503_s0 + $0x58] sm:$0xff]  ;;  %v27_v48 = vld [vmem:[%s1503_s0 + $0x68] sm:$0xff] }
   0x6   :  { %v159_v19 = vadd.f32 %v1093_v5, %v88_v9  ;;  %v161_v29 = vadd.f32 %v1093_v5, %v90_v16  ;;  %v162_v33 = vadd.f32 %v1093_v5, %v91_v20  ;;  %v163_v40 = vadd.f32 %v1093_v5, %v92_v21  ;;  %v26_v47 = vld [vmem:[%s1503_s0 + $0x60] sm:$0xff]  ;;  %v28_v60 = vld [vmem:[%s1503_s0 + $0x70] sm:$0xff]  ;;  %v29_v7 = vld [vmem:[%s1503_s0 + $0x78] sm:$0xff] }
   0x7   :  { %vm220_vm0 = vcmp.ge.f32.partialorder %v156_v13, 0.0  ;;  %vm221_vm1 = vcmp.ge.f32.partialorder %v157_v14, 0.0  ;;  %v284_v22 = vmul.f32 0.2, %v156_v13  ;;  %v285_v23 = vmul.f32 0.2, %v157_v14 }
   0x8   :  { %vm222_vm2 = vcmp.ge.f32.partialorder %v158_v18, 0.0  ;;  %vm223_vm3 = vcmp.ge.f32.partialorder %v159_v19, 0.0  ;;  %v286_v24 = vmul.f32 0.2, %v158_v18  ;;  %v287_v25 = vmul.f32 0.2, %v159_v19 }
   0x9   :  { %v348_v26 = vsel %vm220_vm0, %v156_v13, %v284_v22  ;;  %v349_v27 = vsel %vm221_vm1, %v157_v14, %v285_v23  ;;  %v160_v28 = vadd.f32 %v1093_v5, %v89_v15  ;;  %vm225_vm5 = vcmp.ge.f32.partialorder %v161_v29, 0.0  ;;  %v30_v12 = vld [vmem:[%s1503_s0 + $0x80] sm:$0xff]  ;;  %v31_v13 = vld [vmem:[%s1503_s0 + $0x88] sm:$0xff]  ;;  %v32_v20 = vld [vmem:[%s1503_s0 + $0x90] sm:$0xff] }
   0xa   :  { %v869_v30 = vpack.c.bf16 %v349_v27, %v348_v26  ;;  %v350_v31 = vsel %vm222_vm2, %v158_v18, %v286_v24  ;;  %v351_v32 = vsel %vm223_vm3, %v159_v19, %v287_v25  ;;  %v289_v39 = vmul.f32 0.2, %v161_v29  ;;  %v33_v25 = vld [vmem:[%s1503_s0 + $0x98] sm:$0xff] }
   0xb   :  { %v874_v37 = vpack.c.bf16 %v351_v32, %v350_v31  ;;  %vm224_vm4 = vcmp.ge.f32.partialorder %v160_v28, 0.0  ;;  %v288_v38 = vmul.f32 0.2, %v160_v28  ;;  %vm226_vm6 = vcmp.ge.f32.partialorder %v162_v33, 0.0 }
   0xc   :  { %870 = vst [vmem:[%s1506_s3] sm:$0xff] %v869_v30   ;;  %v290_v41 = vmul.f32 0.2, %v162_v33  ;;  %v93_v44 = vmul.f32 %v1086_v2, %v22_v34  ;;  %v94_v45 = vmul.f32 %v1086_v2, %v23_v35  ;;  %v95_v46 = vmul.f32 %v1086_v2, %v24_v36 }
   0xd   :  { %1026 = vst [vmem:[%s1506_s3 + $0x8] sm:$0xff] %v874_v37   ;;  %v352_v43 = vsel %vm224_vm4, %v160_v28, %v288_v38  ;;  %v353_v49 = vsel %vm225_vm5, %v161_v29, %v289_v39  ;;  %vm227_vm7 = vcmp.ge.f32.partialorder %v163_v40, 0.0  ;;  %v291_v50 = vmul.f32 0.2, %v163_v40  ;;  %v35_v37 = vld [vmem:[%s1503_s0 + $0xa8] sm:$0xff] }
   0xe   :  { %v354_v51 = vsel %vm226_vm6, %v162_v33, %v290_v41  ;;  %v879_v52 = vpack.c.bf16 %v353_v49, %v352_v43  ;;  %v164_v53 = vadd.f32 %v1093_v5, %v93_v44  ;;  %v165_v54 = vadd.f32 %v1093_v5, %v94_v45  ;;  %v34_v33 = vld [vmem:[%s1503_s0 + $0xa0] sm:$0xff]  ;;  %v36_v44 = vld [vmem:[%s1503_s0 + $0xb0] sm:$0xff]  ;;  %v37_v49 = vld [vmem:[%s1503_s0 + $0xb8] sm:$0xff] }
   0xf   :  { %v96_v55 = vmul.f32 %v1086_v2, %v25_v42  ;;  %v355_v56 = vsel %vm227_vm7, %v163_v40, %v291_v50  ;;  %v166_v57 = vadd.f32 %v1093_v5, %v95_v46  ;;  %v97_v58 = vmul.f32 %v1086_v2, %v26_v47  ;;  %v38_v50 = vld [vmem:[%s1503_s0 + $0xc0] sm:$0xff] }
  0x10   :  { %v98_v59 = vmul.f32 %v1086_v2, %v27_v48  ;;  %1027 = vst [vmem:[%s1506_s3 + $0x10] sm:$0xff] %v879_v52   ;;  %v884_v61 = vpack.c.bf16 %v355_v56, %v354_v51  ;;  %vm228_vm8 = vcmp.ge.f32.partialorder %v164_v53, 0.0  ;;  %vm229_vm9 = vcmp.ge.f32.partialorder %v165_v54, 0.0  ;;  %v39_v51 = vld [vmem:[%s1503_s0 + $0xc8] sm:$0xff] }
  0x11   :  { %v292_v62 = vmul.f32 0.2, %v164_v53  ;;  %v293_v63 = vmul.f32 0.2, %v165_v54  ;;  %v167_v0 = vadd.f32 %v1093_v5, %v96_v55  ;;  %vm230_vm10 = vcmp.ge.f32.partialorder %v166_v57, 0.0 }
  0x12   :  { %v294_v1 = vmul.f32 0.2, %v166_v57  ;;  %1028 = vst [vmem:[%s1506_s3 + $0x18] sm:$0xff] %v884_v61   ;;  %v168_v4 = vadd.f32 %v1093_v5, %v97_v58  ;;  %v169_v6 = vadd.f32 %v1093_v5, %v98_v59  ;;  %v99_v8 = vmul.f32 %v1086_v2, %v28_v60 }
  0x13   :  { %v356_v3 = vsel %vm228_vm8, %v164_v53, %v292_v62  ;;  %v357_v9 = vsel %vm229_vm9, %v165_v54, %v293_v63  ;;  %vm231_vm11 = vcmp.ge.f32.partialorder %v167_v0, 0.0  ;;  %v295_v10 = vmul.f32 0.2, %v167_v0  ;;  %v40_v62 = vld [vmem:[%s1503_s0 + $0xd0] sm:$0xff] }
  0x14   :  { %v358_v11 = vsel %vm230_vm10, %v166_v57, %v294_v1  ;;  %v889_v14 = vpack.c.bf16 %v357_v9, %v356_v3  ;;  %vm232_vm12 = vcmp.ge.f32.partialorder %v168_v4, 0.0  ;;  %vm233_vm13 = vcmp.ge.f32.partialorder %v169_v6, 0.0 }
  0x15   :  { %v296_v15 = vmul.f32 0.2, %v168_v4  ;;  %v359_v16 = vsel %vm231_vm11, %v167_v0, %v295_v10  ;;  %v297_v17 = vmul.f32 0.2, %v169_v6  ;;  %v100_v18 = vmul.f32 %v1086_v2, %v29_v7  ;;  %v41_v10 = vld [vmem:[%s1503_s0 + $0xd8] sm:$0xff] }
  0x16   :  { %v170_v19 = vadd.f32 %v1093_v5, %v99_v8  ;;  %1029 = vst [vmem:[%s1506_s3 + $0x20] sm:$0xff] %v889_v14   ;;  %v894_v21 = vpack.c.bf16 %v359_v16, %v358_v11  ;;  %v101_v23 = vmul.f32 %v1086_v2, %v30_v12  ;;  %v102_v24 = vmul.f32 %v1086_v2, %v31_v13  ;;  %v42_v14 = vld [vmem:[%s1503_s0 + $0xe0] sm:$0xff] }
  0x17   :  { %v360_v22 = vsel %vm232_vm12, %v168_v4, %v296_v15  ;;  %v361_v26 = vsel %vm233_vm13, %v169_v6, %v297_v17  ;;  %v171_v27 = vadd.f32 %v1093_v5, %v100_v18  ;;  %v103_v32 = vmul.f32 %v1086_v2, %v32_v20  ;;  %v43_v15 = vld [vmem:[%s1503_s0 + $0xe8] sm:$0xff] }
  0x18   :  { %vm234_vm14 = vcmp.ge.f32.partialorder %v170_v19, 0.0  ;;  %v298_v28 = vmul.f32 0.2, %v170_v19  ;;  %1030 = vst [vmem:[%s1506_s3 + $0x28] sm:$0xff] %v894_v21   ;;  %v899_v29 = vpack.c.bf16 %v361_v26, %v360_v22  ;;  %v172_v30 = vadd.f32 %v1093_v5, %v101_v23  ;;  %v44_v26 = vld [vmem:[%s1503_s0 + $0xf0] sm:$0xff] }
  0x19   :  { %v173_v31 = vadd.f32 %v1093_v5, %v102_v24  ;;  %vm235_vm15 = vcmp.ge.f32.partialorder %v171_v27, 0.0  ;;  %v299_v34 = vmul.f32 0.2, %v171_v27  ;;  %v104_v36 = vmul.f32 %v1086_v2, %v33_v25 }
  0x1a   :  { %v362_v35 = vsel %vm234_vm14, %v170_v19, %v298_v28  ;;  %1031 = vst [vmem:[%s1506_s3 + $0x30] sm:$0xff] %v899_v29   ;;  %vm236_vm0 = vcmp.ge.f32.partialorder %v172_v30, 0.0  ;;  %v300_v38 = vmul.f32 0.2, %v172_v30  ;;  %v174_v41 = vadd.f32 %v1093_v5, %v103_v32 }
  0x1b   :  { %vm237_vm1 = vcmp.ge.f32.partialorder %v173_v31, 0.0  ;;  %v301_v39 = vmul.f32 0.2, %v173_v31  ;;  %v363_v40 = vsel %vm235_vm15, %v171_v27, %v299_v34  ;;  %v175_v42 = vadd.f32 %v1093_v5, %v104_v36 }
  0x1c   :  { %v105_v43 = vmul.f32 %v1086_v2, %v34_v33  ;;  %v904_v45 = vpack.c.bf16 %v363_v40, %v362_v35  ;;  %v364_v46 = vsel %vm236_vm0, %v172_v30, %v300_v38  ;;  %v106_v48 = vmul.f32 %v1086_v2, %v35_v37  ;;  %v46_v38 = vld [vmem:[%s1503_s0 + $0x100] sm:$0xff] }
  0x1d   :  { %v365_v47 = vsel %vm237_vm1, %v173_v31, %v301_v39  ;;  %vm238_vm2 = vcmp.ge.f32.partialorder %v174_v41, 0.0  ;;  %vm239_vm3 = vcmp.ge.f32.partialorder %v175_v42, 0.0  ;;  %v302_v53 = vmul.f32 0.2, %v174_v41  ;;  %v45_v31 = vld [vmem:[%s1503_s0 + $0xf8] sm:$0xff] }
  0x1e   :  { %v909_v52 = vpack.c.bf16 %v365_v47, %v364_v46  ;;  %1032 = vst [vmem:[%s1506_s3 + $0x38] sm:$0xff] %v904_v45   ;;  %v303_v54 = vmul.f32 0.2, %v175_v42  ;;  %v176_v55 = vadd.f32 %v1093_v5, %v105_v43  ;;  %v177_v56 = vadd.f32 %v1093_v5, %v106_v48 }
  0x1f   :  { %v107_v57 = vmul.f32 %v1086_v2, %v36_v44  ;;  %v366_v58 = vsel %vm238_vm2, %v174_v41, %v302_v53  ;;  %v108_v59 = vmul.f32 %v1086_v2, %v37_v49  ;;  %v109_v60 = vmul.f32 %v1086_v2, %v38_v50  ;;  %v48_v50 = vld [vmem:[%s1503_s0 + $0x110] sm:$0xff] }
  0x20   :  { %1033 = vst [vmem:[%s1506_s3 + $0x40] sm:$0xff] %v909_v52   ;;  %v110_v61 = vmul.f32 %v1086_v2, %v39_v51  ;;  %v367_v63 = vsel %vm239_vm3, %v175_v42, %v303_v54  ;;  %vm240_vm4 = vcmp.ge.f32.partialorder %v176_v55, 0.0  ;;  %vm241_vm5 = vcmp.ge.f32.partialorder %v177_v56, 0.0  ;;  %v47_v42 = vld [vmem:[%s1503_s0 + $0x108] sm:$0xff]  ;;  %v49_v51 = vld [vmem:[%s1503_s0 + $0x118] sm:$0xff] }
  0x21   :  { %v304_v0 = vmul.f32 0.2, %v176_v55  ;;  %v914_v1 = vpack.c.bf16 %v367_v63, %v366_v58  ;;  %v305_v3 = vmul.f32 0.2, %v177_v56  ;;  %v178_v4 = vadd.f32 %v1093_v5, %v107_v57  ;;  %v51_v63 = vld [vmem:[%s1503_s0 + $0x128] sm:$0xff] }
  0x22   :  { %v179_v6 = vadd.f32 %v1093_v5, %v108_v59  ;;  %v180_v8 = vadd.f32 %v1093_v5, %v109_v60  ;;  %v181_v9 = vadd.f32 %v1093_v5, %v110_v61  ;;  %v111_v11 = vmul.f32 %v1086_v2, %v40_v62 }
  0x23   :  { %v368_v7 = vsel %vm240_vm4, %v176_v55, %v304_v0  ;;  %1034 = vst [vmem:[%s1506_s3 + $0x48] sm:$0xff] %v914_v1   ;;  %v369_v12 = vsel %vm241_vm5, %v177_v56, %v305_v3  ;;  %vm242_vm6 = vcmp.ge.f32.partialorder %v178_v4, 0.0  ;;  %v306_v13 = vmul.f32 0.2, %v178_v4  ;;  %v50_v55 = vld [vmem:[%s1503_s0 + $0x120] sm:$0xff] }
  0x24   :  { %vm243_vm7 = vcmp.ge.f32.partialorder %v179_v6, 0.0  ;;  %v919_v16 = vpack.c.bf16 %v369_v12, %v368_v7  ;;  %v307_v17 = vmul.f32 0.2, %v179_v6  ;;  %vm244_vm8 = vcmp.ge.f32.partialorder %v180_v8, 0.0 }
  0x25   :  { %vm245_vm9 = vcmp.ge.f32.partialorder %v181_v9, 0.0  ;;  %v370_v18 = vsel %vm242_vm6, %v178_v4, %v306_v13  ;;  %v308_v19 = vmul.f32 0.2, %v180_v8  ;;  %v309_v20 = vmul.f32 0.2, %v181_v9  ;;  %v52_v4 = vld [vmem:[%s1503_s0 + $0x130] sm:$0xff] }
  0x26   :  { %v112_v21 = vmul.f32 %v1086_v2, %v41_v10  ;;  %1035 = vst [vmem:[%s1506_s3 + $0x50] sm:$0xff] %v919_v16   ;;  %v371_v22 = vsel %vm243_vm7, %v179_v6, %v307_v17  ;;  %v182_v23 = vadd.f32 %v1093_v5, %v111_v11  ;;  %v113_v24 = vmul.f32 %v1086_v2, %v42_v14  ;;  %v53_v13 = vld [vmem:[%s1503_s0 + $0x138] sm:$0xff] }
  0x27   :  { %v114_v25 = vmul.f32 %v1086_v2, %v43_v15  ;;  %v924_v27 = vpack.c.bf16 %v371_v22, %v370_v18  ;;  %v372_v28 = vsel %vm244_vm8, %v180_v8, %v308_v19  ;;  %v373_v29 = vsel %vm245_vm9, %v181_v9, %v309_v20  ;;  %v54_v20 = vld [vmem:[%s1503_s0 + $0x140] sm:$0xff] }
  0x28   :  { %v183_v30 = vadd.f32 %v1093_v5, %v112_v21  ;;  %v929_v32 = vpack.c.bf16 %v373_v29, %v372_v28  ;;  %vm246_vm10 = vcmp.ge.f32.partialorder %v182_v23, 0.0  ;;  %v310_v33 = vmul.f32 0.2, %v182_v23 }
  0x29   :  { %v184_v34 = vadd.f32 %v1093_v5, %v113_v24  ;;  %1036 = vst [vmem:[%s1506_s3 + $0x58] sm:$0xff] %v924_v27   ;;  %v185_v36 = vadd.f32 %v1093_v5, %v114_v25  ;;  %v115_v37 = vmul.f32 %v1086_v2, %v44_v26  ;;  %v116_v41 = vmul.f32 %v1086_v2, %v45_v31  ;;  %v55_v24 = vld [vmem:[%s1503_s0 + $0x148] sm:$0xff] }
  0x2a   :  { %vm247_vm11 = vcmp.ge.f32.partialorder %v183_v30, 0.0  ;;  %v311_v35 = vmul.f32 0.2, %v183_v30  ;;  %1037 = vst [vmem:[%s1506_s3 + $0x60] sm:$0xff] %v929_v32   ;;  %v374_v39 = vsel %vm246_vm10, %v182_v23, %v310_v33  ;;  %v117_v49 = vmul.f32 %v1086_v2, %v46_v38  ;;  %v56_v32 = vld [vmem:[%s1503_s0 + $0x150] sm:$0xff]  ;;  %v57_v33 = vld [vmem:[%s1503_s0 + $0x158] sm:$0xff] }
  0x2b   :  { %vm248_vm12 = vcmp.ge.f32.partialorder %v184_v34, 0.0  ;;  %v312_v40 = vmul.f32 0.2, %v184_v34  ;;  %vm249_vm13 = vcmp.ge.f32.partialorder %v185_v36, 0.0  ;;  %v313_v44 = vmul.f32 0.2, %v185_v36 }
  0x2c   :  { %v375_v43 = vsel %vm247_vm11, %v183_v30, %v311_v35  ;;  %v186_v45 = vadd.f32 %v1093_v5, %v115_v37  ;;  %v187_v48 = vadd.f32 %v1093_v5, %v116_v41  ;;  %v118_v54 = vmul.f32 %v1086_v2, %v47_v42  ;;  %v58_v37 = vld [vmem:[%s1503_s0 + $0x160] sm:$0xff] }
  0x2d   :  { %v934_v46 = vpack.c.bf16 %v375_v43, %v374_v39  ;;  %v376_v47 = vsel %vm248_vm12, %v184_v34, %v312_v40  ;;  %v377_v52 = vsel %vm249_vm13, %v185_v36, %v313_v44  ;;  %v188_v58 = vadd.f32 %v1093_v5, %v117_v49  ;;  %v60_v49 = vld [vmem:[%s1503_s0 + $0x170] sm:$0xff] }
  0x2e   :  { %vm250_vm14 = vcmp.ge.f32.partialorder %v186_v45, 0.0  ;;  %v314_v53 = vmul.f32 0.2, %v186_v45  ;;  %v939_v56 = vpack.c.bf16 %v377_v52, %v376_v47  ;;  %vm251_vm15 = vcmp.ge.f32.partialorder %v187_v48, 0.0 }
  0x2f   :  { %1038 = vst [vmem:[%s1506_s3 + $0x68] sm:$0xff] %v934_v46   ;;  %v315_v57 = vmul.f32 0.2, %v187_v48  ;;  %v189_v60 = vadd.f32 %v1093_v5, %v118_v54  ;;  %v119_v61 = vmul.f32 %v1086_v2, %v48_v50  ;;  %v120_v62 = vmul.f32 %v1086_v2, %v49_v51 }
  0x30   :  { %v378_v59 = vsel %vm250_vm14, %v186_v45, %v314_v53  ;;  %1039 = vst [vmem:[%s1506_s3 + $0x70] sm:$0xff] %v939_v56   ;;  %vm252_vm0 = vcmp.ge.f32.partialorder %v188_v58, 0.0  ;;  %v316_v1 = vmul.f32 0.2, %v188_v58  ;;  %v121_v3 = vmul.f32 %v1086_v2, %v50_v55  ;;  %v59_v45 = vld [vmem:[%s1503_s0 + $0x168] sm:$0xff] }
  0x31   :  { %v379_v0 = vsel %vm251_vm15, %v187_v48, %v315_v57  ;;  %vm253_vm1 = vcmp.ge.f32.partialorder %v189_v60, 0.0  ;;  %v317_v7 = vmul.f32 0.2, %v189_v60  ;;  %v190_v8 = vadd.f32 %v1093_v5, %v119_v61  ;;  %v61_v57 = vld [vmem:[%s1503_s0 + $0x178] sm:$0xff] }
  0x32   :  { %v944_v6 = vpack.c.bf16 %v379_v0, %v378_v59  ;;  %v380_v9 = vsel %vm252_vm0, %v188_v58, %v316_v1  ;;  %v191_v10 = vadd.f32 %v1093_v5, %v120_v62  ;;  %v122_v11 = vmul.f32 %v1086_v2, %v51_v63  ;;  %v62_v0 = vld [vmem:[%s1503_s0 + $0x180] sm:$0xff] }
  0x33   :  { %v192_v12 = vadd.f32 %v1093_v5, %v121_v3  ;;  %v381_v14 = vsel %vm253_vm1, %v189_v60, %v317_v7  ;;  %vm254_vm2 = vcmp.ge.f32.partialorder %v190_v8, 0.0  ;;  %v318_v15 = vmul.f32 0.2, %v190_v8 }
  0x34   :  { %1040 = vst [vmem:[%s1506_s3 + $0x78] sm:$0xff] %v944_v6   ;;  %v123_v16 = vmul.f32 %v1086_v2, %v52_v4  ;;  %v949_v17 = vpack.c.bf16 %v381_v14, %v380_v9  ;;  %vm255_vm3 = vcmp.ge.f32.partialorder %v191_v10, 0.0  ;;  %v319_v18 = vmul.f32 0.2, %v191_v10  ;;  %v63_v6 = vld [vmem:[%s1503_s0 + $0x188] sm:$0xff]  ;;  %v64_v14 = vld [vmem:[%s1503_s0 + $0x190] sm:$0xff] }
  0x35   :  { %v193_v19 = vadd.f32 %v1093_v5, %v122_v11  ;;  %v382_v21 = vsel %vm254_vm2, %v190_v8, %v318_v15  ;;  %vm256_vm4 = vcmp.ge.f32.partialorder %v192_v12, 0.0  ;;  %v320_v22 = vmul.f32 0.2, %v192_v12  ;;  %v65_v15 = vld [vmem:[%s1503_s0 + $0x198] sm:$0xff] }
  0x36   :  { %v124_v23 = vmul.f32 %v1086_v2, %v53_v13  ;;  %1041 = vst [vmem:[%s1506_s3 + $0x80] sm:$0xff] %v949_v17   ;;  %v383_v25 = vsel %vm255_vm3, %v191_v10, %v319_v18  ;;  %v194_v27 = vadd.f32 %v1093_v5, %v123_v16  ;;  %v125_v31 = vmul.f32 %v1086_v2, %v54_v20 }
  0x37   :  { %vm257_vm5 = vcmp.ge.f32.partialorder %v193_v19, 0.0  ;;  %v321_v26 = vmul.f32 0.2, %v193_v19  ;;  %v954_v28 = vpack.c.bf16 %v383_v25, %v382_v21  ;;  %v384_v29 = vsel %vm256_vm4, %v192_v12, %v320_v22 }
  0x38   :  { %v195_v30 = vadd.f32 %v1093_v5, %v124_v23  ;;  %vm258_vm6 = vcmp.ge.f32.partialorder %v194_v27, 0.0  ;;  %v322_v35 = vmul.f32 0.2, %v194_v27  ;;  %v126_v36 = vmul.f32 %v1086_v2, %v55_v24 }
  0x39   :  { %v385_v34 = vsel %vm257_vm5, %v193_v19, %v321_v26  ;;  %1042 = vst [vmem:[%s1506_s3 + $0x88] sm:$0xff] %v954_v28   ;;  %v196_v40 = vadd.f32 %v1093_v5, %v125_v31  ;;  %v127_v43 = vmul.f32 %v1086_v2, %v56_v32  ;;  %v128_v44 = vmul.f32 %v1086_v2, %v57_v33  ;;  %v66_v19 = vld [vmem:[%s1503_s0 + $0x1a0] sm:$0xff]  ;;  %v68_v31 = vld [vmem:[%s1503_s0 + $0x1b0] sm:$0xff] }
  0x3a   :  { %v959_v38 = vpack.c.bf16 %v385_v34, %v384_v29  ;;  %vm259_vm7 = vcmp.ge.f32.partialorder %v195_v30, 0.0  ;;  %v323_v39 = vmul.f32 0.2, %v195_v30  ;;  %v386_v41 = vsel %vm258_vm6, %v194_v27, %v322_v35  ;;  %v67_v27 = vld [vmem:[%s1503_s0 + $0x1a8] sm:$0xff] }
  0x3b   :  { %v197_v42 = vadd.f32 %v1093_v5, %v126_v36  ;;  %vm260_vm8 = vcmp.ge.f32.partialorder %v196_v40, 0.0  ;;  %v324_v47 = vmul.f32 0.2, %v196_v40  ;;  %v129_v48 = vmul.f32 %v1086_v2, %v58_v37 }
  0x3c   :  { %1043 = vst [vmem:[%s1506_s3 + $0x90] sm:$0xff] %v959_v38   ;;  %v387_v46 = vsel %vm259_vm7, %v195_v30, %v323_v39  ;;  %v198_v52 = vadd.f32 %v1093_v5, %v127_v43  ;;  %v199_v54 = vadd.f32 %v1093_v5, %v128_v44  ;;  %v130_v55 = vmul.f32 %v1086_v2, %v59_v45  ;;  %v69_v39 = vld [vmem:[%s1503_s0 + $0x1b8] sm:$0xff] }
  0x3d   :  { %v964_v50 = vpack.c.bf16 %v387_v46, %v386_v41  ;;  %vm261_vm9 = vcmp.ge.f32.partialorder %v197_v42, 0.0  ;;  %v325_v51 = vmul.f32 0.2, %v197_v42  ;;  %v388_v53 = vsel %vm260_vm8, %v196_v40, %v324_v47  ;;  %v70_v46 = vld [vmem:[%s1503_s0 + $0x1c0] sm:$0xff] }
  0x3e   :  { %v200_v56 = vadd.f32 %v1093_v5, %v129_v48  ;;  %vm262_vm10 = vcmp.ge.f32.partialorder %v198_v52, 0.0  ;;  %v326_v59 = vmul.f32 0.2, %v198_v52  ;;  %v131_v60 = vmul.f32 %v1086_v2, %v60_v49 }
  0x3f   :  { %1044 = vst [vmem:[%s1506_s3 + $0x98] sm:$0xff] %v964_v50   ;;  %v389_v58 = vsel %vm261_vm9, %v197_v42, %v325_v51  ;;  %vm263_vm11 = vcmp.ge.f32.partialorder %v199_v54, 0.0  ;;  %v327_v62 = vmul.f32 0.2, %v199_v54  ;;  %v201_v63 = vadd.f32 %v1093_v5, %v130_v55  ;;  %v71_v50 = vld [vmem:[%s1503_s0 + $0x1c8] sm:$0xff] }
  0x40   :  { %v969_v61 = vpack.c.bf16 %v389_v58, %v388_v53  ;;  %v390_v1 = vsel %vm262_vm10, %v198_v52, %v326_v59  ;;  %vm264_vm12 = vcmp.ge.f32.partialorder %v200_v56, 0.0  ;;  %v328_v3 = vmul.f32 0.2, %v200_v56  ;;  %v72_v58 = vld [vmem:[%s1503_s0 + $0x1d0] sm:$0xff]  ;;  %v73_v59 = vld [vmem:[%s1503_s0 + $0x1d8] sm:$0xff] }
  0x41   :  { %v132_v4 = vmul.f32 %v1086_v2, %v61_v57  ;;  %v391_v7 = vsel %vm263_vm11, %v199_v54, %v327_v62  ;;  %vm265_vm13 = vcmp.ge.f32.partialorder %v201_v63, 0.0  ;;  %v329_v8 = vmul.f32 0.2, %v201_v63 }
  0x42   :  { %1045 = vst [vmem:[%s1506_s3 + $0xa0] sm:$0xff] %v969_v61   ;;  %v202_v9 = vadd.f32 %v1093_v5, %v131_v60  ;;  %v974_v10 = vpack.c.bf16 %v391_v7, %v390_v1  ;;  %v392_v11 = vsel %vm264_vm12, %v200_v56, %v328_v3  ;;  %v133_v13 = vmul.f32 %v1086_v2, %v62_v0 }
  0x43   :  { %v203_v12 = vadd.f32 %v1093_v5, %v132_v4  ;;  %v393_v16 = vsel %vm265_vm13, %v201_v63, %v329_v8  ;;  %v134_v18 = vmul.f32 %v1086_v2, %v63_v6  ;;  %v135_v25 = vmul.f32 %v1086_v2, %v64_v14  ;;  %v74_v63 = vld [vmem:[%s1503_s0 + $0x1e0] sm:$0xff] }
  0x44   :  { %vm266_vm14 = vcmp.ge.f32.partialorder %v202_v9, 0.0  ;;  %v330_v17 = vmul.f32 0.2, %v202_v9  ;;  %1046 = vst [vmem:[%s1506_s3 + $0xa8] sm:$0xff] %v974_v10   ;;  %v979_v20 = vpack.c.bf16 %v393_v16, %v392_v11  ;;  %v204_v22 = vadd.f32 %v1093_v5, %v133_v13  ;;  %v76_v13 = vld [vmem:[%s1503_s0 + $0x1f0] sm:$0xff] }
  0x45   :  { %vm267_vm15 = vcmp.ge.f32.partialorder %v203_v12, 0.0  ;;  %v331_v21 = vmul.f32 0.2, %v203_v12  ;;  %v205_v24 = vadd.f32 %v1093_v5, %v134_v18  ;;  %v136_v26 = vmul.f32 %v1086_v2, %v65_v15 }
  0x46   :  { %v394_v23 = vsel %vm266_vm14, %v202_v9, %v330_v17  ;;  %1047 = vst [vmem:[%s1506_s3 + $0xb0] sm:$0xff] %v979_v20   ;;  %vm268_vm0 = vcmp.ge.f32.partialorder %v204_v22, 0.0  ;;  %v332_v29 = vmul.f32 0.2, %v204_v22  ;;  %v137_v30 = vmul.f32 %v1086_v2, %v66_v19  ;;  %v75_v9 = vld [vmem:[%s1503_s0 + $0x1e8] sm:$0xff] }
  0x47   :  { %v395_v28 = vsel %vm267_vm15, %v203_v12, %v331_v21  ;;  %vm269_vm1 = vcmp.ge.f32.partialorder %v205_v24, 0.0  ;;  %v333_v33 = vmul.f32 0.2, %v205_v24  ;;  %v206_v34 = vadd.f32 %v1093_v5, %v135_v25  ;;  %v77_v21 = vld [vmem:[%s1503_s0 + $0x1f8] sm:$0xff] }
  0x48   :  { %v984_v32 = vpack.c.bf16 %v395_v28, %v394_v23  ;;  %v396_v35 = vsel %vm268_vm0, %v204_v22, %v332_v29  ;;  %v207_v36 = vadd.f32 %v1093_v5, %v136_v26  ;;  %v138_v37 = vmul.f32 %v1086_v2, %v67_v27 }
  0x49   :  { %v208_v38 = vadd.f32 %v1093_v5, %v137_v30  ;;  %v397_v40 = vsel %vm269_vm1, %v205_v24, %v333_v33  ;;  %vm270_vm2 = vcmp.ge.f32.partialorder %v206_v34, 0.0  ;;  %v334_v41 = vmul.f32 0.2, %v206_v34 }
  0x4a   :  { %1048 = vst [vmem:[%s1506_s3 + $0xb8] sm:$0xff] %v984_v32   ;;  %v139_v42 = vmul.f32 %v1086_v2, %v68_v31  ;;  %v989_v43 = vpack.c.bf16 %v397_v40, %v396_v35  ;;  %vm271_vm3 = vcmp.ge.f32.partialorder %v207_v36, 0.0  ;;  %v335_v44 = vmul.f32 0.2, %v207_v36 }
  0x4b   :  { %v209_v45 = vadd.f32 %v1093_v5, %v138_v37  ;;  %v398_v47 = vsel %vm270_vm2, %v206_v34, %v334_v41  ;;  %vm272_vm4 = vcmp.ge.f32.partialorder %v208_v38, 0.0  ;;  %v336_v48 = vmul.f32 0.2, %v208_v38 }
  0x4c   :  { %v140_v49 = vmul.f32 %v1086_v2, %v69_v39  ;;  %1049 = vst [vmem:[%s1506_s3 + $0xc0] sm:$0xff] %v989_v43   ;;  %v399_v51 = vsel %vm271_vm3, %v207_v36, %v335_v44  ;;  %v210_v53 = vadd.f32 %v1093_v5, %v139_v42  ;;  %v141_v57 = vmul.f32 %v1086_v2, %v70_v46 }
  0x4d   :  { %vm273_vm5 = vcmp.ge.f32.partialorder %v209_v45, 0.0  ;;  %v337_v52 = vmul.f32 0.2, %v209_v45  ;;  %v994_v54 = vpack.c.bf16 %v399_v51, %v398_v47  ;;  %v400_v55 = vsel %vm272_vm4, %v208_v38, %v336_v48 }
  0x4e   :  { %v211_v56 = vadd.f32 %v1093_v5, %v140_v49  ;;  %vm274_vm6 = vcmp.ge.f32.partialorder %v210_v53, 0.0  ;;  %v338_v61 = vmul.f32 0.2, %v210_v53  ;;  %v142_v62 = vmul.f32 %v1086_v2, %v71_v50 }
  0x4f   :  { %v401_v60 = vsel %vm273_vm5, %v209_v45, %v337_v52  ;;  %1050 = vst [vmem:[%s1506_s3 + $0xc8] sm:$0xff] %v994_v54   ;;  %v212_v3 = vadd.f32 %v1093_v5, %v141_v57  ;;  %v143_v7 = vmul.f32 %v1086_v2, %v72_v58  ;;  %v144_v8 = vmul.f32 %v1086_v2, %v73_v59 }
  0x50   :  { %v999_v0 = vpack.c.bf16 %v401_v60, %v400_v55  ;;  %vm275_vm7 = vcmp.ge.f32.partialorder %v211_v56, 0.0  ;;  %v339_v1 = vmul.f32 0.2, %v211_v56  ;;  %v402_v4 = vsel %vm274_vm6, %v210_v53, %v338_v61 }
  0x51   :  { %v213_v6 = vadd.f32 %v1093_v5, %v142_v62  ;;  %vm276_vm8 = vcmp.ge.f32.partialorder %v212_v3, 0.0  ;;  %v340_v11 = vmul.f32 0.2, %v212_v3  ;;  %v145_v12 = vmul.f32 %v1086_v2, %v74_v63 }
  0x52   :  { %1051 = vst [vmem:[%s1506_s3 + $0xd0] sm:$0xff] %v999_v0   ;;  %v403_v10 = vsel %vm275_vm7, %v211_v56, %v339_v1  ;;  %v214_v16 = vadd.f32 %v1093_v5, %v143_v7  ;;  %v215_v18 = vadd.f32 %v1093_v5, %v144_v8  ;;  %v146_v19 = vmul.f32 %v1086_v2, %v75_v9 }
  0x53   :  { %v1004_v14 = vpack.c.bf16 %v403_v10, %v402_v4  ;;  %vm277_vm9 = vcmp.ge.f32.partialorder %v213_v6, 0.0  ;;  %v341_v15 = vmul.f32 0.2, %v213_v6  ;;  %v404_v17 = vsel %vm276_vm8, %v212_v3, %v340_v11 }
  0x54   :  { %v216_v20 = vadd.f32 %v1093_v5, %v145_v12  ;;  %vm278_vm10 = vcmp.ge.f32.partialorder %v214_v16, 0.0  ;;  %v342_v23 = vmul.f32 0.2, %v214_v16  ;;  %v147_v24 = vmul.f32 %v1086_v2, %v76_v13 }
  0x55   :  { %1052 = vst [vmem:[%s1506_s3 + $0xd8] sm:$0xff] %v1004_v14   ;;  %v405_v22 = vsel %vm277_vm9, %v213_v6, %v341_v15  ;;  %vm279_vm11 = vcmp.ge.f32.partialorder %v215_v18, 0.0  ;;  %v343_v26 = vmul.f32 0.2, %v215_v18  ;;  %v217_v27 = vadd.f32 %v1093_v5, %v146_v19 }
  0x56   :  { %v1009_v25 = vpack.c.bf16 %v405_v22, %v404_v17  ;;  %v406_v28 = vsel %vm278_vm10, %v214_v16, %v342_v23  ;;  %vm280_vm12 = vcmp.ge.f32.partialorder %v216_v20, 0.0  ;;  %v344_v29 = vmul.f32 0.2, %v216_v20 }
  0x57   :  { %v148_v30 = vmul.f32 %v1086_v2, %v77_v21  ;;  %v407_v31 = vsel %vm279_vm11, %v215_v18, %v343_v26  ;;  %vm281_vm13 = vcmp.ge.f32.partialorder %v217_v27, 0.0  ;;  %v345_v32 = vmul.f32 0.2, %v217_v27 }
  0x58   :  { %1053 = vst [vmem:[%s1506_s3 + $0xe0] sm:$0xff] %v1009_v25   ;;  %v218_v33 = vadd.f32 %v1093_v5, %v147_v24  ;;  %v1014_v34 = vpack.c.bf16 %v407_v31, %v406_v28  ;;  %v408_v35 = vsel %vm280_vm12, %v216_v20, %v344_v29 }
  0x59   :  { %v219_v36 = vadd.f32 %v1093_v5, %v148_v30  ;;  %v409_v37 = vsel %vm281_vm13, %v217_v27, %v345_v32 }
  0x5a   :  { %vm282_vm14 = vcmp.ge.f32.partialorder %v218_v33, 0.0  ;;  %v346_v38 = vmul.f32 0.2, %v218_v33  ;;  %1054 = vst [vmem:[%s1506_s3 + $0xe8] sm:$0xff] %v1014_v34   ;;  %v1019_v2 = vpack.c.bf16 %v409_v37, %v408_v35 }
  0x5b   :  { %vm283_vm15 = vcmp.ge.f32.partialorder %v219_v36, 0.0  ;;  %v347_v39 = vmul.f32 0.2, %v219_v36 }
  0x5c   :  { %v410_v40 = vsel %vm282_vm14, %v218_v33, %v346_v38  ;;  %1055 = vst [vmem:[%s1506_s3 + $0xf0] sm:$0xff] %v1019_v2  }
  0x5d   :  { %v411_v41 = vsel %vm283_vm15, %v219_v36, %v347_v39 }
  0x5e   :  { %v1024_v42 = vpack.c.bf16 %v411_v41, %v410_v40 }
  0x60   :  { %1056 = vst [vmem:[%s1506_s3 + $0xf8] sm:$0xff] %v1024_v42  }

// kernel: _lambda_.30
= control target key start
LH: loop header
LB: loop body
LE: loop exit
PB: predicated region body
PF: predicated region fallthrough
CT: control target
= control target key end

     0   :  { %s1307_s15 = smov 0   ;;  %s1309_s16 = smov 0   ;;  %s1556_s0 = inlined_call_operand.vmem [shape: bf16[512,48], index: 0, kind: input, shape index: {}]   ;;  %s1557_s1 = inlined_call_operand.vmem [shape: bf16[48,128], index: 1, kind: input, shape index: {}]   ;;  %s1558_s2 = inlined_call_operand.vmem [shape: f32[512,128], index: 2, kind: output, shape index: {0}]   ;;  %s1559_s3 = inlined_call_operand.vmem [shape: f32[1,128], index: 3, kind: output, shape index: {1}]   ;;  %s1560_s4 = inlined_call_operand.vmem [shape: f32[1,128], index: 4, kind: output, shape index: {2}]  }
   0x1   :  { %s1311_s17 = smov 0  }
   0x2 LB: > { %s30_s18 = sadd.s32 1, %s1274_s16  ;;  %p1102_p0 = scmp.ge.s32.totalorder %s1278_s17, 1  ;;  %s1278_s17 = sphi %s1311_s17, %s15_s17   ;;  %s1274_s16 = sphi %s1309_s16, %s1563_s16   ;;  %s1270_s15 = sphi %s1307_s15, %s1562_s15  }
   0x3   : > { %p32_p1 = scmp.ge.s32.totalorder %s30_s18, 2  ;;  %p210_p2 = scmp.lt.s32.totalorder %s1278_s17, 3 }
   0x5   : > { %s1565_s18 = smov (%p32_p1, %s30_s18), 0  ;;  %p211_p3 = pnand %p1102_p0, %p210_p2 }
   0x6   : > { %s1103_s19 = sshll.u32 (!%p211_p3), %s1270_s15, 5  ;;  %p326_p4 = scmp.eq.s32.totalorder (!%p211_p3), %s1270_s15, 0 }
   0x7   : > { %214 = sbr.rel (%p211_p3) target bundleno = 323 (0x143), region = 28  ;;  %p1331_p5 = scmp.lt.s32.totalorder (!%p211_p3), %s1103_s19, 63 }
   0xc   : > { %v1280_v0 = vmov 0.0   ;;  %s1567_s19 = smov (!%p1331_p5, %s1103_s19), 63  ;;  %v1281_v1 = vmov (%p326_p4), 0.0  }
   0xd   : > { %294 = vst [vmem:[#allocation2 + $0xb0] sm:$0xff] %v1280_v0  ;;  %295 = vst [vmem:[#allocation2] sm:$0xff] %v1280_v0  ;;  %s1104_s21 = sshll.u32 %s1567_s19, 2  ;;  %s1106_s22 = sshll.u32 %s1567_s19, 3 }
   0xe   : > { %296 = vst [vmem:[#allocation2 + $0xd8] sm:$0xff] %v1280_v0  ;;  %297 = vst [vmem:[#allocation2 + $0x18] sm:$0xff] %v1280_v0  ;;  %s1342_s25 = scalar_lea.vmem %s1556_s0, %s1104_s21  ;;  %s1347_s28 = scalar_lea.vmem %s1558_s2, %s1106_s22 }
   0xf   : > { %298 = vst [vmem:[#allocation2 + $0x50] sm:$0xff] %v1280_v0  ;;  %299 = vst [vmem:[#allocation2 + $0x68] sm:$0xff] %v1280_v0 }
  0x10   : > { %300 = vst [vmem:[#allocation2 + $0x30] sm:$0xff] %v1280_v0  ;;  %301 = vst [vmem:[#allocation2 + $0x48] sm:$0xff] %v1280_v0 }
  0x11   : > { %302 = vst [vmem:[#allocation2 + $0x80] sm:$0xff] %v1280_v0  ;;  %303 = vst [vmem:[#allocation2 + $0x88] sm:$0xff] %v1280_v0 }
  0x12   : > { %304 = vst [vmem:[#allocation2 + $0xe8] sm:$0xff] %v1280_v0  ;;  %305 = vst [vmem:[#allocation2 + $0xb8] sm:$0xff] %v1280_v0 }
  0x13   : > { %306 = vst [vmem:[#allocation2 + $0x60] sm:$0xff] %v1280_v0  ;;  %307 = vst [vmem:[#allocation2 + $0xf0] sm:$0xff] %v1280_v0 }
  0x14   : > { %308 = vst [vmem:[#allocation2 + $0x8] sm:$0xff] %v1280_v0  ;;  %309 = vst [vmem:[#allocation2 + $0x78] sm:$0xff] %v1280_v0 }
  0x15   : > { %310 = vst [vmem:[#allocation2 + $0x38] sm:$0xff] %v1280_v0  ;;  %311 = vst [vmem:[#allocation2 + $0x58] sm:$0xff] %v1280_v0 }
  0x16   : > { %312 = vst [vmem:[#allocation2 + $0x40] sm:$0xff] %v1280_v0  ;;  %313 = vst [vmem:[#allocation2 + $0xc8] sm:$0xff] %v1280_v0 }
  0x17   : > { %314 = vst [vmem:[#allocation2 + $0xe0] sm:$0xff] %v1280_v0  ;;  %315 = vst [vmem:[#allocation2 + $0x90] sm:$0xff] %v1280_v0 }
  0x18   : > { %316 = vst [vmem:[#allocation2 + $0x70] sm:$0xff] %v1280_v0  ;;  %317 = vst [vmem:[#allocation2 + $0xc0] sm:$0xff] %v1280_v0  ;;  %330 = sbr.rel (!%p326_p4) target bundleno = 30 (0x1e), region = 36 }
  0x19   : > { %318 = vst [vmem:[#allocation2 + $0xa8] sm:$0xff] %v1280_v0  ;;  %319 = vst [vmem:[#allocation2 + $0xd0] sm:$0xff] %v1280_v0 }
  0x1a   : > { %320 = vst [vmem:[#allocation2 + $0x10] sm:$0xff] %v1280_v0  ;;  %321 = vst [vmem:[#allocation2 + $0x28] sm:$0xff] %v1280_v0 }
  0x1b   : > { %322 = vst [vmem:[#allocation2 + $0xa0] sm:$0xff] %v1280_v0  ;;  %323 = vst [vmem:[#allocation2 + $0xf8] sm:$0xff] %v1280_v0 }
  0x1c   : > { %324 = vst [vmem:[#allocation2 + $0x20] sm:$0xff] %v1280_v0  ;;  %325 = vst [vmem:[#allocation2 + $0x98] sm:$0xff] %v1280_v0 }
  0x1d   : > { %331 = vst [vmem:[%s1559_s3] sm:$0x1] %v1281_v1  ;;  %332 = vst [vmem:[%s1560_s4] sm:$0x1] %v1281_v1 }
  0x1e PF: > { %v1237_v2 = vld [vmem:[%s1557_s1 + $0x10] sm:$0xff]   ;;  %v1238_v3 = vld [vmem:[%s1557_s1 + $0x8] sm:$0xff]   ;;  %vm501_vm0 = vcmask 392192   ;;  %v1240_v4 = vld [vmem:[%s1342_s25] sm:$0xff]  }
  0x1f   : > { %1167 = vmatprep.subr.bf16.mxu0 %v1237_v2  ;;  %1205 = vmatprep.subr.bf16.mxu1 %v1237_v2  ;;  %v1239_v5 = vld [vmem:[%s1557_s1] sm:$0xff]   ;;  %v1241_v6 = vld [vmem:[%s1342_s25 + $0x8] sm:$0xff]   ;;  %v1242_v7 = vld [vmem:[%s1342_s25 + $0x10] sm:$0xff]  }
  0x20   : > { %1168 = vmatpush3.bf16.msra.mxu0 %v1237_v2  ;;  %1208 = vmatpush3.bf16.msra.mxu1 %v1237_v2  ;;  %v1248_v8 = vld [vmem:[%s1342_s25 + $0x40] sm:$0xff]   ;;  %v1249_v9 = vld [vmem:[%s1342_s25 + $0x48] sm:$0xff]   ;;  %v1250_v10 = vld [vmem:[%s1342_s25 + $0x50] sm:$0xff]  }
  0x21   : > { %1169 = vmatprep.subr.bf16.mxu0 %v1238_v3  ;;  %1206 = vmatprep.subr.bf16.mxu1 %v1238_v3  ;;  %v1243_v11 = vld [vmem:[%s1342_s25 + $0x18] sm:$0xff]   ;;  %v1244_v13 = vld [vmem:[%s1342_s25 + $0x20] sm:$0xff]   ;;  %v1245_v15 = vld [vmem:[%s1342_s25 + $0x28] sm:$0xff]  }
  0x22   : > { %1173 = vmatprep.mubr.msk.bf16.mxu0 %vm501_vm0, %v1240_v4  ;;  %1189 = vmatprep.mubr.msk.bf16.mxu1 %vm501_vm0, %v1248_v8  ;;  %v1251_v12 = vld [vmem:[%s1342_s25 + $0x58] sm:$0xff]   ;;  %v1252_v14 = vld [vmem:[%s1342_s25 + $0x60] sm:$0xff]   ;;  %v1253_v16 = vld [vmem:[%s1342_s25 + $0x68] sm:$0xff]  }
  0x23   : > { %v1246_v17 = vld [vmem:[%s1342_s25 + $0x30] sm:$0xff]   ;;  %v1247_v19 = vld [vmem:[%s1342_s25 + $0x38] sm:$0xff]   ;;  %v351_v22 = vld [vmem:[#allocation2 + $0x40] sm:$0xff] }
  0x24   : > { %1170 = vmatpush3.bf16.msra.mxu0 %v1238_v3  ;;  %1209 = vmatpush3.bf16.msra.mxu1 %v1238_v3  ;;  %v1254_v18 = vld [vmem:[%s1342_s25 + $0x70] sm:$0xff]   ;;  %v1255_v20 = vld [vmem:[%s1342_s25 + $0x78] sm:$0xff]   ;;  %v352_v32 = vld [vmem:[#allocation2 + $0xc8] sm:$0xff] }
  0x25   : > { %1171 = vmatprep.subr.bf16.mxu0 %v1239_v5  ;;  %1207 = vmatprep.subr.bf16.mxu1 %v1239_v5  ;;  %v335_v21 = vld [vmem:[#allocation2 + $0xd8] sm:$0xff]  ;;  %v333_v24 = vld [vmem:[#allocation2 + $0xb0] sm:$0xff]  ;;  %v334_v36 = vld [vmem:[#allocation2] sm:$0xff] }
  0x26   : > { %v349_v26 = vld [vmem:[#allocation2 + $0x38] sm:$0xff]  ;;  %v339_v42 = vld [vmem:[#allocation2 + $0x30] sm:$0xff]  ;;  %v353_v54 = vld [vmem:[#allocation2 + $0xe0] sm:$0xff] }
  0x27   : > { %v336_v30 = vld [vmem:[#allocation2 + $0x18] sm:$0xff]  ;;  %v355_v46 = vld [vmem:[#allocation2 + $0x70] sm:$0xff]  ;;  %v340_v56 = vld [vmem:[#allocation2 + $0x48] sm:$0xff] }
  0x28   : > { %1172 = vmatpush3.bf16.msra.mxu0 %v1239_v5  ;;  %1210 = vmatpush3.bf16.msra.mxu1 %v1239_v5  ;;  %v350_v38 = vld [vmem:[#allocation2 + $0x58] sm:$0xff]  ;;  %v337_v48 = vld [vmem:[#allocation2 + $0x50] sm:$0xff]  ;;  %v356_v63 = vld [vmem:[#allocation2 + $0xc0] sm:$0xff] }
  0x29   : > { %v338_v1 = vld [vmem:[#allocation2 + $0x68] sm:$0xff]  ;;  %v354_v8 = vld [vmem:[#allocation2 + $0x90] sm:$0xff] }
  0x2b   : > { %1174 = vmatmul.mubr.msk.bf16.vlgmr.msra.gmra.mxu0 %vm501_vm0, %v1241_v6  ;;  %1190 = vmatmul.mubr.msk.bf16.vlgmr.msra.gmra.mxu1 %vm501_vm0, %v1249_v9 }
  0x2c   : > { %1177 = vmatprep.mubr.msk.bf16.mxu0 %vm501_vm0, %v1242_v7  ;;  %1193 = vmatprep.mubr.msk.bf16.mxu1 %vm501_vm0, %v1250_v10  ;;  %v343_v10 = vld [vmem:[#allocation2 + $0xe8] sm:$0xff] }
  0x33   : > { %1178 = vmatmul.mubr.msk.bf16.gmra.mxu0 %vm501_vm0, %v1243_v11  ;;  %1194 = vmatmul.mubr.msk.bf16.gmra.mxu1 %vm501_vm0, %v1251_v12 }
  0x34   : > { %1181 = vmatprep.mubr.msk.bf16.mxu0 %vm501_vm0, %v1244_v13  ;;  %1197 = vmatprep.mubr.msk.bf16.mxu1 %vm501_vm0, %v1252_v14 }
  0x3b   : > { %1182 = vmatmul.mubr.msk.bf16.gmra.mxu0 %vm501_vm0, %v1245_v15  ;;  %1198 = vmatmul.mubr.msk.bf16.gmra.mxu1 %vm501_vm0, %v1253_v16 }
  0x3c   : > { %1185 = vmatprep.mubr.msk.bf16.mxu0 %vm501_vm0, %v1246_v17  ;;  %1201 = vmatprep.mubr.msk.bf16.mxu1 %vm501_vm0, %v1254_v18  ;;  %v359_v17 = vld [vmem:[#allocation2 + $0x10] sm:$0xff] }
  0x43   : > { %1186 = vmatmul.mubr.msk.bf16.gmra.mxu0 %vm501_vm0, %v1247_v19  ;;  %1202 = vmatmul.mubr.msk.bf16.gmra.mxu1 %vm501_vm0, %v1255_v20  ;;  %v341_v19 = vld [vmem:[#allocation2 + $0x80] sm:$0xff] }
  0xeb   : > { %v1175_v23 = vpop.f32.mrf.mxu0  ;;  %v1191_v25 = vpop.f32.mrf.mxu1 }
  0xec   : > { %v713_v27 = vadd.f32 %v1175_v23, %v335_v21  ;;  %v1398_v28 = vadd.f32 %v1191_v25, %v351_v22 }
  0xed   : > { %v584_v29 = vpop.f32.mrf.mxu0  ;;  %v648_v31 = vpop.f32.mrf.mxu1 }
  0xee   : > { %745 = vst [vmem:[#allocation2 + $0xd8] sm:$0xff] %v713_v27  ;;  %812 = vst [vmem:[%s1347_s28 + $0x10] sm:$0xff] %v713_v27  ;;  %v711_v33 = vadd.f32 %v584_v29, %v333_v24  ;;  %v1404_v34 = vadd.f32 %v648_v31, %v349_v26  ;;  %v885_v59 = vmul.f32 %v713_v27, %v713_v27  ;;  %v357_v26 = vld [vmem:[#allocation2 + $0xa8] sm:$0xff]  ;;  %v344_v29 = vld [vmem:[#allocation2 + $0xb8] sm:$0xff] }
  0xef   : > { %761 = vst [vmem:[#allocation2 + $0x40] sm:$0xff] %v1398_v28  ;;  %828 = vst [vmem:[%s1347_s28 + $0x90] sm:$0xff] %v1398_v28  ;;  %v1176_v35 = vpop.f32.mrf.mxu0  ;;  %v1192_v37 = vpop.f32.mrf.mxu1 }
  0xf0   : > { %743 = vst [vmem:[#allocation2 + $0xb0] sm:$0xff] %v711_v33  ;;  %810 = vst [vmem:[%s1347_s28] sm:$0xff] %v711_v33  ;;  %v714_v39 = vadd.f32 %v1176_v35, %v336_v30  ;;  %v1410_v40 = vadd.f32 %v1192_v37, %v352_v32  ;;  %v883_v50 = vmul.f32 %v711_v33, %v711_v33  ;;  %v360_v37 = vld [vmem:[#allocation2 + $0x28] sm:$0xff] }
  0xf1   : > { %759 = vst [vmem:[#allocation2 + $0x38] sm:$0xff] %v1404_v34  ;;  %826 = vst [vmem:[%s1347_s28 + $0x80] sm:$0xff] %v1404_v34  ;;  %v587_v41 = vpop.f32.mrf.mxu0  ;;  %v651_v43 = vpop.f32.mrf.mxu1 }
  0xf2   : > { %746 = vst [vmem:[#allocation2 + $0x18] sm:$0xff] %v714_v39  ;;  %813 = vst [vmem:[%s1347_s28 + $0x18] sm:$0xff] %v714_v39  ;;  %v712_v44 = vadd.f32 %v587_v41, %v334_v36  ;;  %v1416_v45 = vadd.f32 %v651_v43, %v350_v38  ;;  %v886_v4 = vmul.f32 %v714_v39, %v714_v39 }
  0xf3   : > { %762 = vst [vmem:[#allocation2 + $0xc8] sm:$0xff] %v1410_v40  ;;  %829 = vst [vmem:[%s1347_s28 + $0x98] sm:$0xff] %v1410_v40  ;;  %v1179_v47 = vpop.f32.mrf.mxu0  ;;  %v1195_v49 = vpop.f32.mrf.mxu1 }
  0xf4   : > { %744 = vst [vmem:[#allocation2] sm:$0xff] %v712_v44  ;;  %811 = vst [vmem:[%s1347_s28 + $0x8] sm:$0xff] %v712_v44  ;;  %v843_v51 = vadd.f32 %v712_v44, %v711_v33  ;;  %v884_v52 = vmul.f32 %v712_v44, %v712_v44  ;;  %v717_v53 = vadd.f32 %v1179_v47, %v339_v42 }
  0xf5   : > { %760 = vst [vmem:[#allocation2 + $0x58] sm:$0xff] %v1416_v45  ;;  %827 = vst [vmem:[%s1347_s28 + $0x88] sm:$0xff] %v1416_v45  ;;  %v600_v55 = vpop.f32.mrf.mxu0  ;;  %v1422_v57 = vadd.f32 %v1195_v49, %v355_v46  ;;  %v664_v58 = vpop.f32.mrf.mxu1 }
  0xf6   : > { %v844_v60 = vadd.f32 %v843_v51, %v713_v27  ;;  %v915_v61 = vadd.f32 %v884_v52, %v883_v50  ;;  %749 = vst [vmem:[#allocation2 + $0x30] sm:$0xff] %v717_v53  ;;  %816 = vst [vmem:[%s1347_s28 + $0x30] sm:$0xff] %v717_v53  ;;  %v715_v62 = vadd.f32 %v600_v55, %v337_v48  ;;  %v358_v48 = vld [vmem:[#allocation2 + $0xd0] sm:$0xff]  ;;  %v347_v50 = vld [vmem:[#allocation2 + $0x8] sm:$0xff] }
  0xf7   : > { %v1180_v0 = vpop.f32.mrf.mxu0  ;;  %765 = vst [vmem:[#allocation2 + $0x70] sm:$0xff] %v1422_v57  ;;  %832 = vst [vmem:[%s1347_s28 + $0xb0] sm:$0xff] %v1422_v57  ;;  %v1428_v2 = vadd.f32 %v664_v58, %v353_v54  ;;  %v1196_v3 = vpop.f32.mrf.mxu1  ;;  %v889_v32 = vmul.f32 %v717_v53, %v717_v53  ;;  %v363_v58 = vld [vmem:[#allocation2 + $0x20] sm:$0xff] }
  0xf8   : > { %v916_v5 = vadd.f32 %v915_v61, %v885_v59  ;;  %747 = vst [vmem:[#allocation2 + $0x50] sm:$0xff] %v715_v62  ;;  %814 = vst [vmem:[%s1347_s28 + $0x20] sm:$0xff] %v715_v62  ;;  %v845_v6 = vadd.f32 %v844_v60, %v714_v39  ;;  %v718_v7 = vadd.f32 %v1180_v0, %v340_v56  ;;  %v342_v39 = vld [vmem:[#allocation2 + $0x88] sm:$0xff]  ;;  %v345_v60 = vld [vmem:[#allocation2 + $0x60] sm:$0xff] }
  0xf9   : > { %v603_v9 = vpop.f32.mrf.mxu0  ;;  %763 = vst [vmem:[#allocation2 + $0xe0] sm:$0xff] %v1428_v2  ;;  %830 = vst [vmem:[%s1347_s28 + $0xa0] sm:$0xff] %v1428_v2  ;;  %v1434_v11 = vadd.f32 %v1196_v3, %v356_v63  ;;  %v667_v12 = vpop.f32.mrf.mxu1  ;;  %v887_v14 = vmul.f32 %v715_v62, %v715_v62 }
  0xfa   : > { %v846_v13 = vadd.f32 %v845_v6, %v715_v62  ;;  %v917_v15 = vadd.f32 %v916_v5, %v886_v4  ;;  %750 = vst [vmem:[#allocation2 + $0x48] sm:$0xff] %v718_v7  ;;  %817 = vst [vmem:[%s1347_s28 + $0x38] sm:$0xff] %v718_v7  ;;  %v716_v16 = vadd.f32 %v603_v9, %v338_v1  ;;  %v361_v4 = vld [vmem:[#allocation2 + $0xa0] sm:$0xff]  ;;  %v348_v6 = vld [vmem:[#allocation2 + $0x78] sm:$0xff] }
  0xfb   : > { %v1183_v18 = vpop.f32.mrf.mxu0  ;;  %766 = vst [vmem:[#allocation2 + $0xc0] sm:$0xff] %v1434_v11  ;;  %833 = vst [vmem:[%s1347_s28 + $0xb8] sm:$0xff] %v1434_v11  ;;  %v1440_v20 = vadd.f32 %v667_v12, %v354_v8  ;;  %v1199_v21 = vpop.f32.mrf.mxu1  ;;  %v890_v43 = vmul.f32 %v718_v7, %v718_v7 }
  0xfc   : > { %v918_v22 = vadd.f32 %v917_v15, %v887_v14  ;;  %748 = vst [vmem:[#allocation2 + $0x68] sm:$0xff] %v716_v16  ;;  %815 = vst [vmem:[%s1347_s28 + $0x28] sm:$0xff] %v716_v16  ;;  %v847_v23 = vadd.f32 %v846_v13, %v716_v16  ;;  %v888_v24 = vmul.f32 %v716_v16, %v716_v16  ;;  %v364_v14 = vld [vmem:[#allocation2 + $0x98] sm:$0xff]  ;;  %v346_v16 = vld [vmem:[#allocation2 + $0xf0] sm:$0xff] }
  0xfd   : > { %v721_v25 = vadd.f32 %v1183_v18, %v343_v10  ;;  %v616_v27 = vpop.f32.mrf.mxu0  ;;  %764 = vst [vmem:[#allocation2 + $0x90] sm:$0xff] %v1440_v20  ;;  %831 = vst [vmem:[%s1347_s28 + $0xa8] sm:$0xff] %v1440_v20  ;;  %v1446_v30 = vadd.f32 %v1199_v21, %v359_v17  ;;  %v680_v31 = vpop.f32.mrf.mxu1 }
  0xfe   : > { %v848_v33 = vadd.f32 %v847_v23, %v717_v53  ;;  %v919_v35 = vadd.f32 %v918_v22, %v888_v24  ;;  %v719_v36 = vadd.f32 %v616_v27, %v341_v19  ;;  %v1452_v41 = vadd.f32 %v680_v31, %v357_v26  ;;  %v362_v24 = vld [vmem:[#allocation2 + $0xf8] sm:$0xff] }
  0xff   : > { %753 = vst [vmem:[#allocation2 + $0xe8] sm:$0xff] %v721_v25  ;;  %820 = vst [vmem:[%s1347_s28 + $0x50] sm:$0xff] %v721_v25  ;;  %v1184_v38 = vpop.f32.mrf.mxu0  ;;  %v1200_v42 = vpop.f32.mrf.mxu1  ;;  %v893_v9 = vmul.f32 %v721_v25, %v721_v25 }
 0x100   : > { %769 = vst [vmem:[#allocation2 + $0x10] sm:$0xff] %v1446_v30  ;;  %836 = vst [vmem:[%s1347_s28 + $0xd0] sm:$0xff] %v1446_v30  ;;  %v920_v44 = vadd.f32 %v919_v35, %v889_v32  ;;  %v849_v46 = vadd.f32 %v848_v33, %v718_v7  ;;  %v722_v47 = vadd.f32 %v1184_v38, %v344_v29 }
 0x101   : > { %751 = vst [vmem:[#allocation2 + $0x80] sm:$0xff] %v719_v36  ;;  %818 = vst [vmem:[%s1347_s28 + $0x40] sm:$0xff] %v719_v36  ;;  %v619_v49 = vpop.f32.mrf.mxu0  ;;  %v1458_v51 = vadd.f32 %v1200_v42, %v360_v37  ;;  %v683_v52 = vpop.f32.mrf.mxu1  ;;  %v891_v54 = vmul.f32 %v719_v36, %v719_v36 }
 0x102   : > { %767 = vst [vmem:[#allocation2 + $0xa8] sm:$0xff] %v1452_v41  ;;  %834 = vst [vmem:[%s1347_s28 + $0xc0] sm:$0xff] %v1452_v41  ;;  %v850_v53 = vadd.f32 %v849_v46, %v719_v36  ;;  %v921_v55 = vadd.f32 %v920_v44, %v890_v43  ;;  %v720_v56 = vadd.f32 %v619_v49, %v342_v39 }
 0x103   : > { %754 = vst [vmem:[#allocation2 + $0xb8] sm:$0xff] %v722_v47  ;;  %821 = vst [vmem:[%s1347_s28 + $0x58] sm:$0xff] %v722_v47  ;;  %v1187_v59 = vpop.f32.mrf.mxu0  ;;  %v1464_v61 = vadd.f32 %v683_v52, %v358_v48  ;;  %v1203_v62 = vpop.f32.mrf.mxu1  ;;  %v894_v19 = vmul.f32 %v722_v47, %v722_v47  ;;  %v899_v48 = vmul.f32 %v1404_v34, %v1404_v34 }
 0x104   : > { %770 = vst [vmem:[#allocation2 + $0x28] sm:$0xff] %v1458_v51  ;;  %837 = vst [vmem:[%s1347_s28 + $0xd8] sm:$0xff] %v1458_v51  ;;  %v922_v63 = vadd.f32 %v921_v55, %v891_v54  ;;  %v851_v0 = vadd.f32 %v850_v53, %v720_v56  ;;  %v892_v1 = vmul.f32 %v720_v56, %v720_v56 }
 0x105   : > { %752 = vst [vmem:[#allocation2 + $0x88] sm:$0xff] %v720_v56  ;;  %819 = vst [vmem:[%s1347_s28 + $0x48] sm:$0xff] %v720_v56  ;;  %v725_v3 = vadd.f32 %v1187_v59, %v347_v50  ;;  %v632_v5 = vpop.f32.mrf.mxu0  ;;  %v1470_v7 = vadd.f32 %v1203_v62, %v363_v58  ;;  %v696_v8 = vpop.f32.mrf.mxu1  ;;  %v900_v53 = vmul.f32 %v1416_v45, %v1416_v45 }
 0x106   : > { %768 = vst [vmem:[#allocation2 + $0xd0] sm:$0xff] %v1464_v61  ;;  %835 = vst [vmem:[%s1347_s28 + $0xc8] sm:$0xff] %v1464_v61  ;;  %v852_v10 = vadd.f32 %v851_v0, %v721_v25  ;;  %v923_v12 = vadd.f32 %v922_v63, %v892_v1  ;;  %v723_v13 = vadd.f32 %v632_v5, %v345_v60 }
 0x107   : > { %757 = vst [vmem:[#allocation2 + $0x8] sm:$0xff] %v725_v3  ;;  %824 = vst [vmem:[%s1347_s28 + $0x70] sm:$0xff] %v725_v3  ;;  %v1188_v15 = vpop.f32.mrf.mxu0  ;;  %v1476_v17 = vadd.f32 %v696_v8, %v361_v4  ;;  %v1204_v18 = vpop.f32.mrf.mxu1  ;;  %v897_v39 = vmul.f32 %v725_v3, %v725_v3  ;;  %v901_v55 = vmul.f32 %v1398_v28, %v1398_v28 }
 0x108   : > { %773 = vst [vmem:[#allocation2 + $0x20] sm:$0xff] %v1470_v7  ;;  %840 = vst [vmem:[%s1347_s28 + $0xf0] sm:$0xff] %v1470_v7  ;;  %v924_v21 = vadd.f32 %v923_v12, %v893_v9  ;;  %v853_v22 = vadd.f32 %v852_v10, %v722_v47  ;;  %v726_v23 = vadd.f32 %v1188_v15, %v348_v6 }
 0x109   : > { %755 = vst [vmem:[#allocation2 + $0x60] sm:$0xff] %v723_v13  ;;  %822 = vst [vmem:[%s1347_s28 + $0x60] sm:$0xff] %v723_v13  ;;  %v635_v25 = vpop.f32.mrf.mxu0  ;;  %v1482_v26 = vadd.f32 %v1204_v18, %v364_v14  ;;  %v699_v27 = vpop.f32.mrf.mxu1  ;;  %v895_v31 = vmul.f32 %v723_v13, %v723_v13  ;;  %v902_v59 = vmul.f32 %v1410_v40, %v1410_v40 }
 0x10a   : > { %771 = vst [vmem:[#allocation2 + $0xa0] sm:$0xff] %v1476_v17  ;;  %838 = vst [vmem:[%s1347_s28 + $0xe0] sm:$0xff] %v1476_v17  ;;  %v854_v29 = vadd.f32 %v853_v22, %v723_v13  ;;  %v925_v32 = vadd.f32 %v924_v21, %v894_v19  ;;  %v724_v33 = vadd.f32 %v635_v25, %v346_v16 }
 0x10b   : > { %758 = vst [vmem:[#allocation2 + $0x78] sm:$0xff] %v726_v23  ;;  %825 = vst [vmem:[%s1347_s28 + $0x78] sm:$0xff] %v726_v23  ;;  %v740_v35 = vadd.f32 %v699_v27, %v362_v24  ;;  %v898_v44 = vmul.f32 %v726_v23, %v726_v23  ;;  %v903_v63 = vmul.f32 %v1428_v2, %v1428_v2 }
 0x10c   : > { %774 = vst [vmem:[#allocation2 + $0x98] sm:$0xff] %v1482_v26  ;;  %841 = vst [vmem:[%s1347_s28 + $0xf8] sm:$0xff] %v1482_v26  ;;  %v926_v36 = vadd.f32 %v925_v32, %v895_v31  ;;  %v855_v37 = vadd.f32 %v854_v29, %v724_v33  ;;  %v896_v38 = vmul.f32 %v724_v33, %v724_v33 }
 0x10d   : > { %756 = vst [vmem:[#allocation2 + $0xf0] sm:$0xff] %v724_v33  ;;  %823 = vst [vmem:[%s1347_s28 + $0x68] sm:$0xff] %v724_v33  ;;  %v907_v9 = vmul.f32 %v1452_v41, %v1452_v41  ;;  %v908_v13 = vmul.f32 %v1464_v61, %v1464_v61  ;;  %v911_v19 = vmul.f32 %v1476_v17, %v1476_v17 }
 0x10e   : > { %772 = vst [vmem:[#allocation2 + $0xf8] sm:$0xff] %v740_v35  ;;  %839 = vst [vmem:[%s1347_s28 + $0xe8] sm:$0xff] %v740_v35  ;;  %v856_v42 = vadd.f32 %v855_v37, %v725_v3  ;;  %v927_v43 = vadd.f32 %v926_v36, %v896_v38  ;;  %v904_v3 = vmul.f32 %v1440_v20, %v1440_v20 }
 0x10f   : > { %v913_v24 = vmul.f32 %v1470_v7, %v1470_v7  ;;  %v914_v27 = vmul.f32 %v1482_v26, %v1482_v26 }
 0x110   : > { %v928_v46 = vadd.f32 %v927_v43, %v897_v39  ;;  %v857_v47 = vadd.f32 %v856_v42, %v726_v23  ;;  %v912_v23 = vmul.f32 %v740_v35, %v740_v35 }
 0x112   : > { %v858_v49 = vadd.f32 %v857_v47, %v1404_v34  ;;  %v929_v50 = vadd.f32 %v928_v46, %v898_v44 }
 0x114   : > { %v859_v52 = vadd.f32 %v858_v49, %v1416_v45  ;;  %v930_v54 = vadd.f32 %v929_v50, %v899_v48 }
 0x116   : > { %v860_v56 = vadd.f32 %v859_v52, %v1398_v28  ;;  %v931_v58 = vadd.f32 %v930_v54, %v900_v53  ;;  %v905_v28 = vmul.f32 %v1422_v57, %v1422_v57 }
 0x118   : > { %v932_v60 = vadd.f32 %v931_v58, %v901_v55  ;;  %v861_v62 = vadd.f32 %v860_v56, %v1410_v40  ;;  %v906_v40 = vmul.f32 %v1434_v11, %v1434_v11 }
 0x11a   : > { %v862_v34 = vadd.f32 %v861_v62, %v1428_v2  ;;  %v933_v0 = vadd.f32 %v932_v60, %v902_v59 }
 0x11c   : > { %v934_v45 = vadd.f32 %v933_v0, %v903_v63  ;;  %v863_v1 = vadd.f32 %v862_v34, %v1440_v20 }
 0x11e   : > { %v864_v4 = vadd.f32 %v863_v1, %v1422_v57  ;;  %v935_v5 = vadd.f32 %v934_v45, %v904_v3  ;;  %v909_v57 = vmul.f32 %v1446_v30, %v1446_v30 }
 0x120   : > { %v936_v6 = vadd.f32 %v935_v5, %v905_v28  ;;  %v865_v8 = vadd.f32 %v864_v4, %v1434_v11  ;;  %v910_v11 = vmul.f32 %v1458_v51, %v1458_v51 }
 0x122   : > { %v866_v2 = vadd.f32 %v865_v8, %v1452_v41  ;;  %v937_v10 = vadd.f32 %v936_v6, %v906_v40 }
 0x124   : > { %v938_v12 = vadd.f32 %v937_v10, %v907_v9  ;;  %v867_v20 = vadd.f32 %v866_v2, %v1464_v61 }
 0x126   : > { %v868_v14 = vadd.f32 %v867_v20, %v1446_v30  ;;  %v939_v15 = vadd.f32 %v938_v12, %v908_v13 }
 0x128   : > { %v940_v16 = vadd.f32 %v939_v15, %v909_v57  ;;  %v869_v18 = vadd.f32 %v868_v14, %v1458_v51 }
 0x12a   : > { %v870_v41 = vadd.f32 %v869_v18, %v1476_v17  ;;  %v941_v21 = vadd.f32 %v940_v16, %v910_v11 }
 0x12c   : > { %v942_v22 = vadd.f32 %v941_v21, %v911_v19  ;;  %v871_v61 = vadd.f32 %v870_v41, %v740_v35 }
 0x12e   : > { %v872_v30 = vadd.f32 %v871_v61, %v1470_v7  ;;  %v943_v25 = vadd.f32 %v942_v22, %v912_v23  ;;  %v842_v7 = vld [vmem:[%s1559_s3] sm:$0x1] }
 0x130   : > { %v873_v51 = vadd.f32 %v872_v30, %v1482_v26  ;;  %v944_v29 = vadd.f32 %v943_v25, %v913_v24  ;;  %v882_v26 = vld [vmem:[%s1560_s4] sm:$0x1] }
 0x132   : > { %v874_v31 = vrot.slane %v873_v51, 4  ;;  %v945_v32 = vadd.f32 %v944_v29, %v914_v27 }
 0x134   : > { %v875_v33 = vadd.f32 %v874_v31, %v873_v51  ;;  %v946_v17 = vrot.slane %v945_v32, 4 }
 0x136   : > { %v876_v36 = vrot.slane %v875_v33, 2  ;;  %v947_v37 = vadd.f32 %v946_v17, %v945_v32 }
 0x138   : > { %v877_v38 = vadd.f32 %v876_v36, %v875_v33  ;;  %v948_v35 = vrot.slane %v947_v37, 2 }
 0x13a   : > { %v878_v39 = vrot.slane %v877_v38, 1  ;;  %v949_v42 = vadd.f32 %v948_v35, %v947_v37 }
 0x13c   : > { %v879_v43 = vadd.f32 %v878_v39, %v877_v38  ;;  %v950_v44 = vrot.slane %v949_v42, 1 }
 0x13e   : > { %v880_v46 = vadd.f32 %v879_v43, %v842_v7  ;;  %v951_v47 = vadd.f32 %v950_v44, %v949_v42 }
 0x140   : > { %881 = vst [vmem:[%s1559_s3] sm:$0x1] %v880_v46  ;;  %v952_v48 = vadd.f32 %v951_v47, %v882_v26 }
 0x142   : > { %953 = vst [vmem:[%s1560_s4] sm:$0x1] %v952_v48 }
 0x143 PF: > { %s15_s17 = sadd.s32 1, %s1278_s17   ;;  %s1562_s15 = smov %s1274_s16 }
 0x144   : > { %p12_p6 = scmp.ge.s32.totalorder %s15_s17, 4   ;;  %s1563_s16 = smov %s1565_s18 }
 0x146   :  { %14 = sbr.rel (!%p12_p6) target bundleno = 2 (0x2), region = 97 }

// kernel: _lambda_.32
= control target key start
LH: loop header
LB: loop body
LE: loop exit
PB: predicated region body
PF: predicated region fallthrough
CT: control target
= control target key end

     0   :  { %v523_v16 = vmov 0.0   ;;  %s663_s1 = inlined_call_operand.vmem [shape: bf16[128,128], index: 1, kind: input, shape index: {}]   ;;  %s664_s0 = inlined_call_operand.vmem [shape: bf16[128,128], index: 0, kind: input, shape index: {}]   ;;  %s665_s3 = inlined_call_operand.vmem [shape: f32[1,128], index: 3, kind: output, shape index: {1}]   ;;  %s666_s4 = inlined_call_operand.vmem [shape: f32[1,128], index: 4, kind: output, shape index: {2}]   ;;  %s667_s2 = inlined_call_operand.vmem [shape: f32[128,128], index: 2, kind: output, shape index: {0}]  }
   0x1   :  { %v507_v0 = vld [vmem:[%s663_s1 + $0x38] sm:$0xff]   ;;  %v508_v1 = vld [vmem:[%s663_s1 + $0x30] sm:$0xff]   ;;  %v509_v2 = vld [vmem:[%s663_s1 + $0x28] sm:$0xff]   ;;  %40 = vst [vmem:[%s665_s3] sm:$0x1] %v523_v16 }
   0x2   :  { %458 = vmatprep.subr.bf16.mxu0 %v507_v0  ;;  %490 = vmatprep.subr.bf16.mxu1 %v507_v0  ;;  %v510_v3 = vld [vmem:[%s663_s1 + $0x20] sm:$0xff]   ;;  %v511_v5 = vld [vmem:[%s663_s1 + $0x18] sm:$0xff]   ;;  %v512_v7 = vld [vmem:[%s663_s1 + $0x10] sm:$0xff]   ;;  %41 = vst [vmem:[%s666_s4] sm:$0x1] %v523_v16 }
   0x3   :  { %459 = vmatpush3.bf16.msra.mxu0 %v507_v0  ;;  %498 = vmatpush3.bf16.msra.mxu1 %v507_v0  ;;  %v515_v4 = vld [vmem:[%s664_s0] sm:$0xff]   ;;  %v513_v8 = vld [vmem:[%s663_s1 + $0x8] sm:$0xff]   ;;  %v517_v12 = vld [vmem:[%s664_s0 + $0x10] sm:$0xff]  }
   0x4   :  { %460 = vmatprep.subr.bf16.mxu0 %v508_v1  ;;  %491 = vmatprep.subr.bf16.mxu1 %v508_v1  ;;  %v519_v6 = vld [vmem:[%s664_s0 + $0x20] sm:$0xff]   ;;  %v516_v10 = vld [vmem:[%s664_s0 + $0x8] sm:$0xff]   ;;  %v521_v13 = vld [vmem:[%s664_s0 + $0x30] sm:$0xff]  }
   0x5   :  { %474 = vmatprep.mubr.bf16.mxu0 %v515_v4  ;;  %482 = vmatprep.mubr.bf16.mxu1 %v519_v6  ;;  %v514_v9 = vld [vmem:[%s663_s1] sm:$0xff]   ;;  %v520_v11 = vld [vmem:[%s664_s0 + $0x28] sm:$0xff]   ;;  %v518_v14 = vld [vmem:[%s664_s0 + $0x18] sm:$0xff]  }
   0x6   :  { %v522_v15 = vld [vmem:[%s664_s0 + $0x38] sm:$0xff]  }
   0x7   :  { %461 = vmatpush3.bf16.msra.mxu0 %v508_v1  ;;  %499 = vmatpush3.bf16.msra.mxu1 %v508_v1 }
   0x8   :  { %462 = vmatprep.subr.bf16.mxu0 %v509_v2  ;;  %492 = vmatprep.subr.bf16.mxu1 %v509_v2 }
   0xb   :  { %463 = vmatpush3.bf16.msra.mxu0 %v509_v2  ;;  %500 = vmatpush3.bf16.msra.mxu1 %v509_v2 }
   0xc   :  { %464 = vmatprep.subr.bf16.mxu0 %v510_v3  ;;  %493 = vmatprep.subr.bf16.mxu1 %v510_v3 }
   0xf   :  { %465 = vmatpush3.bf16.msra.mxu0 %v510_v3  ;;  %501 = vmatpush3.bf16.msra.mxu1 %v510_v3 }
  0x10   :  { %466 = vmatprep.subr.bf16.mxu0 %v511_v5  ;;  %494 = vmatprep.subr.bf16.mxu1 %v511_v5 }
  0x13   :  { %467 = vmatpush3.bf16.msra.mxu0 %v511_v5  ;;  %502 = vmatpush3.bf16.msra.mxu1 %v511_v5 }
  0x14   :  { %468 = vmatprep.subr.bf16.mxu0 %v512_v7  ;;  %495 = vmatprep.subr.bf16.mxu1 %v512_v7 }
  0x17   :  { %469 = vmatpush3.bf16.msra.mxu0 %v512_v7  ;;  %503 = vmatpush3.bf16.msra.mxu1 %v512_v7 }
  0x18   :  { %470 = vmatprep.subr.bf16.mxu0 %v513_v8  ;;  %496 = vmatprep.subr.bf16.mxu1 %v513_v8 }
  0x1b   :  { %471 = vmatpush3.bf16.msra.mxu0 %v513_v8  ;;  %504 = vmatpush3.bf16.msra.mxu1 %v513_v8 }
  0x1c   :  { %472 = vmatprep.subr.bf16.mxu0 %v514_v9  ;;  %497 = vmatprep.subr.bf16.mxu1 %v514_v9 }
  0x1f   :  { %473 = vmatpush3.bf16.msra.mxu0 %v514_v9  ;;  %505 = vmatpush3.bf16.msra.mxu1 %v514_v9 }
  0x22   :  { %475 = vmatmul.mubr.bf16.vlgmr.msra.gmra.mxu0 %v516_v10  ;;  %483 = vmatmul.mubr.bf16.vlgmr.msra.gmra.mxu1 %v520_v11 }
  0x23   :  { %478 = vmatprep.mubr.bf16.mxu0 %v517_v12  ;;  %486 = vmatprep.mubr.bf16.mxu1 %v521_v13 }
  0x2a   :  { %479 = vmatmul.mubr.bf16.gmra.mxu0 %v518_v14  ;;  %487 = vmatmul.mubr.bf16.gmra.mxu1 %v522_v15 }
  0xe2   :  { %v476_v17 = vpop.f32.mrf.mxu0  ;;  %v484_v18 = vpop.f32.mrf.mxu1 }
  0xe3   :  { %336 = vst [vmem:[%s667_s2 + $0x10] sm:$0xff] %v476_v17  ;;  %344 = vst [vmem:[%s667_s2 + $0x50] sm:$0xff] %v484_v18  ;;  %v377_v30 = vmul.f32 %v476_v17, %v476_v17  ;;  %v385_v60 = vmul.f32 %v484_v18, %v484_v18 }
  0xe4   :  { %v220_v19 = vpop.f32.mrf.mxu0  ;;  %v252_v20 = vpop.f32.mrf.mxu1 }
  0xe5   :  { %334 = vst [vmem:[%s667_s2] sm:$0xff] %v220_v19  ;;  %342 = vst [vmem:[%s667_s2 + $0x40] sm:$0xff] %v252_v20  ;;  %v375_v25 = vmul.f32 %v220_v19, %v220_v19  ;;  %v383_v54 = vmul.f32 %v252_v20, %v252_v20 }
  0xe6   :  { %v477_v21 = vpop.f32.mrf.mxu0  ;;  %v485_v22 = vpop.f32.mrf.mxu1 }
  0xe7   :  { %337 = vst [vmem:[%s667_s2 + $0x18] sm:$0xff] %v477_v21  ;;  %345 = vst [vmem:[%s667_s2 + $0x58] sm:$0xff] %v485_v22  ;;  %v378_v35 = vmul.f32 %v477_v21, %v477_v21  ;;  %v386_v63 = vmul.f32 %v485_v22, %v485_v22 }
  0xe8   :  { %v223_v23 = vpop.f32.mrf.mxu0  ;;  %v255_v24 = vpop.f32.mrf.mxu1 }
  0xe9   :  { %335 = vst [vmem:[%s667_s2 + $0x8] sm:$0xff] %v223_v23  ;;  %v351_v26 = vadd.f32 %v223_v23, %v220_v19  ;;  %v376_v27 = vmul.f32 %v223_v23, %v223_v23  ;;  %343 = vst [vmem:[%s667_s2 + $0x48] sm:$0xff] %v255_v24  ;;  %v384_v58 = vmul.f32 %v255_v24, %v255_v24 }
  0xea   :  { %v480_v28 = vpop.f32.mrf.mxu0  ;;  %v488_v29 = vpop.f32.mrf.mxu1 }
  0xeb   :  { %v352_v31 = vadd.f32 %v476_v17, %v351_v26  ;;  %v391_v32 = vadd.f32 %v376_v27, %v375_v25  ;;  %340 = vst [vmem:[%s667_s2 + $0x30] sm:$0xff] %v480_v28  ;;  %348 = vst [vmem:[%s667_s2 + $0x70] sm:$0xff] %v488_v29  ;;  %v381_v48 = vmul.f32 %v480_v28, %v480_v28  ;;  %v374_v27 = vld [vmem:[%s666_s4] sm:$0x1] }
  0xec   :  { %v236_v33 = vpop.f32.mrf.mxu0  ;;  %v268_v34 = vpop.f32.mrf.mxu1  ;;  %v389_v8 = vmul.f32 %v488_v29, %v488_v29 }
  0xed   :  { %v392_v36 = vadd.f32 %v391_v32, %v377_v30  ;;  %338 = vst [vmem:[%s667_s2 + $0x20] sm:$0xff] %v236_v33  ;;  %v353_v37 = vadd.f32 %v477_v21, %v352_v31  ;;  %346 = vst [vmem:[%s667_s2 + $0x60] sm:$0xff] %v268_v34  ;;  %v379_v41 = vmul.f32 %v236_v33, %v236_v33 }
  0xee   :  { %v481_v38 = vpop.f32.mrf.mxu0  ;;  %v489_v39 = vpop.f32.mrf.mxu1  ;;  %v387_v3 = vmul.f32 %v268_v34, %v268_v34 }
  0xef   :  { %v354_v40 = vadd.f32 %v353_v37, %v236_v33  ;;  %v393_v42 = vadd.f32 %v392_v36, %v378_v35  ;;  %341 = vst [vmem:[%s667_s2 + $0x38] sm:$0xff] %v481_v38  ;;  %349 = vst [vmem:[%s667_s2 + $0x78] sm:$0xff] %v489_v39  ;;  %v382_v51 = vmul.f32 %v481_v38, %v481_v38 }
  0xf0   :  { %v239_v43 = vpop.f32.mrf.mxu0  ;;  %v271_v44 = vpop.f32.mrf.mxu1  ;;  %v390_v11 = vmul.f32 %v489_v39, %v489_v39 }
  0xf1   :  { %v394_v45 = vadd.f32 %v393_v42, %v379_v41  ;;  %339 = vst [vmem:[%s667_s2 + $0x28] sm:$0xff] %v239_v43  ;;  %v355_v46 = vadd.f32 %v354_v40, %v239_v43  ;;  %v380_v47 = vmul.f32 %v239_v43, %v239_v43  ;;  %347 = vst [vmem:[%s667_s2 + $0x68] sm:$0xff] %v271_v44 }
  0xf2   :  { %v388_v7 = vmul.f32 %v271_v44, %v271_v44 }
  0xf3   :  { %v356_v49 = vadd.f32 %v480_v28, %v355_v46  ;;  %v395_v50 = vadd.f32 %v394_v45, %v380_v47 }
  0xf5   :  { %v357_v52 = vadd.f32 %v481_v38, %v356_v49  ;;  %v396_v53 = vadd.f32 %v395_v50, %v381_v48 }
  0xf7   :  { %v397_v55 = vadd.f32 %v396_v53, %v382_v51  ;;  %v358_v56 = vadd.f32 %v357_v52, %v252_v20 }
  0xf9   :  { %v359_v57 = vadd.f32 %v358_v56, %v255_v24  ;;  %v398_v59 = vadd.f32 %v397_v55, %v383_v54  ;;  %v350_v24 = vld [vmem:[%s665_s3] sm:$0x1] }
  0xfb   :  { %v360_v61 = vadd.f32 %v484_v18, %v359_v57  ;;  %v399_v62 = vadd.f32 %v398_v59, %v384_v58 }
  0xfd   :  { %v400_v0 = vadd.f32 %v399_v62, %v385_v60  ;;  %v361_v1 = vadd.f32 %v485_v22, %v360_v61 }
  0xff   :  { %v362_v2 = vadd.f32 %v361_v1, %v268_v34  ;;  %v401_v4 = vadd.f32 %v400_v0, %v386_v63 }
 0x101   :  { %v402_v5 = vadd.f32 %v401_v4, %v387_v3  ;;  %v363_v6 = vadd.f32 %v362_v2, %v271_v44 }
 0x103   :  { %v364_v9 = vadd.f32 %v488_v29, %v363_v6  ;;  %v403_v10 = vadd.f32 %v402_v5, %v388_v7 }
 0x105   :  { %v365_v12 = vadd.f32 %v489_v39, %v364_v9  ;;  %v404_v13 = vadd.f32 %v403_v10, %v389_v8 }
 0x107   :  { %v366_v14 = vrot.slane %v365_v12, 4  ;;  %v405_v15 = vadd.f32 %v404_v13, %v390_v11 }
 0x109   :  { %v367_v16 = vadd.f32 %v366_v14, %v365_v12  ;;  %v406_v17 = vrot.slane %v405_v15, 4 }
 0x10b   :  { %v368_v18 = vrot.slane %v367_v16, 2  ;;  %v407_v19 = vadd.f32 %v406_v17, %v405_v15 }
 0x10d   :  { %v369_v20 = vadd.f32 %v368_v18, %v367_v16  ;;  %v408_v21 = vrot.slane %v407_v19, 2 }
 0x10f   :  { %v370_v22 = vrot.slane %v369_v20, 1  ;;  %v409_v23 = vadd.f32 %v408_v21, %v407_v19 }
 0x111   :  { %v371_v25 = vadd.f32 %v370_v22, %v369_v20  ;;  %v410_v26 = vrot.slane %v409_v23, 1 }
 0x113   :  { %v372_v28 = vadd.f32 %v371_v25, %v350_v24  ;;  %v411_v29 = vadd.f32 %v410_v26, %v409_v23 }
 0x115   :  { %373 = vst [vmem:[%s665_s3] sm:$0x1] %v372_v28  ;;  %v412_v30 = vadd.f32 %v411_v29, %v374_v27 }
 0x117   :  { %413 = vst [vmem:[%s666_s4] sm:$0x1] %v412_v30 }

// kernel: _lambda_.33
= control target key start
LH: loop header
LB: loop body
LE: loop exit
PB: predicated region body
PF: predicated region fallthrough
CT: control target
= control target key end

     0   :  { %s423_s0 = inlined_call_operand.vmem [shape: f32[128,128], index: 0, kind: input, shape index: {}]   ;;  %s424_s1 = inlined_call_operand.vmem [shape: f32[1,128], index: 1, kind: input, shape index: {}]   ;;  %s425_s2 = inlined_call_operand.vmem [shape: f32[1,128], index: 2, kind: input, shape index: {}]   ;;  %s426_s3 = inlined_call_operand.vmem [shape: bf16[128,128], index: 3, kind: output, shape index: {}]  }
   0x1   :  { %v14_v0 = vld [vmem:[%s423_s0] sm:$0xff]  ;;  %v15_v1 = vld [vmem:[%s423_s0 + $0x8] sm:$0xff]  ;;  %v16_v6 = vld [vmem:[%s423_s0 + $0x10] sm:$0xff] }
   0x2   :  { %v318_v2 = vld [vmem:[%s424_s1] ss:$0 sm:$0xff]  ;;  %v17_v7 = vld [vmem:[%s423_s0 + $0x18] sm:$0xff]  ;;  %v19_v11 = vld [vmem:[%s423_s0 + $0x28] sm:$0xff] }
   0x3   :  { %v37_v3 = vmul.f32 %v318_v2, %v14_v0  ;;  %v38_v4 = vmul.f32 %v318_v2, %v15_v1  ;;  %v325_v5 = vld [vmem:[%s425_s2] ss:$0 sm:$0xff]  ;;  %v39_v8 = vmul.f32 %v318_v2, %v16_v6  ;;  %v40_v9 = vmul.f32 %v318_v2, %v17_v7  ;;  %v20_v12 = vld [vmem:[%s423_s0 + $0x30] sm:$0xff]  ;;  %v21_v17 = vld [vmem:[%s423_s0 + $0x38] sm:$0xff] }
   0x4   :  { %v18_v10 = vld [vmem:[%s423_s0 + $0x20] sm:$0xff]  ;;  %v42_v16 = vmul.f32 %v318_v2, %v19_v11  ;;  %v43_v20 = vmul.f32 %v318_v2, %v20_v12  ;;  %v44_v21 = vmul.f32 %v318_v2, %v21_v17  ;;  %v23_v35 = vld [vmem:[%s423_s0 + $0x48] sm:$0xff]  ;;  %v24_v36 = vld [vmem:[%s423_s0 + $0x50] sm:$0xff] }
   0x5   :  { %v60_v13 = vadd.f32 %v325_v5, %v37_v3  ;;  %v61_v14 = vadd.f32 %v325_v5, %v38_v4  ;;  %v41_v15 = vmul.f32 %v318_v2, %v18_v10  ;;  %v62_v18 = vadd.f32 %v325_v5, %v39_v8  ;;  %v22_v34 = vld [vmem:[%s423_s0 + $0x40] sm:$0xff]  ;;  %v25_v42 = vld [vmem:[%s423_s0 + $0x58] sm:$0xff]  ;;  %v27_v48 = vld [vmem:[%s423_s0 + $0x68] sm:$0xff] }
   0x6   :  { %v63_v19 = vadd.f32 %v325_v5, %v40_v9  ;;  %v65_v29 = vadd.f32 %v325_v5, %v42_v16  ;;  %v66_v33 = vadd.f32 %v325_v5, %v43_v20  ;;  %v67_v40 = vadd.f32 %v325_v5, %v44_v21  ;;  %v26_v47 = vld [vmem:[%s423_s0 + $0x60] sm:$0xff]  ;;  %v28_v60 = vld [vmem:[%s423_s0 + $0x70] sm:$0xff]  ;;  %v29_v7 = vld [vmem:[%s423_s0 + $0x78] sm:$0xff] }
   0x7   :  { %vm76_vm0 = vcmp.ge.f32.partialorder %v60_v13, 0.0  ;;  %vm77_vm1 = vcmp.ge.f32.partialorder %v61_v14, 0.0  ;;  %v92_v22 = vmul.f32 0.2, %v60_v13  ;;  %v93_v23 = vmul.f32 0.2, %v61_v14 }
   0x8   :  { %vm78_vm2 = vcmp.ge.f32.partialorder %v62_v18, 0.0  ;;  %vm79_vm3 = vcmp.ge.f32.partialorder %v63_v19, 0.0  ;;  %v94_v24 = vmul.f32 0.2, %v62_v18  ;;  %v95_v25 = vmul.f32 0.2, %v63_v19 }
   0x9   :  { %v108_v26 = vsel %vm76_vm0, %v60_v13, %v92_v22  ;;  %v109_v27 = vsel %vm77_vm1, %v61_v14, %v93_v23  ;;  %v64_v28 = vadd.f32 %v325_v5, %v41_v15  ;;  %vm81_vm5 = vcmp.ge.f32.partialorder %v65_v29, 0.0 }
   0xa   :  { %v245_v30 = vpack.c.bf16 %v109_v27, %v108_v26  ;;  %v110_v31 = vsel %vm78_vm2, %v62_v18, %v94_v24  ;;  %v111_v32 = vsel %vm79_vm3, %v63_v19, %v95_v25  ;;  %v97_v39 = vmul.f32 0.2, %v65_v29 }
   0xb   :  { %v250_v37 = vpack.c.bf16 %v111_v32, %v110_v31  ;;  %vm80_vm4 = vcmp.ge.f32.partialorder %v64_v28, 0.0  ;;  %v96_v38 = vmul.f32 0.2, %v64_v28  ;;  %vm82_vm6 = vcmp.ge.f32.partialorder %v66_v33, 0.0 }
   0xc   :  { %246 = vst [vmem:[%s426_s3] sm:$0xff] %v245_v30   ;;  %v98_v41 = vmul.f32 0.2, %v66_v33  ;;  %v45_v44 = vmul.f32 %v318_v2, %v22_v34  ;;  %v46_v45 = vmul.f32 %v318_v2, %v23_v35  ;;  %v47_v46 = vmul.f32 %v318_v2, %v24_v36 }
   0xd   :  { %282 = vst [vmem:[%s426_s3 + $0x8] sm:$0xff] %v250_v37   ;;  %v112_v43 = vsel %vm80_vm4, %v64_v28, %v96_v38  ;;  %v113_v49 = vsel %vm81_vm5, %v65_v29, %v97_v39  ;;  %vm83_vm7 = vcmp.ge.f32.partialorder %v67_v40, 0.0  ;;  %v99_v50 = vmul.f32 0.2, %v67_v40 }
   0xe   :  { %v114_v51 = vsel %vm82_vm6, %v66_v33, %v98_v41  ;;  %v255_v52 = vpack.c.bf16 %v113_v49, %v112_v43  ;;  %v68_v53 = vadd.f32 %v325_v5, %v45_v44  ;;  %v69_v54 = vadd.f32 %v325_v5, %v46_v45 }
   0xf   :  { %v48_v55 = vmul.f32 %v318_v2, %v25_v42  ;;  %v115_v56 = vsel %vm83_vm7, %v67_v40, %v99_v50  ;;  %v70_v57 = vadd.f32 %v325_v5, %v47_v46  ;;  %v49_v58 = vmul.f32 %v318_v2, %v26_v47 }
  0x10   :  { %v50_v59 = vmul.f32 %v318_v2, %v27_v48  ;;  %283 = vst [vmem:[%s426_s3 + $0x10] sm:$0xff] %v255_v52   ;;  %v260_v61 = vpack.c.bf16 %v115_v56, %v114_v51  ;;  %vm84_vm8 = vcmp.ge.f32.partialorder %v68_v53, 0.0  ;;  %vm85_vm9 = vcmp.ge.f32.partialorder %v69_v54, 0.0 }
  0x11   :  { %v100_v62 = vmul.f32 0.2, %v68_v53  ;;  %v101_v63 = vmul.f32 0.2, %v69_v54  ;;  %v71_v0 = vadd.f32 %v325_v5, %v48_v55  ;;  %vm86_vm10 = vcmp.ge.f32.partialorder %v70_v57, 0.0 }
  0x12   :  { %v102_v1 = vmul.f32 0.2, %v70_v57  ;;  %284 = vst [vmem:[%s426_s3 + $0x18] sm:$0xff] %v260_v61   ;;  %v72_v4 = vadd.f32 %v325_v5, %v49_v58  ;;  %v73_v6 = vadd.f32 %v325_v5, %v50_v59  ;;  %v51_v8 = vmul.f32 %v318_v2, %v28_v60 }
  0x13   :  { %v116_v3 = vsel %vm84_vm8, %v68_v53, %v100_v62  ;;  %v117_v9 = vsel %vm85_vm9, %v69_v54, %v101_v63  ;;  %vm87_vm11 = vcmp.ge.f32.partialorder %v71_v0, 0.0  ;;  %v103_v10 = vmul.f32 0.2, %v71_v0 }
  0x14   :  { %v118_v11 = vsel %vm86_vm10, %v70_v57, %v102_v1  ;;  %v265_v12 = vpack.c.bf16 %v117_v9, %v116_v3  ;;  %vm88_vm12 = vcmp.ge.f32.partialorder %v72_v4, 0.0  ;;  %vm89_vm13 = vcmp.ge.f32.partialorder %v73_v6, 0.0 }
  0x15   :  { %v104_v13 = vmul.f32 0.2, %v72_v4  ;;  %v119_v14 = vsel %vm87_vm11, %v71_v0, %v103_v10  ;;  %v105_v15 = vmul.f32 0.2, %v73_v6  ;;  %v52_v16 = vmul.f32 %v318_v2, %v29_v7 }
  0x16   :  { %v74_v17 = vadd.f32 %v325_v5, %v51_v8  ;;  %285 = vst [vmem:[%s426_s3 + $0x20] sm:$0xff] %v265_v12   ;;  %v270_v18 = vpack.c.bf16 %v119_v14, %v118_v11 }
  0x17   :  { %v120_v19 = vsel %vm88_vm12, %v72_v4, %v104_v13  ;;  %v121_v20 = vsel %vm89_vm13, %v73_v6, %v105_v15  ;;  %v75_v21 = vadd.f32 %v325_v5, %v52_v16 }
  0x18   :  { %vm90_vm14 = vcmp.ge.f32.partialorder %v74_v17, 0.0  ;;  %v106_v22 = vmul.f32 0.2, %v74_v17  ;;  %286 = vst [vmem:[%s426_s3 + $0x28] sm:$0xff] %v270_v18   ;;  %v275_v23 = vpack.c.bf16 %v121_v20, %v120_v19 }
  0x19   :  { %vm91_vm15 = vcmp.ge.f32.partialorder %v75_v21, 0.0  ;;  %v107_v2 = vmul.f32 0.2, %v75_v21 }
  0x1a   :  { %v122_v24 = vsel %vm90_vm14, %v74_v17, %v106_v22  ;;  %287 = vst [vmem:[%s426_s3 + $0x30] sm:$0xff] %v275_v23  }
  0x1b   :  { %v123_v25 = vsel %vm91_vm15, %v75_v21, %v107_v2 }
  0x1c   :  { %v280_v26 = vpack.c.bf16 %v123_v25, %v122_v24 }
  0x1e   :  { %288 = vst [vmem:[%s426_s3 + $0x38] sm:$0xff] %v280_v26  }

// kernel: _lambda_.35
= control target key start
LH: loop header
LB: loop body
LE: loop exit
PB: predicated region body
PF: predicated region fallthrough
CT: control target
= control target key end

     0   :  { %s141_s0 = inlined_call_operand.vmem [shape: f32[32,128], index: 0, kind: input, shape index: {}]   ;;  %s142_s1 = inlined_call_operand.vmem [shape: f32[1,128], index: 1, kind: input, shape index: {}]   ;;  %s143_s2 = inlined_call_operand.vmem [shape: f32[1,128], index: 2, kind: input, shape index: {}]   ;;  %s144_s3 = inlined_call_operand.vmem [shape: bf16[32,128], index: 3, kind: output, shape index: {}]  }
   0x1   :  { %v14_v0 = vld [vmem:[%s141_s0] sm:$0xff]  ;;  %v15_v1 = vld [vmem:[%s141_s0 + $0x8] sm:$0xff]  ;;  %v16_v6 = vld [vmem:[%s141_s0 + $0x10] sm:$0xff] }
   0x2   :  { %v76_v2 = vld [vmem:[%s142_s1] ss:$0 sm:$0xff]  ;;  %v17_v7 = vld [vmem:[%s141_s0 + $0x18] sm:$0xff] }
   0x3   :  { %v25_v3 = vmul.f32 %v76_v2, %v14_v0  ;;  %v26_v4 = vmul.f32 %v76_v2, %v15_v1  ;;  %v77_v5 = vld [vmem:[%s143_s2] ss:$0 sm:$0xff]  ;;  %v27_v8 = vmul.f32 %v76_v2, %v16_v6  ;;  %v28_v9 = vmul.f32 %v76_v2, %v17_v7 }
   0x5   :  { %v36_v10 = vadd.f32 %v77_v5, %v25_v3  ;;  %v37_v11 = vadd.f32 %v77_v5, %v26_v4  ;;  %v38_v12 = vadd.f32 %v77_v5, %v27_v8  ;;  %v39_v13 = vadd.f32 %v77_v5, %v28_v9 }
   0x7   :  { %vm40_vm0 = vcmp.ge.f32.partialorder %v36_v10, 0.0  ;;  %vm41_vm1 = vcmp.ge.f32.partialorder %v37_v11, 0.0  ;;  %v44_v14 = vmul.f32 0.2, %v36_v10  ;;  %v45_v15 = vmul.f32 0.2, %v37_v11 }
   0x8   :  { %vm42_vm2 = vcmp.ge.f32.partialorder %v38_v12, 0.0  ;;  %vm43_vm3 = vcmp.ge.f32.partialorder %v39_v13, 0.0  ;;  %v46_v16 = vmul.f32 0.2, %v38_v12  ;;  %v47_v17 = vmul.f32 0.2, %v39_v13 }
   0x9   :  { %v48_v18 = vsel %vm40_vm0, %v36_v10, %v44_v14  ;;  %v49_v19 = vsel %vm41_vm1, %v37_v11, %v45_v15 }
   0xa   :  { %v89_v20 = vpack.c.bf16 %v49_v19, %v48_v18  ;;  %v50_v21 = vsel %vm42_vm2, %v38_v12, %v46_v16  ;;  %v51_v22 = vsel %vm43_vm3, %v39_v13, %v47_v17 }
   0xb   :  { %v94_v23 = vpack.c.bf16 %v51_v22, %v50_v21 }
   0xc   :  { %90 = vst [vmem:[%s144_s3] sm:$0xff] %v89_v20  }
   0xd   :  { %96 = vst [vmem:[%s144_s3 + $0x8] sm:$0xff] %v94_v23  }

// kernel: _lambda_.34
= control target key start
LH: loop header
LB: loop body
LE: loop exit
PB: predicated region body
PF: predicated region fallthrough
CT: control target
= control target key end

     0   :  { %v381_v20 = vmov 0.0   ;;  %s497_s1 = inlined_call_operand.vmem [shape: bf16[256,128], index: 1, kind: input, shape index: {}]   ;;  %s498_s0 = inlined_call_operand.vmem [shape: bf16[32,256], index: 0, kind: input, shape index: {}]   ;;  %s499_s3 = inlined_call_operand.vmem [shape: f32[1,128], index: 3, kind: output, shape index: {1}]   ;;  %s500_s4 = inlined_call_operand.vmem [shape: f32[1,128], index: 4, kind: output, shape index: {2}]   ;;  %s501_s2 = inlined_call_operand.vmem [shape: f32[32,128], index: 2, kind: output, shape index: {0}]  }
   0x1   :  { %v359_v0 = vld [vmem:[%s497_s1 + $0x78] sm:$0xff]   ;;  %v361_v2 = vld [vmem:[%s497_s1 + $0x70] sm:$0xff]   ;;  %v363_v4 = vld [vmem:[%s497_s1 + $0x68] sm:$0xff]   ;;  %28 = vst [vmem:[%s499_s3] sm:$0x1] %v381_v20 }
   0x2   :  { %v360_v1 = vld [vmem:[%s497_s1 + $0x38] sm:$0xff]   ;;  %314 = vmatprep.subr.bf16.mxu0 %v359_v0  ;;  %342 = vmatprep.subr.bf16.mxu1 %v359_v0  ;;  %v362_v3 = vld [vmem:[%s497_s1 + $0x30] sm:$0xff]   ;;  %v364_v5 = vld [vmem:[%s497_s1 + $0x28] sm:$0xff]   ;;  %29 = vst [vmem:[%s500_s4] sm:$0x1] %v381_v20 }
   0x3   :  { %315 = vmatpush3.bf16.msra.mxu0 %v360_v1  ;;  %350 = vmatpush3.bf16.msra.mxu1 %v360_v1  ;;  %v365_v6 = vld [vmem:[%s497_s1 + $0x60] sm:$0xff]   ;;  %v367_v8 = vld [vmem:[%s497_s1 + $0x58] sm:$0xff]   ;;  %v369_v10 = vld [vmem:[%s497_s1 + $0x50] sm:$0xff]  }
   0x4   :  { %316 = vmatprep.subr.bf16.mxu0 %v361_v2  ;;  %343 = vmatprep.subr.bf16.mxu1 %v361_v2  ;;  %v366_v7 = vld [vmem:[%s497_s1 + $0x20] sm:$0xff]   ;;  %v368_v9 = vld [vmem:[%s497_s1 + $0x18] sm:$0xff]   ;;  %v370_v13 = vld [vmem:[%s497_s1 + $0x10] sm:$0xff]  }
   0x5   :  { %v377_v11 = vld [vmem:[%s498_s0 + $0x4] ss:$8 sps:$4 sm:$0xff]   ;;  %v380_v12 = vld [vmem:[%s498_s0 + $0x14] ss:$8 sps:$4 sm:$0xff]   ;;  %v375_v18 = vld [vmem:[%s498_s0] ss:$8 sps:$4 sm:$0xff]  }
   0x6   :  { %v371_v14 = vld [vmem:[%s497_s1 + $0x48] sm:$0xff]   ;;  %218 = vmatprep.mubr.bf16.mxu0 %v377_v11  ;;  %226 = vmatprep.mubr.bf16.mxu1 %v380_v12  ;;  %v373_v16 = vld [vmem:[%s497_s1 + $0x40] sm:$0xff]   ;;  %v378_v19 = vld [vmem:[%s498_s0 + $0x10] ss:$8 sps:$4 sm:$0xff]  }
   0x7   :  { %317 = vmatpush3.bf16.msra.mxu0 %v362_v3  ;;  %351 = vmatpush3.bf16.msra.mxu1 %v362_v3  ;;  %v372_v15 = vld [vmem:[%s497_s1 + $0x8] sm:$0xff]   ;;  %v374_v17 = vld [vmem:[%s497_s1] sm:$0xff]  }
   0x8   :  { %318 = vmatprep.subr.bf16.mxu0 %v363_v4  ;;  %344 = vmatprep.subr.bf16.mxu1 %v363_v4  ;;  %v254_v52 = vld [vmem:[%s499_s3] sm:$0x1] }
   0x9   :  { %v266_v55 = vld [vmem:[%s500_s4] sm:$0x1] }
   0xb   :  { %319 = vmatpush3.bf16.msra.mxu0 %v364_v5  ;;  %352 = vmatpush3.bf16.msra.mxu1 %v364_v5 }
   0xc   :  { %320 = vmatprep.subr.bf16.mxu0 %v365_v6  ;;  %345 = vmatprep.subr.bf16.mxu1 %v365_v6 }
   0xf   :  { %321 = vmatpush3.bf16.msra.mxu0 %v366_v7  ;;  %353 = vmatpush3.bf16.msra.mxu1 %v366_v7 }
  0x10   :  { %322 = vmatprep.subr.bf16.mxu0 %v367_v8  ;;  %346 = vmatprep.subr.bf16.mxu1 %v367_v8 }
  0x13   :  { %323 = vmatpush3.bf16.msra.mxu0 %v368_v9  ;;  %354 = vmatpush3.bf16.msra.mxu1 %v368_v9 }
  0x14   :  { %324 = vmatprep.subr.bf16.mxu0 %v369_v10  ;;  %347 = vmatprep.subr.bf16.mxu1 %v369_v10 }
  0x17   :  { %325 = vmatpush3.bf16.msra.mxu0 %v370_v13  ;;  %355 = vmatpush3.bf16.msra.mxu1 %v370_v13 }
  0x18   :  { %326 = vmatprep.subr.bf16.mxu0 %v371_v14  ;;  %348 = vmatprep.subr.bf16.mxu1 %v371_v14 }
  0x1b   :  { %327 = vmatpush3.bf16.msra.mxu0 %v372_v15  ;;  %356 = vmatpush3.bf16.msra.mxu1 %v372_v15 }
  0x1c   :  { %328 = vmatprep.subr.bf16.mxu0 %v373_v16  ;;  %349 = vmatprep.subr.bf16.mxu1 %v373_v16 }
  0x1f   :  { %329 = vmatpush3.bf16.msra.mxu0 %v374_v17  ;;  %357 = vmatpush3.bf16.msra.mxu1 %v374_v17 }
  0x22   :  { %219 = vmatmul.mubr.bf16.vlgmr.msra.gmra.mxu0 %v375_v18  ;;  %227 = vmatmul.mubr.bf16.vlgmr.msra.gmra.mxu1 %v378_v19 }
  0xe2   :  { %v330_v21 = vpop.f32.mrf.mxu0  ;;  %v336_v22 = vpop.f32.mrf.mxu1 }
  0xe4   :  { %v331_v23 = vpop.f32.mrf.mxu0  ;;  %v337_v24 = vpop.f32.mrf.mxu1 }
  0xe5   :  { %v332_v25 = vadd.f32 %v331_v23, %v330_v21  ;;  %v338_v26 = vadd.f32 %v337_v24, %v336_v22 }
  0xe6   :  { %v333_v27 = vpop.f32.mrf.mxu0  ;;  %v339_v28 = vpop.f32.mrf.mxu1 }
  0xe7   :  { %250 = vst [vmem:[%s501_s2] sm:$0xff] %v332_v25  ;;  %252 = vst [vmem:[%s501_s2 + $0x10] sm:$0xff] %v338_v26  ;;  %v267_v33 = vmul.f32 %v332_v25, %v332_v25  ;;  %v269_v36 = vmul.f32 %v338_v26, %v338_v26 }
  0xe8   :  { %v334_v29 = vpop.f32.mrf.mxu0  ;;  %v340_v30 = vpop.f32.mrf.mxu1 }
  0xe9   :  { %v335_v31 = vadd.f32 %v334_v29, %v333_v27  ;;  %v341_v32 = vadd.f32 %v340_v30, %v339_v28 }
  0xeb   :  { %251 = vst [vmem:[%s501_s2 + $0x8] sm:$0xff] %v335_v31  ;;  %v255_v34 = vadd.f32 %v335_v31, %v332_v25  ;;  %v268_v35 = vmul.f32 %v335_v31, %v335_v31  ;;  %253 = vst [vmem:[%s501_s2 + $0x18] sm:$0xff] %v341_v32  ;;  %v270_v40 = vmul.f32 %v341_v32, %v341_v32 }
  0xed   :  { %v271_v37 = vadd.f32 %v268_v35, %v267_v33  ;;  %v256_v38 = vadd.f32 %v338_v26, %v255_v34 }
  0xef   :  { %v257_v39 = vadd.f32 %v341_v32, %v256_v38  ;;  %v272_v41 = vadd.f32 %v271_v37, %v269_v36 }
  0xf1   :  { %v258_v42 = vrot.slane %v257_v39, 4  ;;  %v273_v43 = vadd.f32 %v272_v41, %v270_v40 }
  0xf3   :  { %v259_v44 = vadd.f32 %v258_v42, %v257_v39  ;;  %v274_v45 = vrot.slane %v273_v43, 4 }
  0xf5   :  { %v260_v46 = vrot.slane %v259_v44, 2  ;;  %v275_v47 = vadd.f32 %v274_v45, %v273_v43 }
  0xf7   :  { %v261_v48 = vadd.f32 %v260_v46, %v259_v44  ;;  %v276_v49 = vrot.slane %v275_v47, 2 }
  0xf9   :  { %v262_v50 = vrot.slane %v261_v48, 1  ;;  %v277_v51 = vadd.f32 %v276_v49, %v275_v47 }
  0xfb   :  { %v263_v53 = vadd.f32 %v262_v50, %v261_v48  ;;  %v278_v54 = vrot.slane %v277_v51, 1 }
  0xfd   :  { %v264_v56 = vadd.f32 %v263_v53, %v254_v52  ;;  %v279_v57 = vadd.f32 %v278_v54, %v277_v51 }
  0xff   :  { %265 = vst [vmem:[%s499_s3] sm:$0x1] %v264_v56  ;;  %v280_v58 = vadd.f32 %v279_v57, %v266_v55 }
 0x101   :  { %281 = vst [vmem:[%s500_s4] sm:$0x1] %v280_v58 }

// kernel: _lambda_.37
= control target key start
LH: loop header
LB: loop body
LE: loop exit
PB: predicated region body
PF: predicated region fallthrough
CT: control target
= control target key end

     0   :  { %v293_v0 = vmov 0   ;;  %vm128_vm0 = vcmask 130048   ;;  %v294_v14 = vmov 0.0   ;;  %s389_s1 = inlined_call_operand.vmem [shape: bf16[144,128], index: 1, kind: input, shape index: {}]   ;;  %s390_s0 = inlined_call_operand.vmem [shape: bf16[32,144], index: 0, kind: input, shape index: {}]   ;;  %s391_s3 = inlined_call_operand.vmem [shape: f32[1,128], index: 3, kind: output, shape index: {1}]   ;;  %s392_s4 = inlined_call_operand.vmem [shape: f32[1,128], index: 4, kind: output, shape index: {2}]   ;;  %s393_s2 = inlined_call_operand.vmem [shape: f32[32,128], index: 2, kind: output, shape index: {0}]  }
   0x1   :  { %135 = vmatprep.subr.bf16.mxu0 %v293_v0  ;;  %258 = vmatprep.subr.bf16.mxu1 %v293_v0  ;;  %v278_v1 = vld [vmem:[%s389_s1 + $0x38] sm:$0xff]   ;;  %v279_v2 = vld [vmem:[%s389_s1 + $0x30] sm:$0xff]   ;;  %v280_v3 = vld [vmem:[%s389_s1 + $0x28] sm:$0xff]   ;;  %28 = vst [vmem:[%s391_s3] sm:$0x1] %v294_v14 }
   0x2   :  { %136 = vmatpush1.bf16.msra.mxu0 %v278_v1  ;;  %267 = vmatpush1.bf16.msra.mxu1 %v278_v1  ;;  %v281_v4 = vld [vmem:[%s389_s1 + $0x20] sm:$0xff]   ;;  %v292_v6 = vld [vmem:[%s390_s0 + $0x14] ss:$8 sps:$4 sm:$0xff]   ;;  %v284_v9 = vld [vmem:[%s389_s1 + $0x8] sm:$0xff]   ;;  %29 = vst [vmem:[%s392_s4] sm:$0x1] %v294_v14 }
   0x3   :  { %137 = vmatprep.subr.bf16.mxu0 %v293_v0  ;;  %259 = vmatprep.subr.bf16.mxu1 %v293_v0  ;;  %v289_v5 = vld [vmem:[%s390_s0 + $0x4] ss:$8 sps:$4 sm:$0xff]   ;;  %v282_v7 = vld [vmem:[%s389_s1 + $0x18] sm:$0xff]   ;;  %v283_v8 = vld [vmem:[%s389_s1 + $0x10] sm:$0xff]  }
   0x4   :  { %256 = vmatprep.mubr.msk.bf16.mxu0 %vm128_vm0, %v289_v5  ;;  %257 = vmatprep.mubr.msk.bf16.mxu1 %vm128_vm0, %v292_v6  ;;  %v285_v10 = vld [vmem:[%s389_s1] sm:$0xff]   ;;  %v290_v13 = vld [vmem:[%s390_s0 + $0x10] ss:$8 sps:$4 sm:$0xff]  }
   0x5   :  { %v286_v11 = vld [vmem:[%s389_s1 + $0x40] sm:$0xff]  }
   0x6   :  { %138 = vmatpush1.bf16.msra.mxu0 %v279_v2  ;;  %268 = vmatpush1.bf16.msra.mxu1 %v279_v2  ;;  %v287_v12 = vld [vmem:[%s390_s0] ss:$8 sps:$4 sm:$0xff]  }
   0x7   :  { %139 = vmatprep.subr.bf16.mxu0 %v293_v0  ;;  %260 = vmatprep.subr.bf16.mxu1 %v293_v0 }
   0x8   :  { %v203_v42 = vld [vmem:[%s391_s3] sm:$0x1] }
   0x9   :  { %v215_v45 = vld [vmem:[%s392_s4] sm:$0x1] }
   0xa   :  { %140 = vmatpush1.bf16.msra.mxu0 %v280_v3  ;;  %269 = vmatpush1.bf16.msra.mxu1 %v280_v3 }
   0xb   :  { %141 = vmatprep.subr.bf16.mxu0 %v293_v0  ;;  %261 = vmatprep.subr.bf16.mxu1 %v293_v0 }
   0xe   :  { %142 = vmatpush1.bf16.msra.mxu0 %v281_v4  ;;  %270 = vmatpush1.bf16.msra.mxu1 %v281_v4 }
   0xf   :  { %143 = vmatprep.subr.bf16.mxu0 %v293_v0  ;;  %262 = vmatprep.subr.bf16.mxu1 %v293_v0 }
  0x12   :  { %144 = vmatpush1.bf16.msra.mxu0 %v282_v7  ;;  %271 = vmatpush1.bf16.msra.mxu1 %v282_v7 }
  0x13   :  { %145 = vmatprep.subr.bf16.mxu0 %v293_v0  ;;  %263 = vmatprep.subr.bf16.mxu1 %v293_v0 }
  0x16   :  { %146 = vmatpush1.bf16.msra.mxu0 %v283_v8  ;;  %272 = vmatpush1.bf16.msra.mxu1 %v283_v8 }
  0x17   :  { %147 = vmatprep.subr.bf16.mxu0 %v293_v0  ;;  %264 = vmatprep.subr.bf16.mxu1 %v293_v0 }
  0x1a   :  { %148 = vmatpush1.bf16.msra.mxu0 %v284_v9  ;;  %273 = vmatpush1.bf16.msra.mxu1 %v284_v9 }
  0x1b   :  { %149 = vmatprep.subr.bf16.mxu0 %v293_v0  ;;  %265 = vmatprep.subr.bf16.mxu1 %v293_v0 }
  0x1e   :  { %150 = vmatpush1.bf16.msra.mxu0 %v285_v10  ;;  %274 = vmatpush1.bf16.msra.mxu1 %v285_v10 }
  0x1f   :  { %165 = vmatprep.subr.bf16.mxu0 %v293_v0  ;;  %266 = vmatprep.subr.bf16.mxu1 %v293_v0 }
  0x22   :  { %166 = vmatpush2.bf16.msra.mxu0 %v286_v11  ;;  %275 = vmatpush2.bf16.msra.mxu1 %v286_v11 }
  0x25   :  { %168 = vmatmul.mubr.bf16.vlgmr.msra.gmra.mxu0 %v287_v12  ;;  %176 = vmatmul.mubr.bf16.vlgmr.msra.gmra.mxu1 %v290_v13 }
  0xe5   :  { %v169_v15 = vpop.f32.mrf.mxu0  ;;  %v177_v16 = vpop.f32.mrf.mxu1 }
  0xe6   :  { %199 = vst [vmem:[%s393_s2] sm:$0xff] %v169_v15  ;;  %201 = vst [vmem:[%s393_s2 + $0x10] sm:$0xff] %v177_v16  ;;  %v216_v21 = vmul.f32 %v169_v15, %v169_v15  ;;  %v218_v26 = vmul.f32 %v177_v16, %v177_v16 }
  0xe7   :  { %v171_v17 = vpop.f32.mrf.mxu0  ;;  %v179_v18 = vpop.f32.mrf.mxu1 }
  0xe9   :  { %v172_v19 = vpop.f32.mrf.mxu0  ;;  %v180_v20 = vpop.f32.mrf.mxu1 }
  0xea   :  { %200 = vst [vmem:[%s393_s2 + $0x8] sm:$0xff] %v172_v19  ;;  %v204_v22 = vadd.f32 %v172_v19, %v169_v15  ;;  %v217_v23 = vmul.f32 %v172_v19, %v172_v19  ;;  %202 = vst [vmem:[%s393_s2 + $0x18] sm:$0xff] %v180_v20  ;;  %v219_v30 = vmul.f32 %v180_v20, %v180_v20 }
  0xeb   :  { %v174_v24 = vpop.f32.mrf.mxu0  ;;  %v182_v25 = vpop.f32.mrf.mxu1 }
  0xec   :  { %v220_v27 = vadd.f32 %v217_v23, %v216_v21  ;;  %v205_v28 = vadd.f32 %v204_v22, %v177_v16 }
  0xee   :  { %v206_v29 = vadd.f32 %v205_v28, %v180_v20  ;;  %v221_v31 = vadd.f32 %v220_v27, %v218_v26 }
  0xf0   :  { %v207_v32 = vrot.slane %v206_v29, 4  ;;  %v222_v33 = vadd.f32 %v221_v31, %v219_v30 }
  0xf2   :  { %v208_v34 = vadd.f32 %v207_v32, %v206_v29  ;;  %v223_v35 = vrot.slane %v222_v33, 4 }
  0xf4   :  { %v209_v36 = vrot.slane %v208_v34, 2  ;;  %v224_v37 = vadd.f32 %v223_v35, %v222_v33 }
  0xf6   :  { %v210_v38 = vadd.f32 %v209_v36, %v208_v34  ;;  %v225_v39 = vrot.slane %v224_v37, 2 }
  0xf8   :  { %v211_v40 = vrot.slane %v210_v38, 1  ;;  %v226_v41 = vadd.f32 %v225_v39, %v224_v37 }
  0xfa   :  { %v212_v43 = vadd.f32 %v211_v40, %v210_v38  ;;  %v227_v44 = vrot.slane %v226_v41, 1 }
  0xfc   :  { %v213_v46 = vadd.f32 %v212_v43, %v203_v42  ;;  %v228_v47 = vadd.f32 %v227_v44, %v226_v41 }
  0xfe   :  { %214 = vst [vmem:[%s391_s3] sm:$0x1] %v213_v46  ;;  %v229_v48 = vadd.f32 %v228_v47, %v215_v45 }
 0x100   :  { %230 = vst [vmem:[%s392_s4] sm:$0x1] %v229_v48 }

// kernel: _lambda_.40
= control target key start
LH: loop header
LB: loop body
LE: loop exit
PB: predicated region body
PF: predicated region fallthrough
CT: control target
= control target key end

     0   :  { %s133_s0 = inlined_call_operand.vmem [shape: f32[32,128], index: 0, kind: input, shape index: {}]   ;;  %s134_s1 = inlined_call_operand.vmem [shape: f32[1,128], index: 1, kind: input, shape index: {}]   ;;  %s135_s2 = inlined_call_operand.vmem [shape: f32[1,128], index: 2, kind: input, shape index: {}]   ;;  %s136_s3 = inlined_call_operand.vmem [shape: bf16[32,128], index: 3, kind: output, shape index: {}]  }
   0x1   :  { %v14_v0 = vld [vmem:[%s133_s0] sm:$0xff]  ;;  %v15_v1 = vld [vmem:[%s133_s0 + $0x8] sm:$0xff]  ;;  %v16_v6 = vld [vmem:[%s133_s0 + $0x10] sm:$0xff] }
   0x2   :  { %v68_v2 = vld [vmem:[%s134_s1] ss:$0 sm:$0xff]  ;;  %v17_v7 = vld [vmem:[%s133_s0 + $0x18] sm:$0xff] }
   0x3   :  { %v25_v3 = vmul.f32 %v68_v2, %v14_v0  ;;  %v26_v4 = vmul.f32 %v68_v2, %v15_v1  ;;  %v69_v5 = vld [vmem:[%s135_s2] ss:$0 sm:$0xff]  ;;  %v27_v8 = vmul.f32 %v68_v2, %v16_v6  ;;  %v28_v9 = vmul.f32 %v68_v2, %v17_v7 }
   0x5   :  { %v36_v10 = vadd.f32 %v69_v5, %v25_v3  ;;  %v37_v11 = vadd.f32 %v69_v5, %v26_v4  ;;  %v38_v12 = vadd.f32 %v69_v5, %v27_v8  ;;  %v39_v13 = vadd.f32 %v69_v5, %v28_v9 }
   0x7   :  { %v40_v14 = vmax.f32 %v36_v10, 0.0  ;;  %v41_v15 = vmax.f32 %v37_v11, 0.0  ;;  %v42_v16 = vmax.f32 %v38_v12, 0.0  ;;  %v43_v17 = vmax.f32 %v39_v13, 0.0 }
   0x9   :  { %v81_v18 = vpack.c.bf16 %v41_v15, %v40_v14  ;;  %v86_v19 = vpack.c.bf16 %v43_v17, %v42_v16 }
   0xb   :  { %82 = vst [vmem:[%s136_s3] sm:$0xff] %v81_v18   ;;  %88 = vst [vmem:[%s136_s3 + $0x8] sm:$0xff] %v86_v19  }

// kernel: _lambda_.45
= control target key start
LH: loop header
LB: loop body
LE: loop exit
PB: predicated region body
PF: predicated region fallthrough
CT: control target
= control target key end

     0   :  { %v617_v0 = vmov 0   ;;  %vm250_vm0 = vcmask 654336   ;;  %v618_v30 = vmov 0.0   ;;  %s849_s1 = inlined_call_operand.vmem [shape: bf16[208,128], index: 1, kind: input, shape index: {}]   ;;  %s850_s0 = inlined_call_operand.vmem [shape: bf16[128,208], index: 0, kind: input, shape index: {}]   ;;  %s851_s3 = inlined_call_operand.vmem [shape: f32[1,128], index: 3, kind: output, shape index: {1}]   ;;  %s852_s4 = inlined_call_operand.vmem [shape: f32[1,128], index: 4, kind: output, shape index: {2}]   ;;  %s853_s2 = inlined_call_operand.vmem [shape: f32[128,128], index: 2, kind: output, shape index: {0}]  }
   0x1   :  { %275 = vmatprep.subr.bf16.mxu0 %v617_v0  ;;  %v580_v1 = vld [vmem:[%s849_s1 + $0x38] sm:$0xff]   ;;  %552 = vmatprep.subr.bf16.mxu1 %v617_v0  ;;  %v581_v2 = vld [vmem:[%s849_s1 + $0x30] sm:$0xff]   ;;  %v582_v3 = vld [vmem:[%s849_s1 + $0x28] sm:$0xff]   ;;  %40 = vst [vmem:[%s851_s3] sm:$0x1] %v618_v30 }
   0x2   :  { %276 = vmatpush1.bf16.msra.mxu0 %v580_v1  ;;  %565 = vmatpush1.bf16.msra.mxu1 %v580_v1  ;;  %v583_v4 = vld [vmem:[%s849_s1 + $0x20] sm:$0xff]   ;;  %v584_v5 = vld [vmem:[%s849_s1 + $0x18] sm:$0xff]   ;;  %v585_v8 = vld [vmem:[%s849_s1 + $0x10] sm:$0xff]   ;;  %41 = vst [vmem:[%s852_s4] sm:$0x1] %v618_v30 }
   0x3   :  { %277 = vmatprep.subr.bf16.mxu0 %v617_v0  ;;  %553 = vmatprep.subr.bf16.mxu1 %v617_v0  ;;  %v595_v6 = vld [vmem:[%s850_s0 + $0x4] ss:$8 sps:$4 sm:$0xff]   ;;  %v589_v12 = vld [vmem:[%s849_s1 + $0x58] sm:$0xff]   ;;  %v590_v13 = vld [vmem:[%s849_s1 + $0x50] sm:$0xff]  }
   0x4   :  { %544 = vmatprep.mubr.msk.bf16.mxu0 %vm250_vm0, %v595_v6  ;;  %v601_v7 = vld [vmem:[%s850_s0 + $0x44] ss:$8 sps:$4 sm:$0xff]   ;;  %v593_v16 = vld [vmem:[%s850_s0] ss:$8 sps:$4 sm:$0xff]   ;;  %v596_v18 = vld [vmem:[%s850_s0 + $0x14] ss:$8 sps:$4 sm:$0xff]  }
   0x5   :  { %548 = vmatprep.mubr.msk.bf16.mxu1 %vm250_vm0, %v601_v7  ;;  %v586_v9 = vld [vmem:[%s849_s1 + $0x8] sm:$0xff]   ;;  %v587_v10 = vld [vmem:[%s849_s1] sm:$0xff]   ;;  %v605_v19 = vld [vmem:[%s850_s0 + $0x54] ss:$8 sps:$4 sm:$0xff]  }
   0x6   :  { %278 = vmatpush1.bf16.msra.mxu0 %v581_v2  ;;  %566 = vmatpush1.bf16.msra.mxu1 %v581_v2  ;;  %v588_v11 = vld [vmem:[%s849_s1 + $0x60] sm:$0xff]   ;;  %v591_v14 = vld [vmem:[%s849_s1 + $0x48] sm:$0xff]   ;;  %v598_v20 = vld [vmem:[%s850_s0 + $0x10] ss:$8 sps:$4 sm:$0xff]  }
   0x7   :  { %279 = vmatprep.subr.bf16.mxu0 %v617_v0  ;;  %554 = vmatprep.subr.bf16.mxu1 %v617_v0  ;;  %v592_v15 = vld [vmem:[%s849_s1 + $0x40] sm:$0xff]   ;;  %v607_v21 = vld [vmem:[%s850_s0 + $0x50] ss:$8 sps:$4 sm:$0xff]   ;;  %v608_v26 = vld [vmem:[%s850_s0 + $0x34] ss:$8 sps:$4 sm:$0xff]  }
   0x8   :  { %v599_v17 = vld [vmem:[%s850_s0 + $0x40] ss:$8 sps:$4 sm:$0xff]   ;;  %v602_v22 = vld [vmem:[%s850_s0 + $0x24] ss:$8 sps:$4 sm:$0xff]   ;;  %v614_v27 = vld [vmem:[%s850_s0 + $0x74] ss:$8 sps:$4 sm:$0xff]  }
   0x9   :  { %v611_v23 = vld [vmem:[%s850_s0 + $0x64] ss:$8 sps:$4 sm:$0xff]   ;;  %v604_v24 = vld [vmem:[%s850_s0 + $0x20] ss:$8 sps:$4 sm:$0xff]   ;;  %v610_v28 = vld [vmem:[%s850_s0 + $0x30] ss:$8 sps:$4 sm:$0xff]  }
   0xa   :  { %280 = vmatpush1.bf16.msra.mxu0 %v582_v3  ;;  %567 = vmatpush1.bf16.msra.mxu1 %v582_v3  ;;  %v613_v25 = vld [vmem:[%s850_s0 + $0x60] ss:$8 sps:$4 sm:$0xff]   ;;  %v616_v29 = vld [vmem:[%s850_s0 + $0x70] ss:$8 sps:$4 sm:$0xff]  }
   0xb   :  { %281 = vmatprep.subr.bf16.mxu0 %v617_v0  ;;  %555 = vmatprep.subr.bf16.mxu1 %v617_v0 }
   0xe   :  { %282 = vmatpush1.bf16.msra.mxu0 %v583_v4  ;;  %568 = vmatpush1.bf16.msra.mxu1 %v583_v4 }
   0xf   :  { %283 = vmatprep.subr.bf16.mxu0 %v617_v0  ;;  %556 = vmatprep.subr.bf16.mxu1 %v617_v0 }
  0x12   :  { %284 = vmatpush1.bf16.msra.mxu0 %v584_v5  ;;  %569 = vmatpush1.bf16.msra.mxu1 %v584_v5 }
  0x13   :  { %285 = vmatprep.subr.bf16.mxu0 %v617_v0  ;;  %557 = vmatprep.subr.bf16.mxu1 %v617_v0 }
  0x16   :  { %286 = vmatpush1.bf16.msra.mxu0 %v585_v8  ;;  %570 = vmatpush1.bf16.msra.mxu1 %v585_v8 }
  0x17   :  { %287 = vmatprep.subr.bf16.mxu0 %v617_v0  ;;  %558 = vmatprep.subr.bf16.mxu1 %v617_v0 }
  0x1a   :  { %288 = vmatpush1.bf16.msra.mxu0 %v586_v9  ;;  %571 = vmatpush1.bf16.msra.mxu1 %v586_v9 }
  0x1b   :  { %289 = vmatprep.subr.bf16.mxu0 %v617_v0  ;;  %559 = vmatprep.subr.bf16.mxu1 %v617_v0 }
  0x1e   :  { %290 = vmatpush1.bf16.msra.mxu0 %v587_v10  ;;  %572 = vmatpush1.bf16.msra.mxu1 %v587_v10 }
  0x1f   :  { %297 = vmatprep.subr.bf16.mxu0 %v617_v0  ;;  %560 = vmatprep.subr.bf16.mxu1 %v617_v0 }
  0x22   :  { %298 = vmatpush2.bf16.msra.mxu0 %v588_v11  ;;  %573 = vmatpush2.bf16.msra.mxu1 %v588_v11 }
  0x23   :  { %299 = vmatprep.subr.bf16.mxu0 %v617_v0  ;;  %561 = vmatprep.subr.bf16.mxu1 %v617_v0 }
  0x26   :  { %300 = vmatpush2.bf16.msra.mxu0 %v589_v12  ;;  %574 = vmatpush2.bf16.msra.mxu1 %v589_v12 }
  0x27   :  { %301 = vmatprep.subr.bf16.mxu0 %v617_v0  ;;  %562 = vmatprep.subr.bf16.mxu1 %v617_v0 }
  0x2a   :  { %302 = vmatpush2.bf16.msra.mxu0 %v590_v13  ;;  %575 = vmatpush2.bf16.msra.mxu1 %v590_v13 }
  0x2b   :  { %303 = vmatprep.subr.bf16.mxu0 %v617_v0  ;;  %563 = vmatprep.subr.bf16.mxu1 %v617_v0 }
  0x2e   :  { %304 = vmatpush2.bf16.msra.mxu0 %v591_v14  ;;  %576 = vmatpush2.bf16.msra.mxu1 %v591_v14 }
  0x2f   :  { %305 = vmatprep.subr.bf16.mxu0 %v617_v0  ;;  %564 = vmatprep.subr.bf16.mxu1 %v617_v0 }
  0x32   :  { %306 = vmatpush2.bf16.msra.mxu0 %v592_v15  ;;  %577 = vmatpush2.bf16.msra.mxu1 %v592_v15 }
  0x35   :  { %308 = vmatmul.mubr.bf16.vlgmr.msra.gmra.mxu0 %v593_v16  ;;  %340 = vmatmul.mubr.bf16.vlgmr.msra.gmra.mxu1 %v599_v17 }
  0x36   :  { %545 = vmatprep.mubr.msk.bf16.mxu0 %vm250_vm0, %v596_v18  ;;  %549 = vmatprep.mubr.msk.bf16.mxu1 %vm250_vm0, %v605_v19 }
  0x3d   :  { %316 = vmatmul.mubr.bf16.gmra.mxu0 %v598_v20  ;;  %348 = vmatmul.mubr.bf16.gmra.mxu1 %v607_v21 }
  0x3e   :  { %546 = vmatprep.mubr.msk.bf16.mxu0 %vm250_vm0, %v602_v22  ;;  %550 = vmatprep.mubr.msk.bf16.mxu1 %vm250_vm0, %v611_v23 }
  0x45   :  { %324 = vmatmul.mubr.bf16.gmra.mxu0 %v604_v24  ;;  %356 = vmatmul.mubr.bf16.gmra.mxu1 %v613_v25 }
  0x46   :  { %547 = vmatprep.mubr.msk.bf16.mxu0 %vm250_vm0, %v608_v26  ;;  %551 = vmatprep.mubr.msk.bf16.mxu1 %vm250_vm0, %v614_v27 }
  0x4d   :  { %332 = vmatmul.mubr.bf16.gmra.mxu0 %v610_v28  ;;  %364 = vmatmul.mubr.bf16.gmra.mxu1 %v616_v29 }
  0xf5   :  { %v309_v31 = vpop.f32.mrf.mxu0  ;;  %v771_v32 = vpop.f32.mrf.mxu1 }
  0xf6   :  { %423 = vst [vmem:[%s853_s2] sm:$0xff] %v309_v31  ;;  %431 = vst [vmem:[%s853_s2 + $0x40] sm:$0xff] %v771_v32  ;;  %v464_v50 = vmul.f32 %v309_v31, %v309_v31  ;;  %v472_v20 = vmul.f32 %v771_v32, %v771_v32 }
  0xf7   :  { %v311_v33 = vpop.f32.mrf.mxu0  ;;  %v343_v34 = vpop.f32.mrf.mxu1 }
  0xf9   :  { %v312_v35 = vpop.f32.mrf.mxu0  ;;  %v780_v36 = vpop.f32.mrf.mxu1 }
  0xfa   :  { %424 = vst [vmem:[%s853_s2 + $0x8] sm:$0xff] %v312_v35  ;;  %432 = vst [vmem:[%s853_s2 + $0x48] sm:$0xff] %v780_v36  ;;  %v465_v47 = vmul.f32 %v312_v35, %v312_v35  ;;  %v440_v51 = vadd.f32 %v312_v35, %v309_v31  ;;  %v473_v23 = vmul.f32 %v780_v36, %v780_v36 }
  0xfb   :  { %v314_v37 = vpop.f32.mrf.mxu0  ;;  %v346_v38 = vpop.f32.mrf.mxu1 }
  0xfc   :  { %v480_v55 = vadd.f32 %v465_v47, %v464_v50 }
  0xfd   :  { %v317_v39 = vpop.f32.mrf.mxu0  ;;  %v789_v40 = vpop.f32.mrf.mxu1 }
  0xfe   :  { %425 = vst [vmem:[%s853_s2 + $0x10] sm:$0xff] %v317_v39  ;;  %433 = vst [vmem:[%s853_s2 + $0x50] sm:$0xff] %v789_v40  ;;  %v466_v52 = vmul.f32 %v317_v39, %v317_v39  ;;  %v441_v56 = vadd.f32 %v440_v51, %v317_v39  ;;  %v474_v26 = vmul.f32 %v789_v40, %v789_v40 }
  0xff   :  { %v319_v41 = vpop.f32.mrf.mxu0  ;;  %v351_v42 = vpop.f32.mrf.mxu1 }
 0x100   :  { %v481_v60 = vadd.f32 %v480_v55, %v466_v52 }
 0x101   :  { %v320_v43 = vpop.f32.mrf.mxu0  ;;  %v352_v44 = vpop.f32.mrf.mxu1 }
 0x102   :  { %426 = vst [vmem:[%s853_s2 + $0x18] sm:$0xff] %v320_v43  ;;  %434 = vst [vmem:[%s853_s2 + $0x58] sm:$0xff] %v352_v44  ;;  %v467_v57 = vmul.f32 %v320_v43, %v320_v43  ;;  %v442_v61 = vadd.f32 %v441_v56, %v320_v43  ;;  %v475_v29 = vmul.f32 %v352_v44, %v352_v44 }
 0x103   :  { %v322_v45 = vpop.f32.mrf.mxu0  ;;  %v354_v46 = vpop.f32.mrf.mxu1 }
 0x104   :  { %v482_v1 = vadd.f32 %v481_v60, %v467_v57  ;;  %v463_v57 = vld [vmem:[%s852_s4] sm:$0x1] }
 0x105   :  { %v325_v48 = vpop.f32.mrf.mxu0  ;;  %v357_v49 = vpop.f32.mrf.mxu1 }
 0x106   :  { %427 = vst [vmem:[%s853_s2 + $0x20] sm:$0xff] %v325_v48  ;;  %435 = vst [vmem:[%s853_s2 + $0x60] sm:$0xff] %v357_v49  ;;  %v468_v62 = vmul.f32 %v325_v48, %v325_v48  ;;  %v443_v2 = vadd.f32 %v442_v61, %v325_v48  ;;  %v476_v33 = vmul.f32 %v357_v49, %v357_v49 }
 0x107   :  { %v327_v53 = vpop.f32.mrf.mxu0  ;;  %v359_v54 = vpop.f32.mrf.mxu1 }
 0x108   :  { %v483_v6 = vadd.f32 %v482_v1, %v468_v62  ;;  %v439_v54 = vld [vmem:[%s851_s3] sm:$0x1] }
 0x109   :  { %v328_v58 = vpop.f32.mrf.mxu0  ;;  %v360_v59 = vpop.f32.mrf.mxu1 }
 0x10a   :  { %428 = vst [vmem:[%s853_s2 + $0x28] sm:$0xff] %v328_v58  ;;  %436 = vst [vmem:[%s853_s2 + $0x68] sm:$0xff] %v360_v59  ;;  %v469_v3 = vmul.f32 %v328_v58, %v328_v58  ;;  %v444_v7 = vadd.f32 %v443_v2, %v328_v58  ;;  %v477_v37 = vmul.f32 %v360_v59, %v360_v59 }
 0x10b   :  { %v330_v63 = vpop.f32.mrf.mxu0  ;;  %v362_v0 = vpop.f32.mrf.mxu1 }
 0x10c   :  { %v484_v11 = vadd.f32 %v483_v6, %v469_v3 }
 0x10d   :  { %v333_v4 = vpop.f32.mrf.mxu0  ;;  %v365_v5 = vpop.f32.mrf.mxu1 }
 0x10e   :  { %429 = vst [vmem:[%s853_s2 + $0x30] sm:$0xff] %v333_v4  ;;  %v470_v8 = vmul.f32 %v333_v4, %v333_v4  ;;  %437 = vst [vmem:[%s853_s2 + $0x70] sm:$0xff] %v365_v5  ;;  %v445_v12 = vadd.f32 %v444_v7, %v333_v4  ;;  %v478_v42 = vmul.f32 %v365_v5, %v365_v5 }
 0x10f   :  { %v335_v9 = vpop.f32.mrf.mxu0  ;;  %v367_v10 = vpop.f32.mrf.mxu1 }
 0x110   :  { %v485_v15 = vadd.f32 %v484_v11, %v470_v8 }
 0x111   :  { %v336_v13 = vpop.f32.mrf.mxu0  ;;  %v368_v14 = vpop.f32.mrf.mxu1 }
 0x112   :  { %430 = vst [vmem:[%s853_s2 + $0x38] sm:$0xff] %v336_v13  ;;  %v446_v16 = vadd.f32 %v445_v12, %v336_v13  ;;  %v471_v17 = vmul.f32 %v336_v13, %v336_v13  ;;  %438 = vst [vmem:[%s853_s2 + $0x78] sm:$0xff] %v368_v14  ;;  %v479_v45 = vmul.f32 %v368_v14, %v368_v14 }
 0x113   :  { %v338_v18 = vpop.f32.mrf.mxu0  ;;  %v370_v19 = vpop.f32.mrf.mxu1 }
 0x114   :  { %v447_v21 = vadd.f32 %v446_v16, %v771_v32  ;;  %v486_v22 = vadd.f32 %v485_v15, %v471_v17 }
 0x116   :  { %v448_v24 = vadd.f32 %v447_v21, %v780_v36  ;;  %v487_v25 = vadd.f32 %v486_v22, %v472_v20 }
 0x118   :  { %v488_v27 = vadd.f32 %v487_v25, %v473_v23  ;;  %v449_v28 = vadd.f32 %v448_v24, %v789_v40 }
 0x11a   :  { %v450_v30 = vadd.f32 %v449_v28, %v352_v44  ;;  %v489_v31 = vadd.f32 %v488_v27, %v474_v26 }
 0x11c   :  { %v451_v34 = vadd.f32 %v450_v30, %v357_v49  ;;  %v490_v35 = vadd.f32 %v489_v31, %v475_v29 }
 0x11e   :  { %v452_v32 = vadd.f32 %v451_v34, %v360_v59  ;;  %v491_v38 = vadd.f32 %v490_v35, %v476_v33 }
 0x120   :  { %v492_v39 = vadd.f32 %v491_v38, %v477_v37  ;;  %v453_v41 = vadd.f32 %v452_v32, %v365_v5 }
 0x122   :  { %v493_v36 = vadd.f32 %v492_v39, %v478_v42  ;;  %v454_v43 = vadd.f32 %v453_v41, %v368_v14 }
 0x124   :  { %v455_v46 = vrot.slane %v454_v43, 4  ;;  %v494_v47 = vadd.f32 %v493_v36, %v479_v45 }
 0x126   :  { %v456_v48 = vadd.f32 %v455_v46, %v454_v43  ;;  %v495_v50 = vrot.slane %v494_v47, 4 }
 0x128   :  { %v457_v40 = vrot.slane %v456_v48, 2  ;;  %v496_v51 = vadd.f32 %v495_v50, %v494_v47 }
 0x12a   :  { %v458_v44 = vadd.f32 %v457_v40, %v456_v48  ;;  %v497_v52 = vrot.slane %v496_v51, 2 }
 0x12c   :  { %v459_v53 = vrot.slane %v458_v44, 1  ;;  %v498_v49 = vadd.f32 %v497_v52, %v496_v51 }
 0x12e   :  { %v460_v55 = vadd.f32 %v459_v53, %v458_v44  ;;  %v499_v56 = vrot.slane %v498_v49, 1 }
 0x130   :  { %v461_v58 = vadd.f32 %v460_v55, %v439_v54  ;;  %v500_v59 = vadd.f32 %v499_v56, %v498_v49 }
 0x132   :  { %462 = vst [vmem:[%s851_s3] sm:$0x1] %v461_v58  ;;  %v501_v60 = vadd.f32 %v500_v59, %v463_v57 }
 0x134   :  { %502 = vst [vmem:[%s852_s4] sm:$0x1] %v501_v60 }

// kernel: _lambda_.48
= control target key start
LH: loop header
LB: loop body
LE: loop exit
PB: predicated region body
PF: predicated region fallthrough
CT: control target
= control target key end

     0   :  { %s391_s0 = inlined_call_operand.vmem [shape: f32[128,128], index: 0, kind: input, shape index: {}]   ;;  %s392_s1 = inlined_call_operand.vmem [shape: f32[1,128], index: 1, kind: input, shape index: {}]   ;;  %s393_s2 = inlined_call_operand.vmem [shape: f32[1,128], index: 2, kind: input, shape index: {}]   ;;  %s394_s3 = inlined_call_operand.vmem [shape: bf16[128,128], index: 3, kind: output, shape index: {}]  }
   0x1   :  { %v14_v0 = vld [vmem:[%s391_s0] sm:$0xff]  ;;  %v15_v1 = vld [vmem:[%s391_s0 + $0x8] sm:$0xff]  ;;  %v16_v6 = vld [vmem:[%s391_s0 + $0x10] sm:$0xff] }
   0x2   :  { %v286_v2 = vld [vmem:[%s392_s1] ss:$0 sm:$0xff]  ;;  %v17_v7 = vld [vmem:[%s391_s0 + $0x18] sm:$0xff]  ;;  %v19_v11 = vld [vmem:[%s391_s0 + $0x28] sm:$0xff] }
   0x3   :  { %v37_v3 = vmul.f32 %v286_v2, %v14_v0  ;;  %v38_v4 = vmul.f32 %v286_v2, %v15_v1  ;;  %v293_v5 = vld [vmem:[%s393_s2] ss:$0 sm:$0xff]  ;;  %v39_v8 = vmul.f32 %v286_v2, %v16_v6  ;;  %v40_v9 = vmul.f32 %v286_v2, %v17_v7  ;;  %v20_v12 = vld [vmem:[%s391_s0 + $0x30] sm:$0xff]  ;;  %v21_v17 = vld [vmem:[%s391_s0 + $0x38] sm:$0xff] }
   0x4   :  { %v18_v10 = vld [vmem:[%s391_s0 + $0x20] sm:$0xff]  ;;  %v42_v16 = vmul.f32 %v286_v2, %v19_v11  ;;  %v43_v20 = vmul.f32 %v286_v2, %v20_v12  ;;  %v44_v21 = vmul.f32 %v286_v2, %v21_v17  ;;  %v23_v27 = vld [vmem:[%s391_s0 + $0x48] sm:$0xff]  ;;  %v24_v32 = vld [vmem:[%s391_s0 + $0x50] sm:$0xff] }
   0x5   :  { %v60_v13 = vadd.f32 %v293_v5, %v37_v3  ;;  %v61_v14 = vadd.f32 %v293_v5, %v38_v4  ;;  %v41_v15 = vmul.f32 %v286_v2, %v18_v10  ;;  %v62_v18 = vadd.f32 %v293_v5, %v39_v8  ;;  %v22_v22 = vld [vmem:[%s391_s0 + $0x40] sm:$0xff]  ;;  %v25_v33 = vld [vmem:[%s391_s0 + $0x58] sm:$0xff]  ;;  %v27_v39 = vld [vmem:[%s391_s0 + $0x68] sm:$0xff] }
   0x6   :  { %v63_v19 = vadd.f32 %v293_v5, %v40_v9  ;;  %v65_v26 = vadd.f32 %v293_v5, %v42_v16  ;;  %v66_v30 = vadd.f32 %v293_v5, %v43_v20  ;;  %v67_v31 = vadd.f32 %v293_v5, %v44_v21  ;;  %v26_v38 = vld [vmem:[%s391_s0 + $0x60] sm:$0xff]  ;;  %v28_v44 = vld [vmem:[%s391_s0 + $0x70] sm:$0xff]  ;;  %v29_v49 = vld [vmem:[%s391_s0 + $0x78] sm:$0xff] }
   0x7   :  { %v76_v23 = vmax.f32 %v60_v13, 0.0  ;;  %v77_v24 = vmax.f32 %v61_v14, 0.0  ;;  %v64_v25 = vadd.f32 %v293_v5, %v41_v15  ;;  %v78_v28 = vmax.f32 %v62_v18, 0.0 }
   0x8   :  { %v79_v29 = vmax.f32 %v63_v19, 0.0  ;;  %v81_v36 = vmax.f32 %v65_v26, 0.0  ;;  %v45_v37 = vmul.f32 %v286_v2, %v22_v22  ;;  %v82_v41 = vmax.f32 %v66_v30, 0.0 }
   0x9   :  { %v213_v34 = vpack.c.bf16 %v77_v24, %v76_v23  ;;  %v80_v35 = vmax.f32 %v64_v25, 0.0  ;;  %v83_v42 = vmax.f32 %v67_v31, 0.0  ;;  %v46_v43 = vmul.f32 %v286_v2, %v23_v27 }
   0xa   :  { %v218_v40 = vpack.c.bf16 %v79_v29, %v78_v28  ;;  %v68_v46 = vadd.f32 %v293_v5, %v45_v37  ;;  %v47_v47 = vmul.f32 %v286_v2, %v24_v32  ;;  %v48_v48 = vmul.f32 %v286_v2, %v25_v33 }
   0xb   :  { %214 = vst [vmem:[%s394_s3] sm:$0xff] %v213_v34   ;;  %v223_v45 = vpack.c.bf16 %v81_v36, %v80_v35  ;;  %v228_v50 = vpack.c.bf16 %v83_v42, %v82_v41  ;;  %v69_v51 = vadd.f32 %v293_v5, %v46_v43  ;;  %v49_v52 = vmul.f32 %v286_v2, %v26_v38 }
   0xc   :  { %250 = vst [vmem:[%s394_s3 + $0x8] sm:$0xff] %v218_v40   ;;  %v50_v53 = vmul.f32 %v286_v2, %v27_v39  ;;  %v84_v54 = vmax.f32 %v68_v46, 0.0  ;;  %v70_v55 = vadd.f32 %v293_v5, %v47_v47  ;;  %v71_v56 = vadd.f32 %v293_v5, %v48_v48 }
   0xd   :  { %251 = vst [vmem:[%s394_s3 + $0x10] sm:$0xff] %v223_v45   ;;  %v51_v57 = vmul.f32 %v286_v2, %v28_v44  ;;  %252 = vst [vmem:[%s394_s3 + $0x18] sm:$0xff] %v228_v50   ;;  %v85_v58 = vmax.f32 %v69_v51, 0.0  ;;  %v72_v59 = vadd.f32 %v293_v5, %v49_v52  ;;  %v52_v61 = vmul.f32 %v286_v2, %v29_v49 }
   0xe   :  { %v73_v60 = vadd.f32 %v293_v5, %v50_v53  ;;  %v86_v62 = vmax.f32 %v70_v55, 0.0  ;;  %v87_v63 = vmax.f32 %v71_v56, 0.0 }
   0xf   :  { %v74_v0 = vadd.f32 %v293_v5, %v51_v57  ;;  %v233_v1 = vpack.c.bf16 %v85_v58, %v84_v54  ;;  %v88_v3 = vmax.f32 %v72_v59, 0.0  ;;  %v75_v6 = vadd.f32 %v293_v5, %v52_v61 }
  0x10   :  { %v89_v4 = vmax.f32 %v73_v60, 0.0  ;;  %v238_v7 = vpack.c.bf16 %v87_v63, %v86_v62 }
  0x11   :  { %v90_v8 = vmax.f32 %v74_v0, 0.0  ;;  %253 = vst [vmem:[%s394_s3 + $0x20] sm:$0xff] %v233_v1   ;;  %v91_v10 = vmax.f32 %v75_v6, 0.0 }
  0x12   :  { %v243_v9 = vpack.c.bf16 %v89_v4, %v88_v3  ;;  %254 = vst [vmem:[%s394_s3 + $0x28] sm:$0xff] %v238_v7  }
  0x13   :  { %v248_v2 = vpack.c.bf16 %v91_v10, %v90_v8 }
  0x14   :  { %255 = vst [vmem:[%s394_s3 + $0x30] sm:$0xff] %v243_v9  }
  0x15   :  { %256 = vst [vmem:[%s394_s3 + $0x38] sm:$0xff] %v248_v2  }

// kernel: _lambda_.52
= control target key start
LH: loop header
LB: loop body
LE: loop exit
PB: predicated region body
PF: predicated region fallthrough
CT: control target
= control target key end

     0   :  { %10 = vsyncpa [#allocation4], 0  ;;  %s1659_s0 = inlined_call_operand.vmem [shape: bf16[512,64], index: 0, kind: input, shape index: {}]   ;;  %s1660_s1 = inlined_call_operand.vmem [shape: bf16[64,128], index: 1, kind: input, shape index: {}]   ;;  %s1661_s2 = inlined_call_operand.vmem [shape: f32[512,128], index: 2, kind: output, shape index: {0}]   ;;  %s1662_s3 = inlined_call_operand.hbm [shape: f32[1,128], index: 3, kind: output, shape index: {1}]   ;;  %s1663_s4 = inlined_call_operand.hbm [shape: f32[1,128], index: 4, kind: output, shape index: {2}]  }
   0x1   :  { %11 = vsyncpa [#allocation6], 0  ;;  %s1396_s15 = smov 0   ;;  %s1398_s16 = smov 0  }
   0x2   :  { %s1400_s17 = smov 0  }
   0x3 LB: > { %s1105_s18 = sadd.s32 4294967295, %s1365_s17   ;;  %s32_s19 = sadd.s32 1, %s1361_s16  ;;  %s1365_s17 = sphi %s1400_s17, %s17_s17   ;;  %s1361_s16 = sphi %s1398_s16, %s1667_s16   ;;  %s1357_s15 = sphi %s1396_s15, %s1666_s15  }
   0x4   : > { %p34_p0 = scmp.ge.s32.totalorder %s32_s19, 2  ;;  %p1110_p1 = scmp.ge.s32.totalorder %s1365_s17, 1 }
   0x5   : > { %p212_p2 = scmp.lt.s32.totalorder %s1365_s17, 3 }
   0x6   : > { %s1669_s19 = smov (%p34_p0, %s32_s19), 0 }
   0x7   : > { %p213_p3 = pnand %p1110_p1, %p212_p2 }
   0x8   : > { %s1111_s20 = sshll.u32 (!%p213_p3), %s1357_s15, 5  ;;  %p316_p4 = scmp.eq.s32.totalorder (!%p213_p3), %s1357_s15, 0 }
   0x9   : > { %216 = sbr.rel (%p213_p3) target bundleno = 344 (0x158), region = 28  ;;  %p1421_p5 = scmp.lt.s32.totalorder (!%p213_p3), %s1111_s20, 63 }
   0xe   : > { %v1367_v0 = vmov 0.0   ;;  %s1671_s20 = smov (!%p1421_p5, %s1111_s20), 63  ;;  %v1368_v1 = vmov (%p316_p4), 0.0  }
   0xf   : > { %284 = vst [vmem:[#allocation2 + $0xb0] sm:$0xff] %v1367_v0  ;;  %285 = vst [vmem:[#allocation2] sm:$0xff] %v1367_v0  ;;  %s1112_s22 = sshll.u32 %s1671_s20, 2  ;;  %s1114_s23 = sshll.u32 %s1671_s20, 3 }
  0x10   : > { %286 = vst [vmem:[#allocation2 + $0xd8] sm:$0xff] %v1367_v0  ;;  %287 = vst [vmem:[#allocation2 + $0x18] sm:$0xff] %v1367_v0  ;;  %s1432_s26 = scalar_lea.vmem %s1659_s0, %s1112_s22  ;;  %s1437_s29 = scalar_lea.vmem %s1661_s2, %s1114_s23 }
  0x11   : > { %288 = vst [vmem:[#allocation2 + $0x50] sm:$0xff] %v1367_v0  ;;  %289 = vst [vmem:[#allocation2 + $0x68] sm:$0xff] %v1367_v0 }
  0x12   : > { %290 = vst [vmem:[#allocation2 + $0x30] sm:$0xff] %v1367_v0  ;;  %291 = vst [vmem:[#allocation2 + $0x48] sm:$0xff] %v1367_v0 }
  0x13   : > { %292 = vst [vmem:[#allocation2 + $0x80] sm:$0xff] %v1367_v0  ;;  %293 = vst [vmem:[#allocation2 + $0x88] sm:$0xff] %v1367_v0 }
  0x14   : > { %294 = vst [vmem:[#allocation2 + $0xe8] sm:$0xff] %v1367_v0  ;;  %295 = vst [vmem:[#allocation2 + $0xb8] sm:$0xff] %v1367_v0 }
  0x15   : > { %296 = vst [vmem:[#allocation2 + $0x60] sm:$0xff] %v1367_v0  ;;  %297 = vst [vmem:[#allocation2 + $0xf0] sm:$0xff] %v1367_v0 }
  0x16   : > { %298 = vst [vmem:[#allocation2 + $0x8] sm:$0xff] %v1367_v0  ;;  %299 = vst [vmem:[#allocation2 + $0x78] sm:$0xff] %v1367_v0 }
  0x17   : > { %300 = vst [vmem:[#allocation2 + $0x38] sm:$0xff] %v1367_v0  ;;  %301 = vst [vmem:[#allocation2 + $0x58] sm:$0xff] %v1367_v0 }
  0x18   : > { %302 = vst [vmem:[#allocation2 + $0x40] sm:$0xff] %v1367_v0  ;;  %303 = vst [vmem:[#allocation2 + $0xc8] sm:$0xff] %v1367_v0 }
  0x19   : > { %304 = vst [vmem:[#allocation2 + $0xe0] sm:$0xff] %v1367_v0  ;;  %305 = vst [vmem:[#allocation2 + $0x90] sm:$0xff] %v1367_v0 }
  0x1a   : > { %306 = vst [vmem:[#allocation2 + $0x70] sm:$0xff] %v1367_v0  ;;  %307 = vst [vmem:[#allocation2 + $0xc0] sm:$0xff] %v1367_v0  ;;  %320 = sbr.rel (!%p316_p4) target bundleno = 32 (0x20), region = 36 }
  0x1b   : > { %308 = vst [vmem:[#allocation2 + $0xa8] sm:$0xff] %v1367_v0  ;;  %309 = vst [vmem:[#allocation2 + $0xd0] sm:$0xff] %v1367_v0 }
  0x1c   : > { %310 = vst [vmem:[#allocation2 + $0x10] sm:$0xff] %v1367_v0  ;;  %311 = vst [vmem:[#allocation2 + $0x28] sm:$0xff] %v1367_v0 }
  0x1d   : > { %312 = vst [vmem:[#allocation2 + $0xa0] sm:$0xff] %v1367_v0  ;;  %313 = vst [vmem:[#allocation2 + $0xf8] sm:$0xff] %v1367_v0 }
  0x1e   : > { %314 = vst [vmem:[#allocation2 + $0x20] sm:$0xff] %v1367_v0  ;;  %315 = vst [vmem:[#allocation2 + $0x98] sm:$0xff] %v1367_v0 }
  0x1f   : > { %321 = vst [vmem:[#allocation3] sm:$0x1] %v1368_v1  ;;  %322 = vst [vmem:[#allocation5] sm:$0x1] %v1368_v1 }
  0x20 PF: > { %v1267_v2 = vld [vmem:[%s1660_s1 + $0x18] sm:$0xff]   ;;  %v1268_v3 = vld [vmem:[%s1660_s1 + $0x10] sm:$0xff]   ;;  %v1269_v4 = vld [vmem:[%s1660_s1 + $0x8] sm:$0xff]   ;;  %vm499_vm0 = vcmask 523264   ;;  %s1369_s12 = smov [#allocation3]   ;;  %p1624_p6 = scmp.eq.s32.totalorder %s1105_s18, 1 }
  0x21   : > { %1179 = vmatprep.subr.bf16.mxu0 %v1267_v2  ;;  %1219 = vmatprep.subr.bf16.mxu1 %v1267_v2  ;;  %v1271_v5 = vld [vmem:[%s1432_s26] sm:$0xff]   ;;  %v1272_v7 = vld [vmem:[%s1432_s26 + $0x8] sm:$0xff]   ;;  %v1273_v9 = vld [vmem:[%s1432_s26 + $0x10] sm:$0xff]   ;;  %s973_s13 = sshll.u32 %s1369_s12, 4  ;;  %s1370_s15 = smov [#allocation5]   ;;  %s974_s13 = int_to_ptr.vmem [resolvable:$true] %s973_s13 }
  0x22   : > { %1180 = vmatpush3.bf16.msra.mxu0 %v1267_v2  ;;  %1223 = vmatpush3.bf16.msra.mxu1 %v1267_v2  ;;  %v1270_v6 = vld [vmem:[%s1660_s1] sm:$0xff]   ;;  %v1280_v10 = vld [vmem:[%s1432_s26 + $0x48] sm:$0xff]   ;;  %v1281_v11 = vld [vmem:[%s1432_s26 + $0x50] sm:$0xff]   ;;  %s986_s20 = sshll.u32 %s1370_s15, 4  ;;  %s1287_s21 = scalar_lea.vmem %s974_s13, 16  ;;  %s987_s20 = int_to_ptr.vmem [resolvable:$true] %s986_s20 }
  0x23   : > { %1181 = vmatprep.subr.bf16.mxu0 %v1268_v3  ;;  %1220 = vmatprep.subr.bf16.mxu1 %v1268_v3  ;;  %v1279_v8 = vld [vmem:[%s1432_s26 + $0x40] sm:$0xff]   ;;  %v1274_v12 = vld [vmem:[%s1432_s26 + $0x18] sm:$0xff]   ;;  %v1276_v16 = vld [vmem:[%s1432_s26 + $0x28] sm:$0xff]   ;;  %p1288_p7 = scmp.ne.s32.totalorder %s974_s13, %s1287_s21  ;;  %s1293_s22 = scalar_lea.vmem %s974_s13, 32 }
  0x24   : > { %1187 = vmatprep.mubr.msk.bf16.mxu0 %vm499_vm0, %v1271_v5  ;;  %1203 = vmatprep.mubr.msk.bf16.mxu1 %vm499_vm0, %v1279_v8  ;;  %v1282_v13 = vld [vmem:[%s1432_s26 + $0x58] sm:$0xff]   ;;  %v1275_v14 = vld [vmem:[%s1432_s26 + $0x20] sm:$0xff]   ;;  %v1284_v17 = vld [vmem:[%s1432_s26 + $0x68] sm:$0xff]   ;;  %p1294_p10 = scmp.lt.s32.totalorder %s974_s13, %s974_s13  ;;  %p1295_p11 = scmp.lt.s32.totalorder %s1293_s22, %s1287_s21 }
  0x25   : > { %v1283_v15 = vld [vmem:[%s1432_s26 + $0x60] sm:$0xff]   ;;  %v1277_v18 = vld [vmem:[%s1432_s26 + $0x30] sm:$0xff]   ;;  %v1278_v20 = vld [vmem:[%s1432_s26 + $0x38] sm:$0xff]   ;;  %p1289_p8 = pnand %p1288_p7, %p1624_p6 }
  0x26   : > { %1182 = vmatpush3.bf16.msra.mxu0 %v1268_v3  ;;  %1224 = vmatpush3.bf16.msra.mxu1 %v1268_v3  ;;  %v1285_v19 = vld [vmem:[%s1432_s26 + $0x70] sm:$0xff]   ;;  %v1286_v21 = vld [vmem:[%s1432_s26 + $0x78] sm:$0xff]   ;;  %v341_v23 = vld [vmem:[#allocation2 + $0x40] sm:$0xff]  ;;  %p1296_p12 = por %p1295_p11, %p1294_p10 }
  0x27   : > { %1183 = vmatprep.subr.bf16.mxu0 %v1269_v4  ;;  %1221 = vmatprep.subr.bf16.mxu1 %v1269_v4  ;;  %v325_v22 = vld [vmem:[#allocation2 + $0xd8] sm:$0xff]  ;;  %v323_v25 = vld [vmem:[#allocation2 + $0xb0] sm:$0xff]  ;;  %v342_v33 = vld [vmem:[#allocation2 + $0xc8] sm:$0xff]  ;;  %p1290_p9 = pneg %p1289_p8 }
  0x28   : > { %v339_v27 = vld [vmem:[#allocation2 + $0x38] sm:$0xff]  ;;  %v324_v37 = vld [vmem:[#allocation2] sm:$0xff]  ;;  %v329_v43 = vld [vmem:[#allocation2 + $0x30] sm:$0xff] }
  0x29   : > { %v326_v31 = vld [vmem:[#allocation2 + $0x18] sm:$0xff]  ;;  %v345_v47 = vld [vmem:[#allocation2 + $0x70] sm:$0xff]  ;;  %v343_v55 = vld [vmem:[#allocation2 + $0xe0] sm:$0xff]  ;;  %p1297_p13 = pnand %p1296_p12, %p1290_p9 }
  0x2a   : > { %1184 = vmatpush3.bf16.msra.mxu0 %v1269_v4  ;;  %1225 = vmatpush3.bf16.msra.mxu1 %v1269_v4  ;;  %v340_v39 = vld [vmem:[#allocation2 + $0x58] sm:$0xff]  ;;  %v327_v49 = vld [vmem:[#allocation2 + $0x50] sm:$0xff]  ;;  %v330_v57 = vld [vmem:[#allocation2 + $0x48] sm:$0xff] }
  0x2b   : > { %1185 = vmatprep.subr.bf16.mxu0 %v1270_v6  ;;  %1222 = vmatprep.subr.bf16.mxu1 %v1270_v6  ;;  %v346_v0 = vld [vmem:[#allocation2 + $0xc0] sm:$0xff]  ;;  %v328_v2 = vld [vmem:[#allocation2 + $0x68] sm:$0xff] }
  0x2e   : > { %1186 = vmatpush3.bf16.msra.mxu0 %v1270_v6  ;;  %1226 = vmatpush3.bf16.msra.mxu1 %v1270_v6 }
  0x31   : > { %1188 = vmatmul.mubr.msk.bf16.vlgmr.msra.gmra.mxu0 %vm499_vm0, %v1272_v7  ;;  %1204 = vmatmul.mubr.msk.bf16.vlgmr.msra.gmra.mxu1 %vm499_vm0, %v1280_v10 }
  0x32   : > { %1191 = vmatprep.mubr.msk.bf16.mxu0 %vm499_vm0, %v1273_v9  ;;  %1207 = vmatprep.mubr.msk.bf16.mxu1 %vm499_vm0, %v1281_v11  ;;  %v344_v9 = vld [vmem:[#allocation2 + $0x90] sm:$0xff]  ;;  %v333_v11 = vld [vmem:[#allocation2 + $0xe8] sm:$0xff] }
  0x39   : > { %1192 = vmatmul.mubr.msk.bf16.gmra.mxu0 %vm499_vm0, %v1274_v12  ;;  %1208 = vmatmul.mubr.msk.bf16.gmra.mxu1 %vm499_vm0, %v1282_v13 }
  0x3a   : > { %1195 = vmatprep.mubr.msk.bf16.mxu0 %vm499_vm0, %v1275_v14  ;;  %1211 = vmatprep.mubr.msk.bf16.mxu1 %vm499_vm0, %v1283_v15 }
  0x41   : > { %1196 = vmatmul.mubr.msk.bf16.gmra.mxu0 %vm499_vm0, %v1276_v16  ;;  %1212 = vmatmul.mubr.msk.bf16.gmra.mxu1 %vm499_vm0, %v1284_v17 }
  0x42   : > { %1199 = vmatprep.mubr.msk.bf16.mxu0 %vm499_vm0, %v1277_v18  ;;  %1215 = vmatprep.mubr.msk.bf16.mxu1 %vm499_vm0, %v1285_v19  ;;  %v349_v18 = vld [vmem:[#allocation2 + $0x10] sm:$0xff] }
  0x49   : > { %1200 = vmatmul.mubr.msk.bf16.gmra.mxu0 %vm499_vm0, %v1278_v20  ;;  %1216 = vmatmul.mubr.msk.bf16.gmra.mxu1 %vm499_vm0, %v1286_v21  ;;  %v331_v20 = vld [vmem:[#allocation2 + $0x80] sm:$0xff] }
  0xf1   : > { %v1189_v24 = vpop.f32.mrf.mxu0  ;;  %v1205_v26 = vpop.f32.mrf.mxu1 }
  0xf2   : > { %v711_v28 = vadd.f32 %v1189_v24, %v325_v22  ;;  %v1485_v29 = vadd.f32 %v1205_v26, %v341_v23 }
  0xf3   : > { %v582_v30 = vpop.f32.mrf.mxu0  ;;  %v646_v32 = vpop.f32.mrf.mxu1 }
  0xf4   : > { %743 = vst [vmem:[#allocation2 + $0xd8] sm:$0xff] %v711_v28  ;;  %810 = vst [vmem:[%s1437_s29 + $0x10] sm:$0xff] %v711_v28  ;;  %v709_v34 = vadd.f32 %v582_v30, %v323_v25  ;;  %v1491_v35 = vadd.f32 %v646_v32, %v339_v27  ;;  %v883_v60 = vmul.f32 %v711_v28, %v711_v28  ;;  %v347_v27 = vld [vmem:[#allocation2 + $0xa8] sm:$0xff]  ;;  %v334_v30 = vld [vmem:[#allocation2 + $0xb8] sm:$0xff] }
  0xf5   : > { %759 = vst [vmem:[#allocation2 + $0x40] sm:$0xff] %v1485_v29  ;;  %826 = vst [vmem:[%s1437_s29 + $0x90] sm:$0xff] %v1485_v29  ;;  %v1190_v36 = vpop.f32.mrf.mxu0  ;;  %v1206_v38 = vpop.f32.mrf.mxu1 }
  0xf6   : > { %741 = vst [vmem:[#allocation2 + $0xb0] sm:$0xff] %v709_v34  ;;  %808 = vst [vmem:[%s1437_s29] sm:$0xff] %v709_v34  ;;  %v712_v40 = vadd.f32 %v1190_v36, %v326_v31  ;;  %v1497_v41 = vadd.f32 %v1206_v38, %v342_v33  ;;  %v881_v51 = vmul.f32 %v709_v34, %v709_v34  ;;  %v350_v38 = vld [vmem:[#allocation2 + $0x28] sm:$0xff] }
  0xf7   : > { %757 = vst [vmem:[#allocation2 + $0x38] sm:$0xff] %v1491_v35  ;;  %824 = vst [vmem:[%s1437_s29 + $0x80] sm:$0xff] %v1491_v35  ;;  %v585_v42 = vpop.f32.mrf.mxu0  ;;  %v649_v44 = vpop.f32.mrf.mxu1 }
  0xf8   : > { %744 = vst [vmem:[#allocation2 + $0x18] sm:$0xff] %v712_v40  ;;  %811 = vst [vmem:[%s1437_s29 + $0x18] sm:$0xff] %v712_v40  ;;  %v710_v45 = vadd.f32 %v585_v42, %v324_v37  ;;  %v1503_v46 = vadd.f32 %v649_v44, %v340_v39  ;;  %v884_v5 = vmul.f32 %v712_v40, %v712_v40 }
  0xf9   : > { %760 = vst [vmem:[#allocation2 + $0xc8] sm:$0xff] %v1497_v41  ;;  %827 = vst [vmem:[%s1437_s29 + $0x98] sm:$0xff] %v1497_v41  ;;  %v1193_v48 = vpop.f32.mrf.mxu0  ;;  %v1209_v50 = vpop.f32.mrf.mxu1 }
  0xfa   : > { %742 = vst [vmem:[#allocation2] sm:$0xff] %v710_v45  ;;  %809 = vst [vmem:[%s1437_s29 + $0x8] sm:$0xff] %v710_v45  ;;  %v841_v52 = vadd.f32 %v710_v45, %v709_v34  ;;  %v882_v53 = vmul.f32 %v710_v45, %v710_v45  ;;  %v715_v54 = vadd.f32 %v1193_v48, %v329_v43 }
  0xfb   : > { %758 = vst [vmem:[#allocation2 + $0x58] sm:$0xff] %v1503_v46  ;;  %825 = vst [vmem:[%s1437_s29 + $0x88] sm:$0xff] %v1503_v46  ;;  %v598_v56 = vpop.f32.mrf.mxu0  ;;  %v1509_v58 = vadd.f32 %v1209_v50, %v345_v47  ;;  %v662_v59 = vpop.f32.mrf.mxu1 }
  0xfc   : > { %v842_v61 = vadd.f32 %v841_v52, %v711_v28  ;;  %v913_v62 = vadd.f32 %v882_v53, %v881_v51  ;;  %747 = vst [vmem:[#allocation2 + $0x30] sm:$0xff] %v715_v54  ;;  %814 = vst [vmem:[%s1437_s29 + $0x30] sm:$0xff] %v715_v54  ;;  %v713_v63 = vadd.f32 %v598_v56, %v327_v49  ;;  %v348_v49 = vld [vmem:[#allocation2 + $0xd0] sm:$0xff]  ;;  %v337_v51 = vld [vmem:[#allocation2 + $0x8] sm:$0xff] }
  0xfd   : > { %v1194_v1 = vpop.f32.mrf.mxu0  ;;  %763 = vst [vmem:[#allocation2 + $0x70] sm:$0xff] %v1509_v58  ;;  %v1513_v3 = vadd.f32 %v662_v59, %v343_v55  ;;  %v1210_v4 = vpop.f32.mrf.mxu1  ;;  %830 = vst [vmem:[%s1437_s29 + $0xb0] sm:$0xff] %v1509_v58  ;;  %v887_v33 = vmul.f32 %v715_v54, %v715_v54  ;;  %v353_v59 = vld [vmem:[#allocation2 + $0x20] sm:$0xff] }
  0xfe   : > { %v914_v6 = vadd.f32 %v913_v62, %v883_v60  ;;  %745 = vst [vmem:[#allocation2 + $0x50] sm:$0xff] %v713_v63  ;;  %812 = vst [vmem:[%s1437_s29 + $0x20] sm:$0xff] %v713_v63  ;;  %v843_v7 = vadd.f32 %v842_v61, %v712_v40  ;;  %v716_v8 = vadd.f32 %v1194_v1, %v330_v57  ;;  %v332_v40 = vld [vmem:[#allocation2 + $0x88] sm:$0xff]  ;;  %v335_v61 = vld [vmem:[#allocation2 + $0x60] sm:$0xff] }
  0xff   : > { %v601_v10 = vpop.f32.mrf.mxu0  ;;  %761 = vst [vmem:[#allocation2 + $0xe0] sm:$0xff] %v1513_v3  ;;  %828 = vst [vmem:[%s1437_s29 + $0xa0] sm:$0xff] %v1513_v3  ;;  %v1521_v12 = vadd.f32 %v1210_v4, %v346_v0  ;;  %v665_v13 = vpop.f32.mrf.mxu1  ;;  %v885_v15 = vmul.f32 %v713_v63, %v713_v63 }
 0x100   : > { %v844_v14 = vadd.f32 %v843_v7, %v713_v63  ;;  %v915_v16 = vadd.f32 %v914_v6, %v884_v5  ;;  %748 = vst [vmem:[#allocation2 + $0x48] sm:$0xff] %v716_v8  ;;  %815 = vst [vmem:[%s1437_s29 + $0x38] sm:$0xff] %v716_v8  ;;  %v714_v17 = vadd.f32 %v601_v10, %v328_v2  ;;  %v351_v5 = vld [vmem:[#allocation2 + $0xa0] sm:$0xff]  ;;  %v338_v7 = vld [vmem:[#allocation2 + $0x78] sm:$0xff] }
 0x101   : > { %v1197_v19 = vpop.f32.mrf.mxu0  ;;  %764 = vst [vmem:[#allocation2 + $0xc0] sm:$0xff] %v1521_v12  ;;  %v1525_v21 = vadd.f32 %v665_v13, %v344_v9  ;;  %v1213_v22 = vpop.f32.mrf.mxu1  ;;  %831 = vst [vmem:[%s1437_s29 + $0xb8] sm:$0xff] %v1521_v12  ;;  %v888_v44 = vmul.f32 %v716_v8, %v716_v8 }
 0x102   : > { %v916_v23 = vadd.f32 %v915_v16, %v885_v15  ;;  %746 = vst [vmem:[#allocation2 + $0x68] sm:$0xff] %v714_v17  ;;  %813 = vst [vmem:[%s1437_s29 + $0x28] sm:$0xff] %v714_v17  ;;  %v845_v24 = vadd.f32 %v844_v14, %v714_v17  ;;  %v886_v25 = vmul.f32 %v714_v17, %v714_v17  ;;  %v354_v15 = vld [vmem:[#allocation2 + $0x98] sm:$0xff]  ;;  %v336_v17 = vld [vmem:[#allocation2 + $0xf0] sm:$0xff] }
 0x103   : > { %v719_v26 = vadd.f32 %v1197_v19, %v333_v11  ;;  %v614_v28 = vpop.f32.mrf.mxu0  ;;  %762 = vst [vmem:[#allocation2 + $0x90] sm:$0xff] %v1525_v21  ;;  %v1531_v31 = vadd.f32 %v1213_v22, %v349_v18  ;;  %v678_v32 = vpop.f32.mrf.mxu1  ;;  %829 = vst [vmem:[%s1437_s29 + $0xa8] sm:$0xff] %v1525_v21 }
 0x104   : > { %v846_v34 = vadd.f32 %v845_v24, %v715_v54  ;;  %v917_v36 = vadd.f32 %v916_v23, %v886_v25  ;;  %v717_v37 = vadd.f32 %v614_v28, %v331_v20  ;;  %v1537_v42 = vadd.f32 %v678_v32, %v347_v27  ;;  %v352_v25 = vld [vmem:[#allocation2 + $0xf8] sm:$0xff] }
 0x105   : > { %751 = vst [vmem:[#allocation2 + $0xe8] sm:$0xff] %v719_v26  ;;  %818 = vst [vmem:[%s1437_s29 + $0x50] sm:$0xff] %v719_v26  ;;  %v1198_v39 = vpop.f32.mrf.mxu0  ;;  %v1214_v43 = vpop.f32.mrf.mxu1  ;;  %v891_v10 = vmul.f32 %v719_v26, %v719_v26 }
 0x106   : > { %767 = vst [vmem:[#allocation2 + $0x10] sm:$0xff] %v1531_v31  ;;  %834 = vst [vmem:[%s1437_s29 + $0xd0] sm:$0xff] %v1531_v31  ;;  %v918_v45 = vadd.f32 %v917_v36, %v887_v33  ;;  %v847_v47 = vadd.f32 %v846_v34, %v716_v8  ;;  %v720_v48 = vadd.f32 %v1198_v39, %v334_v30 }
 0x107   : > { %749 = vst [vmem:[#allocation2 + $0x80] sm:$0xff] %v717_v37  ;;  %816 = vst [vmem:[%s1437_s29 + $0x40] sm:$0xff] %v717_v37  ;;  %v617_v50 = vpop.f32.mrf.mxu0  ;;  %v1543_v52 = vadd.f32 %v1214_v43, %v350_v38  ;;  %v681_v53 = vpop.f32.mrf.mxu1  ;;  %v889_v55 = vmul.f32 %v717_v37, %v717_v37 }
 0x108   : > { %765 = vst [vmem:[#allocation2 + $0xa8] sm:$0xff] %v1537_v42  ;;  %832 = vst [vmem:[%s1437_s29 + $0xc0] sm:$0xff] %v1537_v42  ;;  %v848_v54 = vadd.f32 %v847_v47, %v717_v37  ;;  %v919_v56 = vadd.f32 %v918_v45, %v888_v44  ;;  %v718_v57 = vadd.f32 %v617_v50, %v332_v40 }
 0x109   : > { %752 = vst [vmem:[#allocation2 + $0xb8] sm:$0xff] %v720_v48  ;;  %819 = vst [vmem:[%s1437_s29 + $0x58] sm:$0xff] %v720_v48  ;;  %v1201_v60 = vpop.f32.mrf.mxu0  ;;  %v1549_v62 = vadd.f32 %v681_v53, %v348_v49  ;;  %v1217_v63 = vpop.f32.mrf.mxu1  ;;  %v892_v20 = vmul.f32 %v720_v48, %v720_v48  ;;  %v897_v49 = vmul.f32 %v1491_v35, %v1491_v35 }
 0x10a   : > { %768 = vst [vmem:[#allocation2 + $0x28] sm:$0xff] %v1543_v52  ;;  %835 = vst [vmem:[%s1437_s29 + $0xd8] sm:$0xff] %v1543_v52  ;;  %v920_v0 = vadd.f32 %v919_v56, %v889_v55  ;;  %v849_v1 = vadd.f32 %v848_v54, %v718_v57  ;;  %v890_v2 = vmul.f32 %v718_v57, %v718_v57 }
 0x10b   : > { %750 = vst [vmem:[#allocation2 + $0x88] sm:$0xff] %v718_v57  ;;  %817 = vst [vmem:[%s1437_s29 + $0x48] sm:$0xff] %v718_v57  ;;  %v723_v4 = vadd.f32 %v1201_v60, %v337_v51  ;;  %v630_v6 = vpop.f32.mrf.mxu0  ;;  %v1555_v8 = vadd.f32 %v1217_v63, %v353_v59  ;;  %v694_v9 = vpop.f32.mrf.mxu1  ;;  %v898_v54 = vmul.f32 %v1503_v46, %v1503_v46 }
 0x10c   : > { %766 = vst [vmem:[#allocation2 + $0xd0] sm:$0xff] %v1549_v62  ;;  %833 = vst [vmem:[%s1437_s29 + $0xc8] sm:$0xff] %v1549_v62  ;;  %v850_v11 = vadd.f32 %v849_v1, %v719_v26  ;;  %v921_v13 = vadd.f32 %v920_v0, %v890_v2  ;;  %v721_v14 = vadd.f32 %v630_v6, %v335_v61 }
 0x10d   : > { %755 = vst [vmem:[#allocation2 + $0x8] sm:$0xff] %v723_v4  ;;  %822 = vst [vmem:[%s1437_s29 + $0x70] sm:$0xff] %v723_v4  ;;  %v1202_v16 = vpop.f32.mrf.mxu0  ;;  %v1561_v18 = vadd.f32 %v694_v9, %v351_v5  ;;  %v1218_v19 = vpop.f32.mrf.mxu1  ;;  %v895_v40 = vmul.f32 %v723_v4, %v723_v4  ;;  %v899_v56 = vmul.f32 %v1485_v29, %v1485_v29 }
 0x10e   : > { %771 = vst [vmem:[#allocation2 + $0x20] sm:$0xff] %v1555_v8  ;;  %838 = vst [vmem:[%s1437_s29 + $0xf0] sm:$0xff] %v1555_v8  ;;  %v922_v22 = vadd.f32 %v921_v13, %v891_v10  ;;  %v851_v23 = vadd.f32 %v850_v11, %v720_v48  ;;  %v724_v24 = vadd.f32 %v1202_v16, %v338_v7 }
 0x10f   : > { %753 = vst [vmem:[#allocation2 + $0x60] sm:$0xff] %v721_v14  ;;  %820 = vst [vmem:[%s1437_s29 + $0x60] sm:$0xff] %v721_v14  ;;  %v633_v26 = vpop.f32.mrf.mxu0  ;;  %v1567_v27 = vadd.f32 %v1218_v19, %v354_v15  ;;  %v697_v28 = vpop.f32.mrf.mxu1  ;;  %v893_v32 = vmul.f32 %v721_v14, %v721_v14  ;;  %v900_v60 = vmul.f32 %v1497_v41, %v1497_v41 }
 0x110   : > { %769 = vst [vmem:[#allocation2 + $0xa0] sm:$0xff] %v1561_v18  ;;  %836 = vst [vmem:[%s1437_s29 + $0xe0] sm:$0xff] %v1561_v18  ;;  %v852_v30 = vadd.f32 %v851_v23, %v721_v14  ;;  %v923_v33 = vadd.f32 %v922_v22, %v892_v20  ;;  %v722_v34 = vadd.f32 %v633_v26, %v336_v17 }
 0x111   : > { %756 = vst [vmem:[#allocation2 + $0x78] sm:$0xff] %v724_v24  ;;  %823 = vst [vmem:[%s1437_s29 + $0x78] sm:$0xff] %v724_v24  ;;  %v738_v36 = vadd.f32 %v697_v28, %v352_v25  ;;  %v896_v45 = vmul.f32 %v724_v24, %v724_v24  ;;  %v901_v0 = vmul.f32 %v1513_v3, %v1513_v3 }
 0x112   : > { %772 = vst [vmem:[#allocation2 + $0x98] sm:$0xff] %v1567_v27  ;;  %839 = vst [vmem:[%s1437_s29 + $0xf8] sm:$0xff] %v1567_v27  ;;  %v924_v37 = vadd.f32 %v923_v33, %v893_v32  ;;  %v853_v38 = vadd.f32 %v852_v30, %v722_v34  ;;  %v894_v39 = vmul.f32 %v722_v34, %v722_v34 }
 0x113   : > { %754 = vst [vmem:[#allocation2 + $0xf0] sm:$0xff] %v722_v34  ;;  %821 = vst [vmem:[%s1437_s29 + $0x68] sm:$0xff] %v722_v34  ;;  %v902_v2 = vmul.f32 %v1525_v21, %v1525_v21  ;;  %v903_v5 = vmul.f32 %v1509_v58, %v1509_v58  ;;  %v904_v7 = vmul.f32 %v1521_v12, %v1521_v12 }
 0x114   : > { %770 = vst [vmem:[#allocation2 + $0xf8] sm:$0xff] %v738_v36  ;;  %837 = vst [vmem:[%s1437_s29 + $0xe8] sm:$0xff] %v738_v36  ;;  %v854_v43 = vadd.f32 %v853_v38, %v723_v4  ;;  %v925_v44 = vadd.f32 %v924_v37, %v894_v39  ;;  %v905_v10 = vmul.f32 %v1537_v42, %v1537_v42 }
 0x115   : > { %v906_v13 = vmul.f32 %v1549_v62, %v1549_v62  ;;  %v907_v15 = vmul.f32 %v1531_v31, %v1531_v31  ;;  %v908_v17 = vmul.f32 %v1543_v52, %v1543_v52  ;;  %v909_v20 = vmul.f32 %v1561_v18, %v1561_v18 }
 0x116   : > { %v926_v47 = vadd.f32 %v925_v44, %v895_v40  ;;  %v855_v48 = vadd.f32 %v854_v43, %v724_v24  ;;  %v910_v23 = vmul.f32 %v738_v36, %v738_v36  ;;  %v840_v44 = vld [vmem:[#allocation3] sm:$0x1] }
 0x118   : > { %v856_v50 = vadd.f32 %v855_v48, %v1491_v35  ;;  %v927_v51 = vadd.f32 %v926_v47, %v896_v45 }
 0x11a   : > { %v857_v53 = vadd.f32 %v856_v50, %v1503_v46  ;;  %v928_v55 = vadd.f32 %v927_v51, %v897_v49 }
 0x11c   : > { %v929_v57 = vadd.f32 %v928_v55, %v898_v54  ;;  %v858_v59 = vadd.f32 %v857_v53, %v1485_v29 }
 0x11e   : > { %v859_v61 = vadd.f32 %v858_v59, %v1497_v41  ;;  %v930_v63 = vadd.f32 %v929_v57, %v899_v56 }
 0x120   : > { %v860_v35 = vadd.f32 %v859_v61, %v1513_v3  ;;  %v931_v1 = vadd.f32 %v930_v63, %v900_v60 }
 0x122   : > { %v861_v46 = vadd.f32 %v860_v35, %v1525_v21  ;;  %v932_v4 = vadd.f32 %v931_v1, %v901_v0 }
 0x124   : > { %v862_v29 = vadd.f32 %v861_v46, %v1509_v58  ;;  %v933_v6 = vadd.f32 %v932_v4, %v902_v2 }
 0x126   : > { %v863_v41 = vadd.f32 %v862_v29, %v1521_v12  ;;  %v934_v9 = vadd.f32 %v933_v6, %v903_v5 }
 0x128   : > { %v864_v3 = vadd.f32 %v863_v41, %v1537_v42  ;;  %v935_v11 = vadd.f32 %v934_v9, %v904_v7 }
 0x12a   : > { %v865_v21 = vadd.f32 %v864_v3, %v1549_v62  ;;  %v936_v14 = vadd.f32 %v935_v11, %v905_v10 }
 0x12c   : > { %v866_v58 = vadd.f32 %v865_v21, %v1531_v31  ;;  %v937_v16 = vadd.f32 %v936_v14, %v906_v13  ;;  %v911_v31 = vmul.f32 %v1555_v8, %v1555_v8 }
 0x12e   : > { %v867_v12 = vadd.f32 %v866_v58, %v1543_v52  ;;  %v938_v19 = vadd.f32 %v937_v16, %v907_v15  ;;  %v912_v52 = vmul.f32 %v1567_v27, %v1567_v27 }
 0x130   : > { %v868_v42 = vadd.f32 %v867_v12, %v1561_v18  ;;  %v939_v22 = vadd.f32 %v938_v19, %v908_v17 }
 0x132   : > { %v869_v62 = vadd.f32 %v868_v42, %v738_v36  ;;  %v940_v24 = vadd.f32 %v939_v22, %v909_v20 }
 0x134   : > { %v870_v25 = vadd.f32 %v869_v62, %v1555_v8  ;;  %v941_v26 = vadd.f32 %v940_v24, %v910_v23 }
 0x136   : > { %v871_v28 = vadd.f32 %v870_v25, %v1567_v27  ;;  %v942_v30 = vadd.f32 %v941_v26, %v911_v31  ;;  %v880_v27 = vld [vmem:[#allocation5] sm:$0x1] }
 0x138   : > { %v872_v32 = vrot.slane %v871_v28, 4  ;;  %v943_v33 = vadd.f32 %v942_v30, %v912_v52 }
 0x13a   : > { %v873_v18 = vadd.f32 %v872_v32, %v871_v28  ;;  %v944_v34 = vrot.slane %v943_v33, 4 }
 0x13c   : > { %v874_v37 = vrot.slane %v873_v18, 2  ;;  %v945_v36 = vadd.f32 %v944_v34, %v943_v33 }
 0x13e   : > { %v875_v38 = vadd.f32 %v874_v37, %v873_v18  ;;  %v946_v39 = vrot.slane %v945_v36, 2 }
 0x140   : > { %v876_v40 = vrot.slane %v875_v38, 1  ;;  %v947_v43 = vadd.f32 %v946_v39, %v945_v36 }
 0x142   : > { %v877_v8 = vadd.f32 %v876_v40, %v875_v38  ;;  %v948_v45 = vrot.slane %v947_v43, 1 }
 0x144   : > { %v878_v47 = vadd.f32 %v877_v8, %v840_v44  ;;  %v949_v48 = vadd.f32 %v948_v45, %v947_v43 }
 0x146   : > { %879 = vst [vmem:[#allocation3] sm:$0x1] %v878_v47  ;;  %v950_v49 = vadd.f32 %v949_v48, %v880_v27 }
 0x147   : > { %1300 = shalt.err (!%p1297_p13)
}
 0x148   : > { %1228 = dma.vmem_to_hbm [thread:$0]  (%p1624_p6), %s974_s13, 16, %s1662_s3, [#allocation4]   ;;  %951 = vst [vmem:[#allocation5] sm:$0x1] %v950_v49 }
 0x149   : > { %s1311_s24 = scalar_lea.vmem %s987_s20, 16  ;;  %s1317_s25 = scalar_lea.vmem %s987_s20, 32 }
 0x14a   : > { %p1312_p0 = scmp.ne.s32.totalorder %s987_s20, %s1311_s24  ;;  %p1318_p3 = scmp.lt.s32.totalorder %s987_s20, %s987_s20 }
 0x14b   : > { %p1319_p4 = scmp.lt.s32.totalorder %s1317_s25, %s1311_s24 }
 0x14c   : > { %p1313_p1 = pnand %p1312_p0, %p1624_p6 }
 0x14d   : > { %p1320_p5 = por %p1319_p4, %p1318_p3 }
 0x14e   : > { %p1314_p2 = pneg %p1313_p1 }
 0x150   : > { %p1321_p7 = pnand %p1320_p5, %p1314_p2 }
 0x152   : > { %1324 = shalt.err (!%p1321_p7)
}
 0x153   : > { %1230 = dma.vmem_to_hbm [thread:$0]  (%p1624_p6), %s987_s20, 16, %s1663_s4, [#allocation6]  }
 0x154   : > { %1348 = dma.done.wait (%p1624_p6), [#allocation4], 16  }
 0x155   : > { %1350 = vsyncadd (%p1624_p6), [#allocation4], 4294967280 }
 0x156   : > { %1352 = dma.done.wait (%p1624_p6), [#allocation6], 16  }
 0x157   : > { %1354 = vsyncadd (%p1624_p6), [#allocation6], 4294967280 }
 0x158 PF: > { %s17_s17 = sadd.s32 1, %s1365_s17   ;;  %s1666_s15 = smov %s1361_s16 }
 0x159   : > { %p14_p8 = scmp.ge.s32.totalorder %s17_s17, 4   ;;  %s1667_s16 = smov %s1669_s19 }
 0x15b   :  { %16 = sbr.rel (!%p14_p8) target bundleno = 3 (0x3), region = 92 }
 0x160   :  { %1014 = vsyncpa [#allocation4], 1 }
 0x161   :  { %1016 = vsyncpa [#allocation4 + $0x1], 1 }
 0x162   :  { %1017 = vsyncpa [#allocation6], 1 }

// kernel: _lambda_.56
= control target key start
LH: loop header
LB: loop body
LE: loop exit
PB: predicated region body
PF: predicated region fallthrough
CT: control target
= control target key end

     0   :  { %s1024_s0 = inlined_call_operand.vmem [shape: f32[512,128], index: 0, kind: input, shape index: {}]   ;;  %s1025_s1 = inlined_call_operand.vmem [shape: f32[1,128], index: 1, kind: input, shape index: {}]   ;;  %s1026_s2 = inlined_call_operand.vmem [shape: f32[1,128], index: 2, kind: input, shape index: {}]   ;;  %s1027_s3 = inlined_call_operand.vmem [shape: f32[512,128], index: 3, kind: output, shape index: {}]  }
   0x1   :  { %v14_v0 = vld [vmem:[%s1024_s0] sm:$0xff]  ;;  %v15_v4 = vld [vmem:[%s1024_s0 + $0x8] sm:$0xff]  ;;  %v16_v5 = vld [vmem:[%s1024_s0 + $0x10] sm:$0xff] }
   0x2   :  { %v508_v1 = vld [vmem:[%s1025_s1] ss:$0 sm:$0xff]  ;;  %v17_v6 = vld [vmem:[%s1024_s0 + $0x18] sm:$0xff]  ;;  %v19_v11 = vld [vmem:[%s1024_s0 + $0x28] sm:$0xff] }
   0x3   :  { %v513_v2 = vld [vmem:[%s1026_s2] ss:$0 sm:$0xff]  ;;  %v85_v3 = vmul.f32 %v508_v1, %v14_v0  ;;  %v86_v7 = vmul.f32 %v508_v1, %v15_v4  ;;  %v87_v8 = vmul.f32 %v508_v1, %v16_v5  ;;  %v88_v9 = vmul.f32 %v508_v1, %v17_v6  ;;  %v20_v12 = vld [vmem:[%s1024_s0 + $0x30] sm:$0xff]  ;;  %v21_v17 = vld [vmem:[%s1024_s0 + $0x38] sm:$0xff] }
   0x4   :  { %v18_v10 = vld [vmem:[%s1024_s0 + $0x20] sm:$0xff]  ;;  %v90_v15 = vmul.f32 %v508_v1, %v19_v11  ;;  %v91_v16 = vmul.f32 %v508_v1, %v20_v12  ;;  %v23_v19 = vld [vmem:[%s1024_s0 + $0x48] sm:$0xff]  ;;  %v92_v23 = vmul.f32 %v508_v1, %v21_v17  ;;  %v24_v24 = vld [vmem:[%s1024_s0 + $0x50] sm:$0xff] }
   0x5   :  { %v156_v13 = vadd.f32 %v513_v2, %v85_v3  ;;  %v89_v14 = vmul.f32 %v508_v1, %v18_v10  ;;  %v22_v18 = vld [vmem:[%s1024_s0 + $0x40] sm:$0xff]  ;;  %v157_v20 = vadd.f32 %v513_v2, %v86_v7  ;;  %v158_v21 = vadd.f32 %v513_v2, %v87_v8  ;;  %v25_v26 = vld [vmem:[%s1024_s0 + $0x58] sm:$0xff]  ;;  %v27_v33 = vld [vmem:[%s1024_s0 + $0x68] sm:$0xff] }
   0x6   :  { %v159_v22 = vadd.f32 %v513_v2, %v88_v9  ;;  %v161_v27 = vadd.f32 %v513_v2, %v90_v15  ;;  %v93_v28 = vmul.f32 %v508_v1, %v22_v18  ;;  %v94_v29 = vmul.f32 %v508_v1, %v23_v19  ;;  %v26_v30 = vld [vmem:[%s1024_s0 + $0x60] sm:$0xff]  ;;  %v28_v36 = vld [vmem:[%s1024_s0 + $0x70] sm:$0xff]  ;;  %v29_v39 = vld [vmem:[%s1024_s0 + $0x78] sm:$0xff] }
   0x7   :  { %354 = vtanh.f32 %v156_v13  ;;  %v160_v25 = vadd.f32 %v513_v2, %v89_v14  ;;  %v162_v31 = vadd.f32 %v513_v2, %v91_v16  ;;  %v95_v32 = vmul.f32 %v508_v1, %v24_v24  ;;  %v30_v42 = vld [vmem:[%s1024_s0 + $0x80] sm:$0xff]  ;;  %v31_v45 = vld [vmem:[%s1024_s0 + $0x88] sm:$0xff]  ;;  %v32_v48 = vld [vmem:[%s1024_s0 + $0x90] sm:$0xff] }
   0x8   :  { %356 = vtanh.f32 %v157_v20  ;;  %v163_v34 = vadd.f32 %v513_v2, %v92_v23  ;;  %v96_v35 = vmul.f32 %v508_v1, %v25_v26  ;;  %v164_v37 = vadd.f32 %v513_v2, %v93_v28  ;;  %v33_v51 = vld [vmem:[%s1024_s0 + $0x98] sm:$0xff]  ;;  %v34_v54 = vld [vmem:[%s1024_s0 + $0xa0] sm:$0xff]  ;;  %v35_v57 = vld [vmem:[%s1024_s0 + $0xa8] sm:$0xff] }
   0x9   :  { %358 = vtanh.f32 %v158_v21  ;;  %v97_v38 = vmul.f32 %v508_v1, %v26_v30  ;;  %v165_v40 = vadd.f32 %v513_v2, %v94_v29  ;;  %v98_v41 = vmul.f32 %v508_v1, %v27_v33  ;;  %v36_v60 = vld [vmem:[%s1024_s0 + $0xb0] sm:$0xff]  ;;  %v37_v63 = vld [vmem:[%s1024_s0 + $0xb8] sm:$0xff]  ;;  %v38_v5 = vld [vmem:[%s1024_s0 + $0xc0] sm:$0xff] }
   0xa   :  { %360 = vtanh.f32 %v159_v22  ;;  %v166_v43 = vadd.f32 %v513_v2, %v95_v32  ;;  %v99_v44 = vmul.f32 %v508_v1, %v28_v36  ;;  %v167_v46 = vadd.f32 %v513_v2, %v96_v35  ;;  %v39_v9 = vld [vmem:[%s1024_s0 + $0xc8] sm:$0xff]  ;;  %v40_v13 = vld [vmem:[%s1024_s0 + $0xd0] sm:$0xff]  ;;  %v41_v17 = vld [vmem:[%s1024_s0 + $0xd8] sm:$0xff] }
   0xb   :  { %362 = vtanh.f32 %v160_v25  ;;  %v100_v47 = vmul.f32 %v508_v1, %v29_v39  ;;  %v168_v49 = vadd.f32 %v513_v2, %v97_v38  ;;  %v101_v50 = vmul.f32 %v508_v1, %v30_v42  ;;  %v42_v21 = vld [vmem:[%s1024_s0 + $0xe0] sm:$0xff]  ;;  %v43_v25 = vld [vmem:[%s1024_s0 + $0xe8] sm:$0xff]  ;;  %v44_v29 = vld [vmem:[%s1024_s0 + $0xf0] sm:$0xff] }
   0xc   :  { %364 = vtanh.f32 %v161_v27  ;;  %v169_v52 = vadd.f32 %v513_v2, %v98_v41  ;;  %v102_v53 = vmul.f32 %v508_v1, %v31_v45  ;;  %v170_v55 = vadd.f32 %v513_v2, %v99_v44  ;;  %v45_v33 = vld [vmem:[%s1024_s0 + $0xf8] sm:$0xff]  ;;  %v47_v41 = vld [vmem:[%s1024_s0 + $0x108] sm:$0xff]  ;;  %v48_v45 = vld [vmem:[%s1024_s0 + $0x110] sm:$0xff] }
   0xd   :  { %366 = vtanh.f32 %v162_v31  ;;  %v103_v56 = vmul.f32 %v508_v1, %v32_v48  ;;  %v171_v58 = vadd.f32 %v513_v2, %v100_v47  ;;  %v104_v59 = vmul.f32 %v508_v1, %v33_v51 }
   0xe   :  { %368 = vtanh.f32 %v163_v34  ;;  %v172_v61 = vadd.f32 %v513_v2, %v101_v50  ;;  %v105_v62 = vmul.f32 %v508_v1, %v34_v54  ;;  %v173_v3 = vadd.f32 %v513_v2, %v102_v53  ;;  %v50_v53 = vld [vmem:[%s1024_s0 + $0x120] sm:$0xff] }
   0xf   :  { %370 = vtanh.f32 %v164_v37  ;;  %v106_v4 = vmul.f32 %v508_v1, %v35_v57  ;;  %v174_v7 = vadd.f32 %v513_v2, %v103_v56  ;;  %v107_v8 = vmul.f32 %v508_v1, %v36_v60  ;;  %v46_v37 = vld [vmem:[%s1024_s0 + $0x100] sm:$0xff]  ;;  %v51_v57 = vld [vmem:[%s1024_s0 + $0x128] sm:$0xff] }
  0x10   :  { %372 = vtanh.f32 %v165_v40  ;;  %v175_v11 = vadd.f32 %v513_v2, %v104_v59  ;;  %v108_v12 = vmul.f32 %v508_v1, %v37_v63  ;;  %v176_v15 = vadd.f32 %v513_v2, %v105_v62 }
  0x11   :  { %374 = vtanh.f32 %v166_v43  ;;  %v109_v16 = vmul.f32 %v508_v1, %v38_v5  ;;  %v177_v19 = vadd.f32 %v513_v2, %v106_v4  ;;  %v110_v20 = vmul.f32 %v508_v1, %v39_v9 }
  0x12   :  { %376 = vtanh.f32 %v167_v46  ;;  %v178_v23 = vadd.f32 %v513_v2, %v107_v8  ;;  %v111_v24 = vmul.f32 %v508_v1, %v40_v13  ;;  %v179_v27 = vadd.f32 %v513_v2, %v108_v12 }
  0x13   :  { %378 = vtanh.f32 %v168_v49  ;;  %v112_v28 = vmul.f32 %v508_v1, %v41_v17  ;;  %v180_v31 = vadd.f32 %v513_v2, %v109_v16  ;;  %v113_v32 = vmul.f32 %v508_v1, %v42_v21  ;;  %v49_v49 = vld [vmem:[%s1024_s0 + $0x118] sm:$0xff] }
  0x14   :  { %v355_v0 = vpop.eup %354  ;;  %380 = vtanh.f32 %v169_v52  ;;  %v181_v35 = vadd.f32 %v513_v2, %v110_v20  ;;  %v114_v36 = vmul.f32 %v508_v1, %v43_v25  ;;  %v182_v39 = vadd.f32 %v513_v2, %v111_v24 }
  0x15   :  { %v357_v6 = vpop.eup %356  ;;  %284 = vst [vmem:[%s1027_s3] sm:$0xff] %v355_v0  ;;  %382 = vtanh.f32 %v170_v55  ;;  %v115_v40 = vmul.f32 %v508_v1, %v44_v29  ;;  %v183_v43 = vadd.f32 %v513_v2, %v112_v28  ;;  %v116_v44 = vmul.f32 %v508_v1, %v45_v33 }
  0x16   :  { %v359_v10 = vpop.eup %358  ;;  %285 = vst [vmem:[%s1027_s3 + $0x8] sm:$0xff] %v357_v6  ;;  %384 = vtanh.f32 %v171_v58  ;;  %v184_v47 = vadd.f32 %v513_v2, %v113_v32  ;;  %v117_v48 = vmul.f32 %v508_v1, %v46_v37  ;;  %v185_v51 = vadd.f32 %v513_v2, %v114_v36 }
  0x17   :  { %v361_v14 = vpop.eup %360  ;;  %286 = vst [vmem:[%s1027_s3 + $0x10] sm:$0xff] %v359_v10  ;;  %386 = vtanh.f32 %v172_v61  ;;  %v118_v52 = vmul.f32 %v508_v1, %v47_v41  ;;  %v186_v55 = vadd.f32 %v513_v2, %v115_v40  ;;  %v119_v56 = vmul.f32 %v508_v1, %v48_v45  ;;  %v52_v61 = vld [vmem:[%s1024_s0 + $0x130] sm:$0xff] }
  0x18   :  { %v363_v18 = vpop.eup %362  ;;  %287 = vst [vmem:[%s1027_s3 + $0x18] sm:$0xff] %v361_v14  ;;  %388 = vtanh.f32 %v173_v3  ;;  %v187_v59 = vadd.f32 %v513_v2, %v116_v44  ;;  %v120_v60 = vmul.f32 %v508_v1, %v49_v49  ;;  %v188_v63 = vadd.f32 %v513_v2, %v117_v48  ;;  %v53_v3 = vld [vmem:[%s1024_s0 + $0x138] sm:$0xff] }
  0x19   :  { %v365_v22 = vpop.eup %364  ;;  %288 = vst [vmem:[%s1027_s3 + $0x20] sm:$0xff] %v363_v18  ;;  %390 = vtanh.f32 %v174_v7  ;;  %v121_v0 = vmul.f32 %v508_v1, %v50_v53  ;;  %v189_v5 = vadd.f32 %v513_v2, %v118_v52  ;;  %v122_v6 = vmul.f32 %v508_v1, %v51_v57  ;;  %v54_v7 = vld [vmem:[%s1024_s0 + $0x140] sm:$0xff] }
  0x1a   :  { %v367_v26 = vpop.eup %366  ;;  %289 = vst [vmem:[%s1027_s3 + $0x28] sm:$0xff] %v365_v22  ;;  %392 = vtanh.f32 %v175_v11  ;;  %v190_v9 = vadd.f32 %v513_v2, %v119_v56  ;;  %v123_v10 = vmul.f32 %v508_v1, %v52_v61  ;;  %v55_v11 = vld [vmem:[%s1024_s0 + $0x148] sm:$0xff]  ;;  %v191_v13 = vadd.f32 %v513_v2, %v120_v60 }
  0x1b   :  { %v369_v30 = vpop.eup %368  ;;  %290 = vst [vmem:[%s1027_s3 + $0x30] sm:$0xff] %v367_v26  ;;  %394 = vtanh.f32 %v176_v15  ;;  %v124_v14 = vmul.f32 %v508_v1, %v53_v3  ;;  %v56_v15 = vld [vmem:[%s1024_s0 + $0x150] sm:$0xff]  ;;  %v192_v17 = vadd.f32 %v513_v2, %v121_v0  ;;  %v125_v18 = vmul.f32 %v508_v1, %v54_v7 }
  0x1c   :  { %v371_v34 = vpop.eup %370  ;;  %291 = vst [vmem:[%s1027_s3 + $0x38] sm:$0xff] %v369_v30  ;;  %396 = vtanh.f32 %v177_v19  ;;  %v57_v19 = vld [vmem:[%s1024_s0 + $0x158] sm:$0xff]  ;;  %v193_v21 = vadd.f32 %v513_v2, %v122_v6  ;;  %v126_v22 = vmul.f32 %v508_v1, %v55_v11  ;;  %v194_v25 = vadd.f32 %v513_v2, %v123_v10 }
  0x1d   :  { %v373_v38 = vpop.eup %372  ;;  %292 = vst [vmem:[%s1027_s3 + $0x40] sm:$0xff] %v371_v34  ;;  %398 = vtanh.f32 %v178_v23  ;;  %v58_v23 = vld [vmem:[%s1024_s0 + $0x160] sm:$0xff]  ;;  %v127_v26 = vmul.f32 %v508_v1, %v56_v15  ;;  %v195_v29 = vadd.f32 %v513_v2, %v124_v14  ;;  %v128_v30 = vmul.f32 %v508_v1, %v57_v19 }
  0x1e   :  { %v375_v42 = vpop.eup %374  ;;  %293 = vst [vmem:[%s1027_s3 + $0x48] sm:$0xff] %v373_v38  ;;  %400 = vtanh.f32 %v179_v27  ;;  %v59_v27 = vld [vmem:[%s1024_s0 + $0x168] sm:$0xff]  ;;  %v196_v33 = vadd.f32 %v513_v2, %v125_v18  ;;  %v129_v34 = vmul.f32 %v508_v1, %v58_v23  ;;  %v197_v37 = vadd.f32 %v513_v2, %v126_v22 }
  0x1f   :  { %v377_v46 = vpop.eup %376  ;;  %294 = vst [vmem:[%s1027_s3 + $0x50] sm:$0xff] %v375_v42  ;;  %402 = vtanh.f32 %v180_v31  ;;  %v60_v31 = vld [vmem:[%s1024_s0 + $0x170] sm:$0xff]  ;;  %v130_v38 = vmul.f32 %v508_v1, %v59_v27  ;;  %v198_v41 = vadd.f32 %v513_v2, %v127_v26  ;;  %v199_v45 = vadd.f32 %v513_v2, %v128_v30 }
  0x20   :  { %v379_v50 = vpop.eup %378  ;;  %295 = vst [vmem:[%s1027_s3 + $0x58] sm:$0xff] %v377_v46  ;;  %404 = vtanh.f32 %v181_v35  ;;  %v61_v35 = vld [vmem:[%s1024_s0 + $0x178] sm:$0xff]  ;;  %v131_v42 = vmul.f32 %v508_v1, %v60_v31  ;;  %v200_v49 = vadd.f32 %v513_v2, %v129_v34 }
  0x21   :  { %v381_v54 = vpop.eup %380  ;;  %296 = vst [vmem:[%s1027_s3 + $0x60] sm:$0xff] %v379_v50  ;;  %406 = vtanh.f32 %v182_v39  ;;  %v62_v39 = vld [vmem:[%s1024_s0 + $0x180] sm:$0xff]  ;;  %v132_v46 = vmul.f32 %v508_v1, %v61_v35  ;;  %v201_v53 = vadd.f32 %v513_v2, %v130_v38 }
  0x22   :  { %v383_v58 = vpop.eup %382  ;;  %297 = vst [vmem:[%s1027_s3 + $0x68] sm:$0xff] %v381_v54  ;;  %408 = vtanh.f32 %v183_v43  ;;  %v63_v43 = vld [vmem:[%s1024_s0 + $0x188] sm:$0xff]  ;;  %v133_v50 = vmul.f32 %v508_v1, %v62_v39  ;;  %v202_v57 = vadd.f32 %v513_v2, %v131_v42 }
  0x23   :  { %v385_v62 = vpop.eup %384  ;;  %298 = vst [vmem:[%s1027_s3 + $0x70] sm:$0xff] %v383_v58  ;;  %410 = vtanh.f32 %v184_v47  ;;  %v64_v47 = vld [vmem:[%s1024_s0 + $0x190] sm:$0xff]  ;;  %v134_v54 = vmul.f32 %v508_v1, %v63_v43  ;;  %v203_v61 = vadd.f32 %v513_v2, %v132_v46 }
  0x24   :  { %v387_v4 = vpop.eup %386  ;;  %299 = vst [vmem:[%s1027_s3 + $0x78] sm:$0xff] %v385_v62  ;;  %412 = vtanh.f32 %v185_v51  ;;  %v65_v51 = vld [vmem:[%s1024_s0 + $0x198] sm:$0xff]  ;;  %v135_v58 = vmul.f32 %v508_v1, %v64_v47  ;;  %v204_v3 = vadd.f32 %v513_v2, %v133_v50 }
  0x25   :  { %v389_v8 = vpop.eup %388  ;;  %300 = vst [vmem:[%s1027_s3 + $0x80] sm:$0xff] %v387_v4  ;;  %414 = vtanh.f32 %v186_v55  ;;  %v66_v55 = vld [vmem:[%s1024_s0 + $0x1a0] sm:$0xff]  ;;  %v136_v62 = vmul.f32 %v508_v1, %v65_v51  ;;  %v205_v7 = vadd.f32 %v513_v2, %v134_v54 }
  0x26   :  { %v391_v12 = vpop.eup %390  ;;  %301 = vst [vmem:[%s1027_s3 + $0x88] sm:$0xff] %v389_v8  ;;  %416 = vtanh.f32 %v187_v59  ;;  %v67_v59 = vld [vmem:[%s1024_s0 + $0x1a8] sm:$0xff]  ;;  %v137_v4 = vmul.f32 %v508_v1, %v66_v55  ;;  %v206_v11 = vadd.f32 %v513_v2, %v135_v58 }
  0x27   :  { %v393_v16 = vpop.eup %392  ;;  %302 = vst [vmem:[%s1027_s3 + $0x90] sm:$0xff] %v391_v12  ;;  %418 = vtanh.f32 %v188_v63  ;;  %v68_v63 = vld [vmem:[%s1024_s0 + $0x1b0] sm:$0xff]  ;;  %v138_v8 = vmul.f32 %v508_v1, %v67_v59  ;;  %v207_v15 = vadd.f32 %v513_v2, %v136_v62 }
  0x28   :  { %v395_v20 = vpop.eup %394  ;;  %303 = vst [vmem:[%s1027_s3 + $0x98] sm:$0xff] %v393_v16  ;;  %420 = vtanh.f32 %v189_v5  ;;  %v69_v5 = vld [vmem:[%s1024_s0 + $0x1b8] sm:$0xff]  ;;  %v139_v12 = vmul.f32 %v508_v1, %v68_v63  ;;  %v208_v19 = vadd.f32 %v513_v2, %v137_v4 }
  0x29   :  { %v397_v24 = vpop.eup %396  ;;  %304 = vst [vmem:[%s1027_s3 + $0xa0] sm:$0xff] %v395_v20  ;;  %422 = vtanh.f32 %v190_v9  ;;  %v70_v9 = vld [vmem:[%s1024_s0 + $0x1c0] sm:$0xff]  ;;  %v140_v16 = vmul.f32 %v508_v1, %v69_v5  ;;  %v209_v23 = vadd.f32 %v513_v2, %v138_v8 }
  0x2a   :  { %v399_v28 = vpop.eup %398  ;;  %305 = vst [vmem:[%s1027_s3 + $0xa8] sm:$0xff] %v397_v24  ;;  %424 = vtanh.f32 %v191_v13  ;;  %v71_v13 = vld [vmem:[%s1024_s0 + $0x1c8] sm:$0xff]  ;;  %v141_v20 = vmul.f32 %v508_v1, %v70_v9  ;;  %v210_v27 = vadd.f32 %v513_v2, %v139_v12 }
  0x2b   :  { %v401_v32 = vpop.eup %400  ;;  %306 = vst [vmem:[%s1027_s3 + $0xb0] sm:$0xff] %v399_v28  ;;  %426 = vtanh.f32 %v192_v17  ;;  %v72_v17 = vld [vmem:[%s1024_s0 + $0x1d0] sm:$0xff]  ;;  %v142_v24 = vmul.f32 %v508_v1, %v71_v13  ;;  %v211_v31 = vadd.f32 %v513_v2, %v140_v16 }
  0x2c   :  { %v403_v36 = vpop.eup %402  ;;  %307 = vst [vmem:[%s1027_s3 + $0xb8] sm:$0xff] %v401_v32  ;;  %428 = vtanh.f32 %v193_v21  ;;  %v73_v21 = vld [vmem:[%s1024_s0 + $0x1d8] sm:$0xff]  ;;  %v143_v28 = vmul.f32 %v508_v1, %v72_v17  ;;  %v212_v35 = vadd.f32 %v513_v2, %v141_v20 }
  0x2d   :  { %v405_v40 = vpop.eup %404  ;;  %308 = vst [vmem:[%s1027_s3 + $0xc0] sm:$0xff] %v403_v36  ;;  %430 = vtanh.f32 %v194_v25  ;;  %v74_v25 = vld [vmem:[%s1024_s0 + $0x1e0] sm:$0xff]  ;;  %v144_v32 = vmul.f32 %v508_v1, %v73_v21  ;;  %v213_v39 = vadd.f32 %v513_v2, %v142_v24 }
  0x2e   :  { %v407_v44 = vpop.eup %406  ;;  %309 = vst [vmem:[%s1027_s3 + $0xc8] sm:$0xff] %v405_v40  ;;  %432 = vtanh.f32 %v195_v29  ;;  %v75_v29 = vld [vmem:[%s1024_s0 + $0x1e8] sm:$0xff]  ;;  %v145_v36 = vmul.f32 %v508_v1, %v74_v25  ;;  %v214_v42 = vadd.f32 %v513_v2, %v143_v28 }
  0x2f   :  { %v409_v48 = vpop.eup %408  ;;  %310 = vst [vmem:[%s1027_s3 + $0xd0] sm:$0xff] %v407_v44  ;;  %434 = vtanh.f32 %v196_v33  ;;  %v76_v33 = vld [vmem:[%s1024_s0 + $0x1f0] sm:$0xff]  ;;  %v146_v40 = vmul.f32 %v508_v1, %v75_v29 }
  0x30   :  { %v411_v52 = vpop.eup %410  ;;  %311 = vst [vmem:[%s1027_s3 + $0xd8] sm:$0xff] %v409_v48  ;;  %436 = vtanh.f32 %v197_v37  ;;  %v77_v37 = vld [vmem:[%s1024_s0 + $0x1f8] sm:$0xff]  ;;  %v147_v43 = vmul.f32 %v508_v1, %v76_v33  ;;  %v216_v48 = vadd.f32 %v513_v2, %v145_v36 }
  0x31   :  { %v413_v56 = vpop.eup %412  ;;  %312 = vst [vmem:[%s1027_s3 + $0xe0] sm:$0xff] %v411_v52  ;;  %438 = vtanh.f32 %v198_v41  ;;  %v148_v46 = vmul.f32 %v508_v1, %v77_v37  ;;  %v217_v50 = vadd.f32 %v513_v2, %v146_v40 }
  0x32   :  { %v415_v60 = vpop.eup %414  ;;  %313 = vst [vmem:[%s1027_s3 + $0xe8] sm:$0xff] %v413_v56  ;;  %440 = vtanh.f32 %v199_v45  ;;  %v215_v45 = vadd.f32 %v513_v2, %v144_v32  ;;  %v218_v1 = vadd.f32 %v513_v2, %v147_v43 }
  0x33   :  { %v417_v0 = vpop.eup %416  ;;  %314 = vst [vmem:[%s1027_s3 + $0xf0] sm:$0xff] %v415_v60  ;;  %442 = vtanh.f32 %v200_v49 }
  0x34   :  { %v419_v6 = vpop.eup %418  ;;  %315 = vst [vmem:[%s1027_s3 + $0xf8] sm:$0xff] %v417_v0  ;;  %444 = vtanh.f32 %v201_v53  ;;  %v219_v53 = vadd.f32 %v513_v2, %v148_v46 }
  0x35   :  { %v421_v10 = vpop.eup %420  ;;  %316 = vst [vmem:[%s1027_s3 + $0x100] sm:$0xff] %v419_v6  ;;  %446 = vtanh.f32 %v202_v57 }
  0x36   :  { %v423_v14 = vpop.eup %422  ;;  %317 = vst [vmem:[%s1027_s3 + $0x108] sm:$0xff] %v421_v10  ;;  %448 = vtanh.f32 %v203_v61 }
  0x37   :  { %v425_v18 = vpop.eup %424  ;;  %318 = vst [vmem:[%s1027_s3 + $0x110] sm:$0xff] %v423_v14  ;;  %450 = vtanh.f32 %v204_v3 }
  0x38   :  { %v427_v22 = vpop.eup %426  ;;  %319 = vst [vmem:[%s1027_s3 + $0x118] sm:$0xff] %v425_v18  ;;  %452 = vtanh.f32 %v205_v7 }
  0x39   :  { %v429_v26 = vpop.eup %428  ;;  %320 = vst [vmem:[%s1027_s3 + $0x120] sm:$0xff] %v427_v22  ;;  %454 = vtanh.f32 %v206_v11 }
  0x3a   :  { %v431_v30 = vpop.eup %430  ;;  %321 = vst [vmem:[%s1027_s3 + $0x128] sm:$0xff] %v429_v26  ;;  %456 = vtanh.f32 %v207_v15 }
  0x3b   :  { %v433_v34 = vpop.eup %432  ;;  %322 = vst [vmem:[%s1027_s3 + $0x130] sm:$0xff] %v431_v30  ;;  %458 = vtanh.f32 %v208_v19 }
  0x3c   :  { %v435_v38 = vpop.eup %434  ;;  %323 = vst [vmem:[%s1027_s3 + $0x138] sm:$0xff] %v433_v34  ;;  %460 = vtanh.f32 %v209_v23 }
  0x3d   :  { %v437_v41 = vpop.eup %436  ;;  %324 = vst [vmem:[%s1027_s3 + $0x140] sm:$0xff] %v435_v38  ;;  %462 = vtanh.f32 %v210_v27 }
  0x3e   :  { %v439_v44 = vpop.eup %438  ;;  %325 = vst [vmem:[%s1027_s3 + $0x148] sm:$0xff] %v437_v41  ;;  %464 = vtanh.f32 %v211_v31 }
  0x3f   :  { %v441_v47 = vpop.eup %440  ;;  %326 = vst [vmem:[%s1027_s3 + $0x150] sm:$0xff] %v439_v44  ;;  %466 = vtanh.f32 %v212_v35 }
  0x40   :  { %v443_v49 = vpop.eup %442  ;;  %327 = vst [vmem:[%s1027_s3 + $0x158] sm:$0xff] %v441_v47  ;;  %468 = vtanh.f32 %v213_v39 }
  0x41   :  { %v445_v51 = vpop.eup %444  ;;  %328 = vst [vmem:[%s1027_s3 + $0x160] sm:$0xff] %v443_v49  ;;  %470 = vtanh.f32 %v214_v42 }
  0x42   :  { %v447_v52 = vpop.eup %446  ;;  %329 = vst [vmem:[%s1027_s3 + $0x168] sm:$0xff] %v445_v51  ;;  %472 = vtanh.f32 %v215_v45 }
  0x43   :  { %v449_v54 = vpop.eup %448  ;;  %330 = vst [vmem:[%s1027_s3 + $0x170] sm:$0xff] %v447_v52  ;;  %474 = vtanh.f32 %v216_v48 }
  0x44   :  { %v451_v55 = vpop.eup %450  ;;  %331 = vst [vmem:[%s1027_s3 + $0x178] sm:$0xff] %v449_v54  ;;  %476 = vtanh.f32 %v217_v50 }
  0x45   :  { %v453_v56 = vpop.eup %452  ;;  %332 = vst [vmem:[%s1027_s3 + $0x180] sm:$0xff] %v451_v55  ;;  %478 = vtanh.f32 %v218_v1 }
  0x46   :  { %v455_v57 = vpop.eup %454  ;;  %333 = vst [vmem:[%s1027_s3 + $0x188] sm:$0xff] %v453_v56  ;;  %480 = vtanh.f32 %v219_v53 }
  0x47   :  { %v457_v2 = vpop.eup %456  ;;  %334 = vst [vmem:[%s1027_s3 + $0x190] sm:$0xff] %v455_v57 }
  0x48   :  { %v459_v58 = vpop.eup %458  ;;  %335 = vst [vmem:[%s1027_s3 + $0x198] sm:$0xff] %v457_v2 }
  0x49   :  { %v461_v59 = vpop.eup %460  ;;  %336 = vst [vmem:[%s1027_s3 + $0x1a0] sm:$0xff] %v459_v58 }
  0x4a   :  { %v463_v60 = vpop.eup %462  ;;  %337 = vst [vmem:[%s1027_s3 + $0x1a8] sm:$0xff] %v461_v59 }
  0x4b   :  { %v465_v61 = vpop.eup %464  ;;  %338 = vst [vmem:[%s1027_s3 + $0x1b0] sm:$0xff] %v463_v60 }
  0x4c   :  { %v467_v62 = vpop.eup %466  ;;  %339 = vst [vmem:[%s1027_s3 + $0x1b8] sm:$0xff] %v465_v61 }
  0x4d   :  { %v469_v63 = vpop.eup %468  ;;  %340 = vst [vmem:[%s1027_s3 + $0x1c0] sm:$0xff] %v467_v62 }
  0x4e   :  { %v471_v0 = vpop.eup %470  ;;  %341 = vst [vmem:[%s1027_s3 + $0x1c8] sm:$0xff] %v469_v63 }
  0x4f   :  { %v473_v3 = vpop.eup %472  ;;  %342 = vst [vmem:[%s1027_s3 + $0x1d0] sm:$0xff] %v471_v0 }
  0x50   :  { %v475_v4 = vpop.eup %474  ;;  %343 = vst [vmem:[%s1027_s3 + $0x1d8] sm:$0xff] %v473_v3 }
  0x51   :  { %v477_v5 = vpop.eup %476  ;;  %344 = vst [vmem:[%s1027_s3 + $0x1e0] sm:$0xff] %v475_v4 }
  0x52   :  { %v479_v6 = vpop.eup %478  ;;  %345 = vst [vmem:[%s1027_s3 + $0x1e8] sm:$0xff] %v477_v5 }
  0x53   :  { %v481_v7 = vpop.eup %480  ;;  %346 = vst [vmem:[%s1027_s3 + $0x1f0] sm:$0xff] %v479_v6 }
  0x54   :  { %347 = vst [vmem:[%s1027_s3 + $0x1f8] sm:$0xff] %v481_v7 }

</bundles_post_ra>
